<compile_context>
chip_gen: v5e
topology: v5e:2x2
jax: 0.10.0
libtpu: 0.0.40
codegen_flags: <defaults>
</compile_context>

<pallas_src>
import functools
import math

import jax
import jax.numpy as jnp
from jax import lax
from jax.experimental import pallas as pl
from jax.experimental.pallas import tpu as pltpu

MLP_SCALE = 4
LN_EPS = 1e-5
NEG_INF = -1e30


# --------------------------------------------------------------------------- #
# small math helpers (shared by kernel and pure-JAX reference)
# --------------------------------------------------------------------------- #
def _layernorm(x, g, b, eps=LN_EPS):
    mu = jnp.mean(x, axis=-1, keepdims=True)
    var = jnp.mean((x - mu) ** 2, axis=-1, keepdims=True)
    return (x - mu) * lax.rsqrt(var + eps) * g + b


def _gelu_tanh(x):
    c = jnp.sqrt(2.0 / jnp.pi).astype(x.dtype)
    return 0.5 * x * (1.0 + jnp.tanh(c * (x + 0.044715 * x * x * x)))


def _row_std_sum(x):
    # sum over rows of the unbiased (ddof=1) per-row std, matching torch .std(dim=-1)
    n = x.shape[-1]
    mu = jnp.mean(x, axis=-1, keepdims=True)
    var = jnp.sum((x - mu) ** 2, axis=-1, keepdims=True) / jnp.float32(n - 1)
    return jnp.sum(jnp.sqrt(var), keepdims=True)            # (1, 1)


# --------------------------------------------------------------------------- #
# kernel
# --------------------------------------------------------------------------- #
def ben_block_kernel(n_head, mlp_chunk,
                     x_q_ref, x_kv_ref,
                     g1_ref, b1_ref,
                     wk_ref, wq_ref, wv_ref, wpj_ref, bpj_ref,
                     g2_ref, b2_ref, wfc_ref, bfc_ref, wmp_ref,
                     out_ref, stats_ref,
                     q_hm_ref, m_ref, l_ref, acc_ref):
    qi = pl.program_id(1)          # Q tile index
    ki = pl.program_id(2)          # KV tile index (tile_kv == tile_q)
    _, tile, C = x_q_ref.shape
    hd = C // n_head
    H = wfc_ref.shape[1]
    scale = float(hd) ** -0.5
    rows8 = lax.broadcasted_iota(jnp.int32, (8, 128), 0)

    def to_heads(t2d):             # (tile, C) -> (n_head, tile, hd), one relayout
        return jnp.transpose(t2d.reshape(tile, n_head, hd), (1, 0, 2))

    # ---- first KV step of this Q tile: ln_1, q projection, accumulator init ----
    @pl.when(ki == 0)
    def _init():
        x_q = x_q_ref[0]
        y = _layernorm(x_q, g1_ref[0], b1_ref[0])                      # f32
        stats_ref[0, 0] = jnp.where(rows8 == 0, _row_std_sum(y), 0.0)  # row 0 = y std sum
        q = jnp.dot(y.astype(jnp.bfloat16), wq_ref[...],
                    preferred_element_type=jnp.float32) * scale        # scale once on (tile,C)
        q_hm_ref[...] = to_heads(q).astype(jnp.bfloat16)
        m_ref[...] = jnp.full(m_ref.shape, NEG_INF, jnp.float32)
        l_ref[...] = jnp.zeros(l_ref.shape, jnp.float32)
        acc_ref[...] = jnp.zeros(acc_ref.shape, jnp.float32)

    # ---- online softmax over this KV tile; fully-future tiles are skipped ----
    @pl.when(ki <= qi)
    def _attend():
        x_k = x_kv_ref[0]
        yk = _layernorm(x_k, g1_ref[0], b1_ref[0]).astype(jnp.bfloat16)
        k = jnp.dot(yk, wk_ref[...], preferred_element_type=jnp.float32)
        v = jnp.dot(yk, wv_ref[...], preferred_element_type=jnp.float32)
        k_hm = to_heads(k).astype(jnp.bfloat16)
        v_hm = to_heads(v).astype(jnp.bfloat16)

        # batched over heads; contracts the last dim of both operands (no .T)
        s = jnp.einsum('hqd,hkd->hqk', q_hm_ref[...], k_hm,
                       preferred_element_type=jnp.float32)             # (nh, tile, tile)
        row_g = qi * tile + lax.broadcasted_iota(jnp.int32, (tile, tile), 0)
        col_g = ki * tile + lax.broadcasted_iota(jnp.int32, (tile, tile), 1)
        s = jnp.where((col_g <= row_g)[None, :, :], s, NEG_INF)

        m_new = jnp.maximum(m_ref[...], jnp.max(s, axis=-1, keepdims=True))
        alpha = jnp.exp(m_ref[...] - m_new)
        p = jnp.exp(s - m_new)
        l_ref[...] = alpha * l_ref[...] + jnp.sum(p, axis=-1, keepdims=True)
        acc_ref[...] = alpha * acc_ref[...] + jnp.einsum(
            'hqk,hkd->hqd', p.astype(jnp.bfloat16), v_hm,
            preferred_element_type=jnp.float32)
        m_ref[...] = m_new

    # ---- last visited KV tile (the diagonal): c_proj + MLP + residual ----
    @pl.when(ki == qi)
    def _finalize():
        x_q = x_q_ref[0]
        # deferred normalization: scale (nh, tile, hd), not (nh, tile, tile)
        o = acc_ref[...] * pl.reciprocal(l_ref[...], approx=True)
        o = jnp.transpose(o, (1, 0, 2)).reshape(tile, C)               # concat heads
        attn = jnp.dot(o.astype(jnp.bfloat16), wpj_ref[...],
                       preferred_element_type=jnp.float32) + bpj_ref[0]

        inp = _layernorm(x_q + attn, g2_ref[0], b2_ref[0]).astype(jnp.bfloat16)
        mlp = jnp.zeros((tile, C), jnp.float32)
        for j in range(H // mlp_chunk):                                # H-chunked MLP
            lo, hi = j * mlp_chunk, (j + 1) * mlp_chunk
            h1 = jnp.dot(inp, wfc_ref[:, lo:hi],
                         preferred_element_type=jnp.float32) + bfc_ref[0, lo:hi]
            h1 = _gelu_tanh(h1)
            mlp = mlp + jnp.dot(h1.astype(jnp.bfloat16), wmp_ref[lo:hi, :],
                                preferred_element_type=jnp.float32)
        machine = mlp + attn

        stats_ref[0, 0] = (stats_ref[0, 0]
                           + jnp.where(rows8 == 1, _row_std_sum(attn), 0.0)
                           + jnp.where(rows8 == 2, _row_std_sum(machine), 0.0))
        out_ref[0] = x_q + machine


# --------------------------------------------------------------------------- #
# wrapper
# --------------------------------------------------------------------------- #
def _pick_tile(n, target, multiple=8):
    if n <= target:
        return n
    for t in range(target, multiple - 1, -1):
        if n % t == 0 and t % multiple == 0:
            return t
    return n


def _vmem_capacity_bytes():
    try:
        info = pltpu.get_tpu_info()
        cap = getattr(info, "vmem_capacity_bytes", None)
        if cap:
            return int(cap)
    except Exception:
        pass
    return 64 * 2 ** 20                       # conservative (v7x per-core)


def _vmem_limit_bytes(tile, C, H, n_head, mlp_chunk):
    f32, bf16, lane = 4, 2, 128
    hd = C // n_head
    hdp = ((hd + lane - 1) // lane) * lane    # lane padding of head-major slabs
    io = 3 * 2 * tile * C * f32 + 2 * 8 * lane * f32        # x_q/x_kv/out (2x-buffered) + stats
    w = bf16 * (4 * C * C + 2 * C * H) + f32 * (5 * C + H)  # single-buffered weights + ln/bias
    scr = (bf16 + f32) * n_head * tile * hdp + 2 * f32 * n_head * tile * lane
    act = 8 * tile * C * f32                                # y/k/v/o/attn/inp/mlp/machine slabs
    act += 2 * n_head * tile * hdp * bf16                   # k_hm, v_hm
    act += 2 * n_head * tile * tile * f32                   # s and p
    act += 3 * tile * mlp_chunk * f32                       # h1 chunk (f32 + bf16 copy)
    need = int(1.25 * (io + w + scr + act))
    cap = int(0.85 * _vmem_capacity_bytes())                # ~15% headroom (review)
    return max(min(need, cap), 32 * 2 ** 20)


def ben_block(x, params, *, n_head, n_layer, tile_t=None, mlp_chunk=None):
    x = x.astype(jnp.float32)
    B, T, C = x.shape
    assert C % n_head == 0
    H = MLP_SCALE * C
    tile = tile_t if tile_t is not None else _pick_tile(T, 256)
    assert T % tile == 0
    nq = T // tile
    hc = mlp_chunk if mlp_chunk is not None else _pick_tile(H, 512, multiple=128)
    assert H % hc == 0

    bf16, f32 = jnp.bfloat16, jnp.float32
    # .astype is a no-op when params were already stored bf16 by init_params
    w_k = params["w_k"].astype(bf16)
    w_q = params["w_q"].astype(bf16)
    w_v = params["w_val"].astype(bf16)
    w_pj = params["w_proj"].astype(bf16)
    w_fc = params["w_fc"].astype(bf16)
    w_mp = params["w_mp"].astype(bf16)
    ln1_g, ln1_b = params["ln1_g"].astype(f32), params["ln1_b"].astype(f32)
    ln2_g, ln2_b = params["ln2_g"].astype(f32), params["ln2_b"].astype(f32)
    b_pj, b_fc = params["b_proj"].astype(f32), params["b_fc"].astype(f32)

    kernel = functools.partial(ben_block_kernel, n_head, hc)

    xq_spec = pl.BlockSpec((1, tile, C), lambda b, qi, ki: (b, qi, 0))
    # clamp skipped (fully-future) KV tiles onto the previous block -> no extra DMA
    xkv_spec = pl.BlockSpec((1, tile, C), lambda b, qi, ki: (b, jnp.minimum(ki, qi), 0))
    stats_spec = pl.BlockSpec((1, 1, 8, 128), lambda b, qi, ki: (b, qi, 0, 0))

    out_shape = (jax.ShapeDtypeStruct((B, T, C), jnp.float32),
                 jax.ShapeDtypeStruct((B, nq, 8, 128), jnp.float32))

    def _run(single_buffer_weights):
        pm = {}
        if single_buffer_weights:
            pm = {"pipeline_mode": pl.Buffered(buffer_count=1)}   # grid-invariant weights
        wspec = lambda r, c: pl.BlockSpec((r, c), lambda b, qi, ki: (0, 0), **pm)
        vspec = lambda d: pl.BlockSpec((1, d), lambda b, qi, ki: (0, 0), **pm)
        return pl.pallas_call(
            kernel,
            out_shape=out_shape,
            grid_spec=pltpu.PrefetchScalarGridSpec(
                num_scalar_prefetch=0,
                grid=(B, nq, nq),
                in_specs=[xq_spec, xkv_spec,
                          vspec(C), vspec(C),            # ln_1 gamma / beta
                          wspec(C, C), wspec(C, C),      # c_attn: k half, q half
                          wspec(C, C),                   # c_attn_value
                          wspec(C, C), vspec(C),         # c_proj (attn) w / b
                          vspec(C), vspec(C),            # ln_2 gamma / beta
                          wspec(C, H), vspec(H),         # c_fc w / b
                          wspec(H, C)],                  # c_proj (mlp) w
                out_specs=[xq_spec, stats_spec],
                scratch_shapes=[
                    pltpu.VMEM((n_head, tile, C // n_head), jnp.bfloat16),  # q head-major
                    pltpu.VMEM((n_head, tile, 1), jnp.float32),             # running max
                    pltpu.VMEM((n_head, tile, 1), jnp.float32),             # running sum
                    pltpu.VMEM((n_head, tile, C // n_head), jnp.float32)]), # o accumulator
            compiler_params=pltpu.CompilerParams(
                dimension_semantics=("parallel", "parallel", "arbitrary"),
                vmem_limit_bytes=_vmem_limit_bytes(tile, C, H, n_head, hc)),
        )(x, x,
          ln1_g, ln1_b,
          w_k, w_q, w_v, w_pj, b_pj,
          ln2_g, ln2_b, w_fc, b_fc, w_mp)

    try:
        newx, stats = _run(True)
    except Exception:
        # graceful degradation if this JAX build rejects pl.Buffered(1)
        newx, stats = _run(False)

    denom = jnp.float32(B * T)
    metadata = {
        "_norm_attn": jnp.sum(stats[:, :, 1, 0]) / denom / n_layer,
        "_norm_y": jnp.sum(stats[:, :, 0, 0]) / denom / n_layer,
        "_norm_x": jnp.std(x, axis=-1, ddof=1).mean() / n_layer,
        "_norm_output": jnp.sum(stats[:, :, 2, 0]) / denom / n_layer,
        # xWeights is torch.ones(B, T, 1) in this config -> mean is exactly 1
        "_frac_noop": jnp.float32(1.0) / n_layer,
    }
    return newx, metadata


# --------------------------------------------------------------------------- #
# params + pure-JAX reference (tolerance check, per review correctness notes)
# --------------------------------------------------------------------------- #
def init_params(key, C, *, weight_dtype=jnp.bfloat16):
    # Weights stored in (in, out) layout, cast to bf16 once here (review item).
    # NOTE for torch checkpoints: c_attn.weight must be split k-first, q-second
    # (torch: k, q = kq.split(n_embd, dim=2)).
    H = MLP_SCALE * C
    ks = jax.random.split(key, 6)
    std = 0.02

    def w(k, r, c):
        return (std * jax.random.normal(k, (r, c), jnp.float32)).astype(weight_dtype)

    return {
        "ln1_g": jnp.ones((1, C), jnp.float32),
        "ln1_b": jnp.zeros((1, C), jnp.float32),
        "w_k": w(ks[0], C, C),
        "w_q": w(ks[1], C, C),
        "w_val": w(ks[2], C, C),
        "w_proj": w(ks[3], C, C),
        "b_proj": jnp.zeros((1, C), jnp.float32),
        "ln2_g": jnp.ones((1, C), jnp.float32),
        "ln2_b": jnp.zeros((1, C), jnp.float32),
        "w_fc": w(ks[4], C, H),
        "b_fc": jnp.zeros((1, H), jnp.float32),
        "w_mp": w(ks[5], H, C),
    }


def ben_block_reference(x, params, *, n_head, n_layer):
    x = x.astype(jnp.float32)
    B, T, C = x.shape
    hd = C // n_head
    f = lambda a: a.astype(jnp.float32)

    y = _layernorm(x, f(params["ln1_g"])[0], f(params["ln1_b"])[0])
    k = y @ f(params["w_k"])
    q = y @ f(params["w_q"])
    v = y @ f(params["w_val"])
    split = lambda t: t.reshape(B, T, n_head, hd).transpose(0, 2, 1, 3)
    qh, kh, vh = split(q), split(k), split(v)
    s = (qh @ kh.transpose(0, 1, 3, 2)) / math.sqrt(hd)
    causal = jnp.tril(jnp.ones((T, T), bool))
    s = jnp.where(causal, s, -jnp.inf)
    p = jax.nn.softmax(s, axis=-1)
    o = (p @ vh).transpose(0, 2, 1, 3).reshape(B, T, C)
    attn = o @ f(params["w_proj"]) + f(params["b_proj"])[0]
    inp = _layernorm(x + attn, f(params["ln2_g"])[0], f(params["ln2_b"])[0])
    h = _gelu_tanh(inp @ f(params["w_fc"]) + f(params["b_fc"])[0])
    machine = h @ f(params["w_mp"]) + attn
    newx = x + machine
    metadata = {
        "_norm_attn": jnp.std(attn, axis=-1, ddof=1).mean() / n_layer,
        "_norm_y": jnp.std(y, axis=-1, ddof=1).mean() / n_layer,
        "_norm_x": jnp.std(x, axis=-1, ddof=1).mean() / n_layer,
        "_norm_output": jnp.std(machine, axis=-1, ddof=1).mean() / n_layer,
        "_frac_noop": jnp.float32(1.0) / n_layer,
    }
    return newx, metadata


def _check(name, got, want, atol, rtol=0.0):
    diff = jnp.abs(got - want)
    ok = bool(jnp.all(diff <= atol + rtol * jnp.abs(want)))
    assert ok, f"{name}: max abs err {float(jnp.max(diff)):.3e} exceeds tolerance"


if __name__ == "__main__":
    k0, k1, k2, k3 = jax.random.split(jax.random.PRNGKey(0), 4)
    n_layer = 4

    # Case 1: small single-tile shapes.
    B, T, C, n_head = 2, 8, 32, 4
    x = jax.random.normal(k0, (B, T, C), jnp.float32)
    params = init_params(k1, C)
    newx, meta = ben_block(x, params, n_head=n_head, n_layer=n_layer)
    jax.block_until_ready(newx)
    ref_x, ref_meta = ben_block_reference(x, params, n_head=n_head, n_layer=n_layer)
    _check("newx", newx, ref_x, atol=3e-2, rtol=3e-2)
    for s in ("_norm_attn", "_norm_y", "_norm_x", "_norm_output", "_frac_noop"):
        _check(s, meta[s], ref_meta[s], atol=2e-2)

    # Case 2: exercises the multi Q/KV-tile flash path + H-chunked MLP.
    B2, T2, C2, n_head2 = 1, 32, 64, 4
    x2 = jax.random.normal(k2, (B2, T2, C2), jnp.float32)
    params2 = init_params(k3, C2)
    newx2, meta2 = ben_block(x2, params2, n_head=n_head2, n_layer=n_layer,
                             tile_t=16, mlp_chunk=128)
    jax.block_until_ready(newx2)
    ref_x2, _ = ben_block_reference(x2, params2, n_head=n_head2, n_layer=n_layer)
    _check("newx(tiled)", newx2, ref_x2, atol=3e-2, rtol=3e-2)

    jax.block_until_ready(jax.tree_util.tree_leaves(meta))
    print("KERNEL_OK")
</pallas_src>

<mosaic_0001>
module attributes {stable_mosaic.version = 11 : i64} {
  func.func @ben_block_kernel(%arg0: i32, %arg1: i32, %arg2: i32, %arg3: memref<1x8x32xf32, #tpu.memory_space<vmem>>, %arg4: memref<1x8x32xf32, #tpu.memory_space<vmem>>, %arg5: memref<1x32xf32, #tpu.memory_space<vmem>>, %arg6: memref<1x32xf32, #tpu.memory_space<vmem>>, %arg7: memref<32x32xbf16, #tpu.memory_space<vmem>>, %arg8: memref<32x32xbf16, #tpu.memory_space<vmem>>, %arg9: memref<32x32xbf16, #tpu.memory_space<vmem>>, %arg10: memref<32x32xbf16, #tpu.memory_space<vmem>>, %arg11: memref<1x32xf32, #tpu.memory_space<vmem>>, %arg12: memref<1x32xf32, #tpu.memory_space<vmem>>, %arg13: memref<1x32xf32, #tpu.memory_space<vmem>>, %arg14: memref<32x128xbf16, #tpu.memory_space<vmem>>, %arg15: memref<1x128xf32, #tpu.memory_space<vmem>>, %arg16: memref<128x32xbf16, #tpu.memory_space<vmem>>, %arg17: memref<1x8x32xf32, #tpu.memory_space<vmem>>, %arg18: memref<1x1x8x128xf32, #tpu.memory_space<vmem>>, %arg19: memref<4x8x8xbf16, #tpu.memory_space<vmem>>, %arg20: memref<4x8x1xf32, #tpu.memory_space<vmem>>, %arg21: memref<4x8x1xf32, #tpu.memory_space<vmem>>, %arg22: memref<4x8x8xf32, #tpu.memory_space<vmem>>) attributes {dimension_semantics = [#tpu.dimension_semantics<parallel>, #tpu.dimension_semantics<parallel>, #tpu.dimension_semantics<arbitrary>], iteration_bounds = array<i64: 2, 1, 1>, scalar_prefetch = 0 : i64, scratch_operands = 4 : i64, tpu.core_type = #tpu.core_type<tc>, window_params = [{transform_indices = @transform_0, window_bounds = array<i64: 1, 8, 32>}, {transform_indices = @transform_1, window_bounds = array<i64: 1, 8, 32>}, {pipeline_mode = #tpu.pipeline_mode<synchronous>, transform_indices = @transform_2, window_bounds = array<i64: 1, 32>}, {pipeline_mode = #tpu.pipeline_mode<synchronous>, transform_indices = @transform_3, window_bounds = array<i64: 1, 32>}, {pipeline_mode = #tpu.pipeline_mode<synchronous>, transform_indices = @transform_4, window_bounds = array<i64: 32, 32>}, {pipeline_mode = #tpu.pipeline_mode<synchronous>, transform_indices = @transform_5, window_bounds = array<i64: 32, 32>}, {pipeline_mode = #tpu.pipeline_mode<synchronous>, transform_indices = @transform_6, window_bounds = array<i64: 32, 32>}, {pipeline_mode = #tpu.pipeline_mode<synchronous>, transform_indices = @transform_7, window_bounds = array<i64: 32, 32>}, {pipeline_mode = #tpu.pipeline_mode<synchronous>, transform_indices = @transform_8, window_bounds = array<i64: 1, 32>}, {pipeline_mode = #tpu.pipeline_mode<synchronous>, transform_indices = @transform_9, window_bounds = array<i64: 1, 32>}, {pipeline_mode = #tpu.pipeline_mode<synchronous>, transform_indices = @transform_10, window_bounds = array<i64: 1, 32>}, {pipeline_mode = #tpu.pipeline_mode<synchronous>, transform_indices = @transform_11, window_bounds = array<i64: 32, 128>}, {pipeline_mode = #tpu.pipeline_mode<synchronous>, transform_indices = @transform_12, window_bounds = array<i64: 1, 128>}, {pipeline_mode = #tpu.pipeline_mode<synchronous>, transform_indices = @transform_13, window_bounds = array<i64: 128, 32>}, {transform_indices = @transform_14, window_bounds = array<i64: 1, 8, 32>}, {transform_indices = @transform_15, window_bounds = array<i64: 1, 1, 8, 128>}]} {
    %0 = tpu.iota {dimensions = array<i32: 0>} : vector<8x128xi32>
    %c0_i32 = arith.constant 0 : i32
    %1 = arith.cmpi eq, %arg2, %c0_i32 : i32
    %2 = arith.extui %1 : i1 to i32
    %c0_i32_0 = arith.constant 0 : i32
    %3 = arith.cmpi ne, %2, %c0_i32_0 : i32
    scf.if %3 {
      %c0 = arith.constant 0 : index
      %c0_3 = arith.constant 0 : index
      %c0_4 = arith.constant 0 : index
      %10 = vector.load %arg3[%c0, %c0_3, %c0_4] : memref<1x8x32xf32, #tpu.memory_space<vmem>>, vector<1x8x32xf32>
      %11 = vector.shape_cast %10 : vector<1x8x32xf32> to vector<8x32xf32>
      %c0_5 = arith.constant 0 : index
      %c0_6 = arith.constant 0 : index
      %12 = vector.load %arg5[%c0_5, %c0_6] : memref<1x32xf32, #tpu.memory_space<vmem>>, vector<1x32xf32>
      %13 = vector.shape_cast %12 : vector<1x32xf32> to vector<32xf32>
      %c0_7 = arith.constant 0 : index
      %c0_8 = arith.constant 0 : index
      %14 = vector.load %arg6[%c0_7, %c0_8] : memref<1x32xf32, #tpu.memory_space<vmem>>, vector<1x32xf32>
      %15 = vector.shape_cast %14 : vector<1x32xf32> to vector<32xf32>
      %cst = arith.constant dense<0.000000e+00> : vector<8xf32>
      %16 = vector.multi_reduction <add>, %11, %cst [1] : vector<8x32xf32> to vector<8xf32>
      %17 = vector.shape_cast %16 : vector<8xf32> to vector<8x1xf32>
      %cst_9 = arith.constant 3.200000e+01 : f32
      %18 = vector.broadcast %cst_9 : f32 to vector<8x1xf32>
      %19 = arith.divf %17, %18 : vector<8x1xf32>
      %20 = vector.broadcast %19 : vector<8x1xf32> to vector<8x32xf32>
      %21 = arith.subf %11, %20 : vector<8x32xf32>
      %22 = arith.mulf %21, %21 : vector<8x32xf32>
      %cst_10 = arith.constant dense<0.000000e+00> : vector<8xf32>
      %23 = vector.multi_reduction <add>, %22, %cst_10 [1] : vector<8x32xf32> to vector<8xf32>
      %24 = vector.shape_cast %23 : vector<8xf32> to vector<8x1xf32>
      %cst_11 = arith.constant 3.200000e+01 : f32
      %25 = vector.broadcast %cst_11 : f32 to vector<8x1xf32>
      %26 = arith.divf %24, %25 : vector<8x1xf32>
      %27 = vector.broadcast %19 : vector<8x1xf32> to vector<8x32xf32>
      %28 = arith.subf %11, %27 : vector<8x32xf32>
      %cst_12 = arith.constant 9.99999974E-6 : f32
      %29 = vector.broadcast %cst_12 : f32 to vector<8x1xf32>
      %30 = arith.addf %26, %29 : vector<8x1xf32>
      %31 = math.rsqrt %30 : vector<8x1xf32>
      %32 = vector.broadcast %31 : vector<8x1xf32> to vector<8x32xf32>
      %33 = arith.mulf %28, %32 : vector<8x32xf32>
      %34 = vector.shape_cast %13 : vector<32xf32> to vector<1x32xf32>
      %35 = vector.broadcast %34 : vector<1x32xf32> to vector<8x32xf32>
      %36 = arith.mulf %33, %35 : vector<8x32xf32>
      %37 = vector.shape_cast %15 : vector<32xf32> to vector<1x32xf32>
      %38 = vector.broadcast %37 : vector<1x32xf32> to vector<8x32xf32>
      %39 = arith.addf %36, %38 : vector<8x32xf32>
      %c0_i32_13 = arith.constant 0 : i32
      %40 = vector.broadcast %c0_i32_13 : i32 to vector<8x128xi32>
      %41 = arith.cmpi eq, %0, %40 : vector<8x128xi32>
      %cst_14 = arith.constant dense<0.000000e+00> : vector<8xf32>
      %42 = vector.multi_reduction <add>, %39, %cst_14 [1] : vector<8x32xf32> to vector<8xf32>
      %43 = vector.shape_cast %42 : vector<8xf32> to vector<8x1xf32>
      %cst_15 = arith.constant 3.200000e+01 : f32
      %44 = vector.broadcast %cst_15 : f32 to vector<8x1xf32>
      %45 = arith.divf %43, %44 : vector<8x1xf32>
      %46 = vector.broadcast %45 : vector<8x1xf32> to vector<8x32xf32>
      %47 = arith.subf %39, %46 : vector<8x32xf32>
      %48 = arith.mulf %47, %47 : vector<8x32xf32>
      %cst_16 = arith.constant dense<0.000000e+00> : vector<8xf32>
      %49 = vector.multi_reduction <add>, %48, %cst_16 [1] : vector<8x32xf32> to vector<8xf32>
      %50 = vector.shape_cast %49 : vector<8xf32> to vector<8x1xf32>
      %cst_17 = arith.constant 3.100000e+01 : f32
      %51 = vector.broadcast %cst_17 : f32 to vector<8x1xf32>
      %52 = arith.divf %50, %51 : vector<8x1xf32>
      %53 = math.sqrt %52 : vector<8x1xf32>
      %54 = vector.shape_cast %53 : vector<8x1xf32> to vector<1x8x1xf32>
      %cst_18 = arith.constant dense<0.000000e+00> : vector<1xf32>
      %55 = vector.multi_reduction <add>, %54, %cst_18 [1, 2] : vector<1x8x1xf32> to vector<1xf32>
      %56 = vector.shape_cast %55 : vector<1xf32> to vector<1x1x1xf32>
      %57 = vector.extract %56[0, 0, 0] : f32 from vector<1x1x1xf32>
      %58 = vector.broadcast %57 : f32 to vector<1x1xf32>
      %cst_19 = arith.constant 0.000000e+00 : f32
      %59 = vector.shape_cast %58 : vector<1x1xf32> to vector<1x1xf32>
      %60 = vector.broadcast %59 : vector<1x1xf32> to vector<8x128xf32>
      %61 = vector.broadcast %cst_19 : f32 to vector<8x128xf32>
      %62 = arith.select %41, %60, %61 : vector<8x128xi1>, vector<8x128xf32>
      %c0_20 = arith.constant 0 : index
      %c0_21 = arith.constant 0 : index
      %c0_22 = arith.constant 0 : index
      %c0_23 = arith.constant 0 : index
      %63 = vector.load %arg18[%c0_20, %c0_21, %c0_22, %c0_23] : memref<1x1x8x128xf32, #tpu.memory_space<vmem>>, vector<1x1x8x128xf32>
      %64 = vector.shape_cast %63 : vector<1x1x8x128xf32> to vector<8x128xf32>
      %65 = vector.shape_cast %62 : vector<8x128xf32> to vector<1x1x8x128xf32>
      tpu.vector_store %arg18[%c0_20, %c0_21, %c0_22, %c0_23], %65 {strides = array<i32>} : memref<1x1x8x128xf32, #tpu.memory_space<vmem>>, vector<1x1x8x128xf32>,
      %66 = arith.truncf %39 : vector<8x32xf32> to vector<8x32xbf16>
      %c0_24 = arith.constant 0 : index
      %c0_25 = arith.constant 0 : index
      %67 = vector.load %arg8[%c0_24, %c0_25] : memref<32x32xbf16, #tpu.memory_space<vmem>>, vector<32x32xbf16>
      %cst_26 = arith.constant dense<0.000000e+00> : vector<8x32xf32>
      %68 = tpu.matmul %66, %67, %cst_26 {dimension_numbers = #tpu.dot_dimension_numbers<[1], [0], [0], [1], [0, 0, 1, 1], [], []>} : vector<8x32xbf16>, vector<32x32xbf16>, vector<8x32xf32> -> vector<8x32xf32>
      %cst_27 = arith.constant 0.353553385 : f32
      %69 = vector.broadcast %cst_27 : f32 to vector<8x32xf32>
      %70 = arith.mulf %68, %69 : vector<8x32xf32>
      %71 = vector.shape_cast %70 : vector<8x32xf32> to vector<8x4x8xf32>
      %72 = tpu.transpose %71, [1, 0, 2] : vector<8x4x8xf32> -> vector<4x8x8xf32>
      %73 = arith.truncf %72 : vector<4x8x8xf32> to vector<4x8x8xbf16>
      %c0_28 = arith.constant 0 : index
      %c0_29 = arith.constant 0 : index
      %c0_30 = arith.constant 0 : index
      %74 = vector.load %arg19[%c0_28, %c0_29, %c0_30] : memref<4x8x8xbf16, #tpu.memory_space<vmem>>, vector<4x8x8xbf16>
      tpu.vector_store %arg19[%c0_28, %c0_29, %c0_30], %73 {strides = array<i32>} : memref<4x8x8xbf16, #tpu.memory_space<vmem>>, vector<4x8x8xbf16>,
      %cst_31 = arith.constant -1.000000e+30 : f32
      %75 = vector.broadcast %cst_31 : f32 to vector<4x8x1xf32>
      %c0_32 = arith.constant 0 : index
      %c0_33 = arith.constant 0 : index
      %c0_34 = arith.constant 0 : index
      %76 = vector.load %arg20[%c0_32, %c0_33, %c0_34] : memref<4x8x1xf32, #tpu.memory_space<vmem>>, vector<4x8x1xf32>
      tpu.vector_store %arg20[%c0_32, %c0_33, %c0_34], %75 {strides = array<i32>} : memref<4x8x1xf32, #tpu.memory_space<vmem>>, vector<4x8x1xf32>,
      %cst_35 = arith.constant 0.000000e+00 : f32
      %77 = vector.broadcast %cst_35 : f32 to vector<4x8x1xf32>
      %c0_36 = arith.constant 0 : index
      %c0_37 = arith.constant 0 : index
      %c0_38 = arith.constant 0 : index
      %78 = vector.load %arg21[%c0_36, %c0_37, %c0_38] : memref<4x8x1xf32, #tpu.memory_space<vmem>>, vector<4x8x1xf32>
      tpu.vector_store %arg21[%c0_36, %c0_37, %c0_38], %77 {strides = array<i32>} : memref<4x8x1xf32, #tpu.memory_space<vmem>>, vector<4x8x1xf32>,
      %cst_39 = arith.constant 0.000000e+00 : f32
      %79 = vector.broadcast %cst_39 : f32 to vector<4x8x8xf32>
      %c0_40 = arith.constant 0 : index
      %c0_41 = arith.constant 0 : index
      %c0_42 = arith.constant 0 : index
      %80 = vector.load %arg22[%c0_40, %c0_41, %c0_42] : memref<4x8x8xf32, #tpu.memory_space<vmem>>, vector<4x8x8xf32>
      tpu.vector_store %arg22[%c0_40, %c0_41, %c0_42], %79 {strides = array<i32>} : memref<4x8x8xf32, #tpu.memory_space<vmem>>, vector<4x8x8xf32>,
    } else {
    }
    %4 = arith.cmpi sle, %arg2, %arg1 : i32
    %5 = arith.extui %4 : i1 to i32
    %c0_i32_1 = arith.constant 0 : i32
    %6 = arith.cmpi ne, %5, %c0_i32_1 : i32
    scf.if %6 {
      %c0 = arith.constant 0 : index
      %c0_3 = arith.constant 0 : index
      %c0_4 = arith.constant 0 : index
      %10 = vector.load %arg4[%c0, %c0_3, %c0_4] : memref<1x8x32xf32, #tpu.memory_space<vmem>>, vector<1x8x32xf32>
      %11 = vector.shape_cast %10 : vector<1x8x32xf32> to vector<8x32xf32>
      %c0_5 = arith.constant 0 : index
      %c0_6 = arith.constant 0 : index
      %12 = vector.load %arg5[%c0_5, %c0_6] : memref<1x32xf32, #tpu.memory_space<vmem>>, vector<1x32xf32>
      %13 = vector.shape_cast %12 : vector<1x32xf32> to vector<32xf32>
      %c0_7 = arith.constant 0 : index
      %c0_8 = arith.constant 0 : index
      %14 = vector.load %arg6[%c0_7, %c0_8] : memref<1x32xf32, #tpu.memory_space<vmem>>, vector<1x32xf32>
      %15 = vector.shape_cast %14 : vector<1x32xf32> to vector<32xf32>
      %cst = arith.constant dense<0.000000e+00> : vector<8xf32>
      %16 = vector.multi_reduction <add>, %11, %cst [1] : vector<8x32xf32> to vector<8xf32>
      %17 = vector.shape_cast %16 : vector<8xf32> to vector<8x1xf32>
      %cst_9 = arith.constant 3.200000e+01 : f32
      %18 = vector.broadcast %cst_9 : f32 to vector<8x1xf32>
      %19 = arith.divf %17, %18 : vector<8x1xf32>
      %20 = vector.broadcast %19 : vector<8x1xf32> to vector<8x32xf32>
      %21 = arith.subf %11, %20 : vector<8x32xf32>
      %22 = arith.mulf %21, %21 : vector<8x32xf32>
      %cst_10 = arith.constant dense<0.000000e+00> : vector<8xf32>
      %23 = vector.multi_reduction <add>, %22, %cst_10 [1] : vector<8x32xf32> to vector<8xf32>
      %24 = vector.shape_cast %23 : vector<8xf32> to vector<8x1xf32>
      %cst_11 = arith.constant 3.200000e+01 : f32
      %25 = vector.broadcast %cst_11 : f32 to vector<8x1xf32>
      %26 = arith.divf %24, %25 : vector<8x1xf32>
      %27 = vector.broadcast %19 : vector<8x1xf32> to vector<8x32xf32>
      %28 = arith.subf %11, %27 : vector<8x32xf32>
      %cst_12 = arith.constant 9.99999974E-6 : f32
      %29 = vector.broadcast %cst_12 : f32 to vector<8x1xf32>
      %30 = arith.addf %26, %29 : vector<8x1xf32>
      %31 = math.rsqrt %30 : vector<8x1xf32>
      %32 = vector.broadcast %31 : vector<8x1xf32> to vector<8x32xf32>
      %33 = arith.mulf %28, %32 : vector<8x32xf32>
      %34 = vector.shape_cast %13 : vector<32xf32> to vector<1x32xf32>
      %35 = vector.broadcast %34 : vector<1x32xf32> to vector<8x32xf32>
      %36 = arith.mulf %33, %35 : vector<8x32xf32>
      %37 = vector.shape_cast %15 : vector<32xf32> to vector<1x32xf32>
      %38 = vector.broadcast %37 : vector<1x32xf32> to vector<8x32xf32>
      %39 = arith.addf %36, %38 : vector<8x32xf32>
      %40 = arith.truncf %39 : vector<8x32xf32> to vector<8x32xbf16>
      %c0_13 = arith.constant 0 : index
      %c0_14 = arith.constant 0 : index
      %41 = vector.load %arg7[%c0_13, %c0_14] : memref<32x32xbf16, #tpu.memory_space<vmem>>, vector<32x32xbf16>
      %cst_15 = arith.constant dense<0.000000e+00> : vector<8x32xf32>
      %42 = tpu.matmul %40, %41, %cst_15 {dimension_numbers = #tpu.dot_dimension_numbers<[1], [0], [0], [1], [0, 0, 1, 1], [], []>} : vector<8x32xbf16>, vector<32x32xbf16>, vector<8x32xf32> -> vector<8x32xf32>
      %c0_16 = arith.constant 0 : index
      %c0_17 = arith.constant 0 : index
      %43 = vector.load %arg9[%c0_16, %c0_17] : memref<32x32xbf16, #tpu.memory_space<vmem>>, vector<32x32xbf16>
      %cst_18 = arith.constant dense<0.000000e+00> : vector<8x32xf32>
      %44 = tpu.matmul %40, %43, %cst_18 {dimension_numbers = #tpu.dot_dimension_numbers<[1], [0], [0], [1], [0, 0, 1, 1], [], []>} : vector<8x32xbf16>, vector<32x32xbf16>, vector<8x32xf32> -> vector<8x32xf32>
      %45 = vector.shape_cast %42 : vector<8x32xf32> to vector<8x4x8xf32>
      %46 = tpu.transpose %45, [1, 0, 2] : vector<8x4x8xf32> -> vector<4x8x8xf32>
      %47 = arith.truncf %46 : vector<4x8x8xf32> to vector<4x8x8xbf16>
      %48 = vector.shape_cast %44 : vector<8x32xf32> to vector<8x4x8xf32>
      %49 = tpu.transpose %48, [1, 0, 2] : vector<8x4x8xf32> -> vector<4x8x8xf32>
      %50 = arith.truncf %49 : vector<4x8x8xf32> to vector<4x8x8xbf16>
      %c0_19 = arith.constant 0 : index
      %c0_20 = arith.constant 0 : index
      %c0_21 = arith.constant 0 : index
      %51 = vector.load %arg19[%c0_19, %c0_20, %c0_21] : memref<4x8x8xbf16, #tpu.memory_space<vmem>>, vector<4x8x8xbf16>
      "tpu.trace_start"() <{level = 10 : i32, message = "hqd,hkd->hqk"}> : () -> ()
      %cst_22 = arith.constant dense<0.000000e+00> : vector<4x8x8xf32>
      %52 = tpu.matmul %51, %47, %cst_22 {dimension_numbers = #tpu.dot_dimension_numbers<[2], [2], [1], [1], [0, 0, 0, 1, 1, 1], [0], [0]>} : vector<4x8x8xbf16>, vector<4x8x8xbf16>, vector<4x8x8xf32> -> vector<4x8x8xf32>
      "tpu.trace_stop"() : () -> ()
      %c8_i32 = arith.constant 8 : i32
      %53 = arith.muli %arg1, %c8_i32 : i32
      %54 = tpu.iota {dimensions = array<i32: 0>} : vector<8x8xi32>
      %55 = vector.broadcast %53 : i32 to vector<8x8xi32>
      %56 = arith.addi %55, %54 : vector<8x8xi32>
      %c8_i32_23 = arith.constant 8 : i32
      %57 = arith.muli %arg2, %c8_i32_23 : i32
      %58 = tpu.iota {dimensions = array<i32: 1>} : vector<8x8xi32>
      %59 = vector.broadcast %57 : i32 to vector<8x8xi32>
      %60 = arith.addi %59, %58 : vector<8x8xi32>
      %61 = arith.cmpi sle, %60, %56 : vector<8x8xi32>
      %62 = vector.shape_cast %61 : vector<8x8xi1> to vector<1x8x8xi1>
      %cst_24 = arith.constant -1.000000e+30 : f32
      %63 = vector.shape_cast %62 : vector<1x8x8xi1> to vector<1x8x8xi1>
      %64 = vector.broadcast %63 : vector<1x8x8xi1> to vector<4x8x8xi1>
      %65 = vector.broadcast %cst_24 : f32 to vector<4x8x8xf32>
      %66 = arith.select %64, %52, %65 : vector<4x8x8xi1>, vector<4x8x8xf32>
      %c0_25 = arith.constant 0 : index
      %c0_26 = arith.constant 0 : index
      %c0_27 = arith.constant 0 : index
      %67 = vector.load %arg20[%c0_25, %c0_26, %c0_27] : memref<4x8x1xf32, #tpu.memory_space<vmem>>, vector<4x8x1xf32>
      %cst_28 = arith.constant dense<0xFF800000> : vector<4x8xf32>
      %68 = vector.multi_reduction <maximumf>, %66, %cst_28 [2] : vector<4x8x8xf32> to vector<4x8xf32>
      %69 = vector.shape_cast %68 : vector<4x8xf32> to vector<4x8x1xf32>
      %70 = arith.maximumf %67, %69 : vector<4x8x1xf32>
      %c0_29 = arith.constant 0 : index
      %c0_30 = arith.constant 0 : index
      %c0_31 = arith.constant 0 : index
      %71 = vector.load %arg20[%c0_29, %c0_30, %c0_31] : memref<4x8x1xf32, #tpu.memory_space<vmem>>, vector<4x8x1xf32>
      %72 = arith.subf %71, %70 : vector<4x8x1xf32>
      %73 = math.exp %72 : vector<4x8x1xf32>
      %74 = vector.broadcast %70 : vector<4x8x1xf32> to vector<4x8x8xf32>
      %75 = arith.subf %66, %74 : vector<4x8x8xf32>
      %76 = math.exp %75 : vector<4x8x8xf32>
      %c0_32 = arith.constant 0 : index
      %c0_33 = arith.constant 0 : index
      %c0_34 = arith.constant 0 : index
      %77 = vector.load %arg21[%c0_32, %c0_33, %c0_34] : memref<4x8x1xf32, #tpu.memory_space<vmem>>, vector<4x8x1xf32>
      %78 = arith.mulf %73, %77 : vector<4x8x1xf32>
      %cst_35 = arith.constant dense<0.000000e+00> : vector<4x8xf32>
      %79 = vector.multi_reduction <add>, %76, %cst_35 [2] : vector<4x8x8xf32> to vector<4x8xf32>
      %80 = vector.shape_cast %79 : vector<4x8xf32> to vector<4x8x1xf32>
      %81 = arith.addf %78, %80 : vector<4x8x1xf32>
      %c0_36 = arith.constant 0 : index
      %c0_37 = arith.constant 0 : index
      %c0_38 = arith.constant 0 : index
      %82 = vector.load %arg21[%c0_36, %c0_37, %c0_38] : memref<4x8x1xf32, #tpu.memory_space<vmem>>, vector<4x8x1xf32>
      tpu.vector_store %arg21[%c0_36, %c0_37, %c0_38], %81 {strides = array<i32>} : memref<4x8x1xf32, #tpu.memory_space<vmem>>, vector<4x8x1xf32>,
      %c0_39 = arith.constant 0 : index
      %c0_40 = arith.constant 0 : index
      %c0_41 = arith.constant 0 : index
      %83 = vector.load %arg22[%c0_39, %c0_40, %c0_41] : memref<4x8x8xf32, #tpu.memory_space<vmem>>, vector<4x8x8xf32>
      %84 = vector.broadcast %73 : vector<4x8x1xf32> to vector<4x8x8xf32>
      %85 = arith.mulf %84, %83 : vector<4x8x8xf32>
      %86 = arith.truncf %76 : vector<4x8x8xf32> to vector<4x8x8xbf16>
      "tpu.trace_start"() <{level = 10 : i32, message = "hqk,hkd->hqd"}> : () -> ()
      %cst_42 = arith.constant dense<0.000000e+00> : vector<4x8x8xf32>
      %87 = tpu.matmul %86, %50, %cst_42 {dimension_numbers = #tpu.dot_dimension_numbers<[2], [1], [1], [2], [0, 0, 0, 1, 1, 2], [0], [0]>} : vector<4x8x8xbf16>, vector<4x8x8xbf16>, vector<4x8x8xf32> -> vector<4x8x8xf32>
      "tpu.trace_stop"() : () -> ()
      %88 = arith.addf %85, %87 : vector<4x8x8xf32>
      %c0_43 = arith.constant 0 : index
      %c0_44 = arith.constant 0 : index
      %c0_45 = arith.constant 0 : index
      %89 = vector.load %arg22[%c0_43, %c0_44, %c0_45] : memref<4x8x8xf32, #tpu.memory_space<vmem>>, vector<4x8x8xf32>
      tpu.vector_store %arg22[%c0_43, %c0_44, %c0_45], %88 {strides = array<i32>} : memref<4x8x8xf32, #tpu.memory_space<vmem>>, vector<4x8x8xf32>,
      %c0_46 = arith.constant 0 : index
      %c0_47 = arith.constant 0 : index
      %c0_48 = arith.constant 0 : index
      %90 = vector.load %arg20[%c0_46, %c0_47, %c0_48] : memref<4x8x1xf32, #tpu.memory_space<vmem>>, vector<4x8x1xf32>
      tpu.vector_store %arg20[%c0_46, %c0_47, %c0_48], %70 {strides = array<i32>} : memref<4x8x1xf32, #tpu.memory_space<vmem>>, vector<4x8x1xf32>,
    } else {
    }
    %7 = arith.cmpi eq, %arg2, %arg1 : i32
    %8 = arith.extui %7 : i1 to i32
    %c0_i32_2 = arith.constant 0 : i32
    %9 = arith.cmpi ne, %8, %c0_i32_2 : i32
    scf.if %9 {
      %c0 = arith.constant 0 : index
      %c0_3 = arith.constant 0 : index
      %c0_4 = arith.constant 0 : index
      %10 = vector.load %arg3[%c0, %c0_3, %c0_4] : memref<1x8x32xf32, #tpu.memory_space<vmem>>, vector<1x8x32xf32>
      %11 = vector.shape_cast %10 : vector<1x8x32xf32> to vector<8x32xf32>
      %c0_5 = arith.constant 0 : index
      %c0_6 = arith.constant 0 : index
      %c0_7 = arith.constant 0 : index
      %12 = vector.load %arg22[%c0_5, %c0_6, %c0_7] : memref<4x8x8xf32, #tpu.memory_space<vmem>>, vector<4x8x8xf32>
      %c0_8 = arith.constant 0 : index
      %c0_9 = arith.constant 0 : index
      %c0_10 = arith.constant 0 : index
      %13 = vector.load %arg21[%c0_8, %c0_9, %c0_10] : memref<4x8x1xf32, #tpu.memory_space<vmem>>, vector<4x8x1xf32>
      %14 = tpu.reciprocal %13 {approx = true} : vector<4x8x1xf32> -> vector<4x8x1xf32>
      %15 = vector.broadcast %14 : vector<4x8x1xf32> to vector<4x8x8xf32>
      %16 = arith.mulf %12, %15 : vector<4x8x8xf32>
      %17 = tpu.transpose %16, [1, 0, 2] : vector<4x8x8xf32> -> vector<8x4x8xf32>
      %18 = vector.shape_cast %17 : vector<8x4x8xf32> to vector<8x32xf32>
      %19 = arith.truncf %18 : vector<8x32xf32> to vector<8x32xbf16>
      %c0_11 = arith.constant 0 : index
      %c0_12 = arith.constant 0 : index
      %20 = vector.load %arg10[%c0_11, %c0_12] : memref<32x32xbf16, #tpu.memory_space<vmem>>, vector<32x32xbf16>
      %cst = arith.constant dense<0.000000e+00> : vector<8x32xf32>
      %21 = tpu.matmul %19, %20, %cst {dimension_numbers = #tpu.dot_dimension_numbers<[1], [0], [0], [1], [0, 0, 1, 1], [], []>} : vector<8x32xbf16>, vector<32x32xbf16>, vector<8x32xf32> -> vector<8x32xf32>
      %c0_13 = arith.constant 0 : index
      %c0_14 = arith.constant 0 : index
      %22 = vector.load %arg11[%c0_13, %c0_14] : memref<1x32xf32, #tpu.memory_space<vmem>>, vector<1x32xf32>
      %23 = vector.shape_cast %22 : vector<1x32xf32> to vector<32xf32>
      %24 = vector.shape_cast %23 : vector<32xf32> to vector<1x32xf32>
      %25 = vector.broadcast %24 : vector<1x32xf32> to vector<8x32xf32>
      %26 = arith.addf %21, %25 : vector<8x32xf32>
      %27 = arith.addf %11, %26 : vector<8x32xf32>
      %c0_15 = arith.constant 0 : index
      %c0_16 = arith.constant 0 : index
      %28 = vector.load %arg12[%c0_15, %c0_16] : memref<1x32xf32, #tpu.memory_space<vmem>>, vector<1x32xf32>
      %29 = vector.shape_cast %28 : vector<1x32xf32> to vector<32xf32>
      %c0_17 = arith.constant 0 : index
      %c0_18 = arith.constant 0 : index
      %30 = vector.load %arg13[%c0_17, %c0_18] : memref<1x32xf32, #tpu.memory_space<vmem>>, vector<1x32xf32>
      %31 = vector.shape_cast %30 : vector<1x32xf32> to vector<32xf32>
      %cst_19 = arith.constant dense<0.000000e+00> : vector<8xf32>
      %32 = vector.multi_reduction <add>, %27, %cst_19 [1] : vector<8x32xf32> to vector<8xf32>
      %33 = vector.shape_cast %32 : vector<8xf32> to vector<8x1xf32>
      %cst_20 = arith.constant 3.200000e+01 : f32
      %34 = vector.broadcast %cst_20 : f32 to vector<8x1xf32>
      %35 = arith.divf %33, %34 : vector<8x1xf32>
      %36 = vector.broadcast %35 : vector<8x1xf32> to vector<8x32xf32>
      %37 = arith.subf %27, %36 : vector<8x32xf32>
      %38 = arith.mulf %37, %37 : vector<8x32xf32>
      %cst_21 = arith.constant dense<0.000000e+00> : vector<8xf32>
      %39 = vector.multi_reduction <add>, %38, %cst_21 [1] : vector<8x32xf32> to vector<8xf32>
      %40 = vector.shape_cast %39 : vector<8xf32> to vector<8x1xf32>
      %cst_22 = arith.constant 3.200000e+01 : f32
      %41 = vector.broadcast %cst_22 : f32 to vector<8x1xf32>
      %42 = arith.divf %40, %41 : vector<8x1xf32>
      %43 = vector.broadcast %35 : vector<8x1xf32> to vector<8x32xf32>
      %44 = arith.subf %27, %43 : vector<8x32xf32>
      %cst_23 = arith.constant 9.99999974E-6 : f32
      %45 = vector.broadcast %cst_23 : f32 to vector<8x1xf32>
      %46 = arith.addf %42, %45 : vector<8x1xf32>
      %47 = math.rsqrt %46 : vector<8x1xf32>
      %48 = vector.broadcast %47 : vector<8x1xf32> to vector<8x32xf32>
      %49 = arith.mulf %44, %48 : vector<8x32xf32>
      %50 = vector.shape_cast %29 : vector<32xf32> to vector<1x32xf32>
      %51 = vector.broadcast %50 : vector<1x32xf32> to vector<8x32xf32>
      %52 = arith.mulf %49, %51 : vector<8x32xf32>
      %53 = vector.shape_cast %31 : vector<32xf32> to vector<1x32xf32>
      %54 = vector.broadcast %53 : vector<1x32xf32> to vector<8x32xf32>
      %55 = arith.addf %52, %54 : vector<8x32xf32>
      %56 = arith.truncf %55 : vector<8x32xf32> to vector<8x32xbf16>
      %cst_24 = arith.constant 0.000000e+00 : f32
      %57 = vector.broadcast %cst_24 : f32 to vector<8x32xf32>
      %c0_25 = arith.constant 0 : index
      %c0_26 = arith.constant 0 : index
      %58 = vector.load %arg14[%c0_25, %c0_26] : memref<32x128xbf16, #tpu.memory_space<vmem>>, vector<32x128xbf16>
      %cst_27 = arith.constant dense<0.000000e+00> : vector<8x128xf32>
      %59 = tpu.matmul %56, %58, %cst_27 {dimension_numbers = #tpu.dot_dimension_numbers<[1], [0], [0], [1], [0, 0, 1, 1], [], []>} : vector<8x32xbf16>, vector<32x128xbf16>, vector<8x128xf32> -> vector<8x128xf32>
      %c0_28 = arith.constant 0 : index
      %c0_29 = arith.constant 0 : index
      %60 = vector.load %arg15[%c0_28, %c0_29] : memref<1x128xf32, #tpu.memory_space<vmem>>, vector<1x128xf32>
      %61 = vector.shape_cast %60 : vector<1x128xf32> to vector<128xf32>
      %62 = vector.shape_cast %61 : vector<128xf32> to vector<1x128xf32>
      %63 = vector.broadcast %62 : vector<1x128xf32> to vector<8x128xf32>
      %64 = arith.addf %59, %63 : vector<8x128xf32>
      %cst_30 = arith.constant 0.636619746 : f32
      %65 = math.sqrt %cst_30 : f32
      %cst_31 = arith.constant 5.000000e-01 : f32
      %66 = vector.broadcast %cst_31 : f32 to vector<8x128xf32>
      %67 = arith.mulf %66, %64 : vector<8x128xf32>
      %cst_32 = arith.constant 4.471500e-02 : f32
      %68 = vector.broadcast %cst_32 : f32 to vector<8x128xf32>
      %69 = arith.mulf %68, %64 : vector<8x128xf32>
      %70 = arith.mulf %69, %64 : vector<8x128xf32>
      %71 = arith.mulf %70, %64 : vector<8x128xf32>
      %72 = arith.addf %64, %71 : vector<8x128xf32>
      %73 = vector.broadcast %65 : f32 to vector<8x128xf32>
      %74 = arith.mulf %73, %72 : vector<8x128xf32>
      %75 = math.tanh %74 : vector<8x128xf32>
      %cst_33 = arith.constant 1.000000e+00 : f32
      %76 = vector.broadcast %cst_33 : f32 to vector<8x128xf32>
      %77 = arith.addf %76, %75 : vector<8x128xf32>
      %78 = arith.mulf %67, %77 : vector<8x128xf32>
      %79 = arith.truncf %78 : vector<8x128xf32> to vector<8x128xbf16>
      %c0_34 = arith.constant 0 : index
      %c0_35 = arith.constant 0 : index
      %80 = vector.load %arg16[%c0_34, %c0_35] : memref<128x32xbf16, #tpu.memory_space<vmem>>, vector<128x32xbf16>
      %cst_36 = arith.constant dense<0.000000e+00> : vector<8x32xf32>
      %81 = tpu.matmul %79, %80, %cst_36 {dimension_numbers = #tpu.dot_dimension_numbers<[1], [0], [0], [1], [0, 0, 1, 1], [], []>} : vector<8x128xbf16>, vector<128x32xbf16>, vector<8x32xf32> -> vector<8x32xf32>
      %82 = arith.addf %57, %81 : vector<8x32xf32>
      %83 = arith.addf %82, %26 : vector<8x32xf32>
      %c0_37 = arith.constant 0 : index
      %c0_38 = arith.constant 0 : index
      %c0_39 = arith.constant 0 : index
      %c0_40 = arith.constant 0 : index
      %84 = vector.load %arg18[%c0_37, %c0_38, %c0_39, %c0_40] : memref<1x1x8x128xf32, #tpu.memory_space<vmem>>, vector<1x1x8x128xf32>
      %85 = vector.shape_cast %84 : vector<1x1x8x128xf32> to vector<8x128xf32>
      %c1_i32 = arith.constant 1 : i32
      %86 = vector.broadcast %c1_i32 : i32 to vector<8x128xi32>
      %87 = arith.cmpi eq, %0, %86 : vector<8x128xi32>
      %cst_41 = arith.constant dense<0.000000e+00> : vector<8xf32>
      %88 = vector.multi_reduction <add>, %26, %cst_41 [1] : vector<8x32xf32> to vector<8xf32>
      %89 = vector.shape_cast %88 : vector<8xf32> to vector<8x1xf32>
      %cst_42 = arith.constant 3.200000e+01 : f32
      %90 = vector.broadcast %cst_42 : f32 to vector<8x1xf32>
      %91 = arith.divf %89, %90 : vector<8x1xf32>
      %92 = vector.broadcast %91 : vector<8x1xf32> to vector<8x32xf32>
      %93 = arith.subf %26, %92 : vector<8x32xf32>
      %94 = arith.mulf %93, %93 : vector<8x32xf32>
      %cst_43 = arith.constant dense<0.000000e+00> : vector<8xf32>
      %95 = vector.multi_reduction <add>, %94, %cst_43 [1] : vector<8x32xf32> to vector<8xf32>
      %96 = vector.shape_cast %95 : vector<8xf32> to vector<8x1xf32>
      %cst_44 = arith.constant 3.100000e+01 : f32
      %97 = vector.broadcast %cst_44 : f32 to vector<8x1xf32>
      %98 = arith.divf %96, %97 : vector<8x1xf32>
      %99 = math.sqrt %98 : vector<8x1xf32>
      %100 = vector.shape_cast %99 : vector<8x1xf32> to vector<1x8x1xf32>
      %cst_45 = arith.constant dense<0.000000e+00> : vector<1xf32>
      %101 = vector.multi_reduction <add>, %100, %cst_45 [1, 2] : vector<1x8x1xf32> to vector<1xf32>
      %102 = vector.shape_cast %101 : vector<1xf32> to vector<1x1x1xf32>
      %103 = vector.extract %102[0, 0, 0] : f32 from vector<1x1x1xf32>
      %104 = vector.broadcast %103 : f32 to vector<1x1xf32>
      %cst_46 = arith.constant 0.000000e+00 : f32
      %105 = vector.shape_cast %104 : vector<1x1xf32> to vector<1x1xf32>
      %106 = vector.broadcast %105 : vector<1x1xf32> to vector<8x128xf32>
      %107 = vector.broadcast %cst_46 : f32 to vector<8x128xf32>
      %108 = arith.select %87, %106, %107 : vector<8x128xi1>, vector<8x128xf32>
      %109 = arith.addf %85, %108 : vector<8x128xf32>
      %c2_i32 = arith.constant 2 : i32
      %110 = vector.broadcast %c2_i32 : i32 to vector<8x128xi32>
      %111 = arith.cmpi eq, %0, %110 : vector<8x128xi32>
      %cst_47 = arith.constant dense<0.000000e+00> : vector<8xf32>
      %112 = vector.multi_reduction <add>, %83, %cst_47 [1] : vector<8x32xf32> to vector<8xf32>
      %113 = vector.shape_cast %112 : vector<8xf32> to vector<8x1xf32>
      %cst_48 = arith.constant 3.200000e+01 : f32
      %114 = vector.broadcast %cst_48 : f32 to vector<8x1xf32>
      %115 = arith.divf %113, %114 : vector<8x1xf32>
      %116 = vector.broadcast %115 : vector<8x1xf32> to vector<8x32xf32>
      %117 = arith.subf %83, %116 : vector<8x32xf32>
      %118 = arith.mulf %117, %117 : vector<8x32xf32>
      %cst_49 = arith.constant dense<0.000000e+00> : vector<8xf32>
      %119 = vector.multi_reduction <add>, %118, %cst_49 [1] : vector<8x32xf32> to vector<8xf32>
      %120 = vector.shape_cast %119 : vector<8xf32> to vector<8x1xf32>
      %cst_50 = arith.constant 3.100000e+01 : f32
      %121 = vector.broadcast %cst_50 : f32 to vector<8x1xf32>
      %122 = arith.divf %120, %121 : vector<8x1xf32>
      %123 = math.sqrt %122 : vector<8x1xf32>
      %124 = vector.shape_cast %123 : vector<8x1xf32> to vector<1x8x1xf32>
      %cst_51 = arith.constant dense<0.000000e+00> : vector<1xf32>
      %125 = vector.multi_reduction <add>, %124, %cst_51 [1, 2] : vector<1x8x1xf32> to vector<1xf32>
      %126 = vector.shape_cast %125 : vector<1xf32> to vector<1x1x1xf32>
      %127 = vector.extract %126[0, 0, 0] : f32 from vector<1x1x1xf32>
      %128 = vector.broadcast %127 : f32 to vector<1x1xf32>
      %cst_52 = arith.constant 0.000000e+00 : f32
      %129 = vector.shape_cast %128 : vector<1x1xf32> to vector<1x1xf32>
      %130 = vector.broadcast %129 : vector<1x1xf32> to vector<8x128xf32>
      %131 = vector.broadcast %cst_52 : f32 to vector<8x128xf32>
      %132 = arith.select %111, %130, %131 : vector<8x128xi1>, vector<8x128xf32>
      %133 = arith.addf %109, %132 : vector<8x128xf32>
      %c0_53 = arith.constant 0 : index
      %c0_54 = arith.constant 0 : index
      %c0_55 = arith.constant 0 : index
      %c0_56 = arith.constant 0 : index
      %134 = vector.load %arg18[%c0_53, %c0_54, %c0_55, %c0_56] : memref<1x1x8x128xf32, #tpu.memory_space<vmem>>, vector<1x1x8x128xf32>
      %135 = vector.shape_cast %134 : vector<1x1x8x128xf32> to vector<8x128xf32>
      %136 = vector.shape_cast %133 : vector<8x128xf32> to vector<1x1x8x128xf32>
      tpu.vector_store %arg18[%c0_53, %c0_54, %c0_55, %c0_56], %136 {strides = array<i32>} : memref<1x1x8x128xf32, #tpu.memory_space<vmem>>, vector<1x1x8x128xf32>,
      %137 = arith.addf %11, %83 : vector<8x32xf32>
      %c0_57 = arith.constant 0 : index
      %c0_58 = arith.constant 0 : index
      %c0_59 = arith.constant 0 : index
      %138 = vector.load %arg17[%c0_57, %c0_58, %c0_59] : memref<1x8x32xf32, #tpu.memory_space<vmem>>, vector<1x8x32xf32>
      %139 = vector.shape_cast %138 : vector<1x8x32xf32> to vector<8x32xf32>
      %140 = vector.shape_cast %137 : vector<8x32xf32> to vector<1x8x32xf32>
      tpu.vector_store %arg17[%c0_57, %c0_58, %c0_59], %140 {strides = array<i32>} : memref<1x8x32xf32, #tpu.memory_space<vmem>>, vector<1x8x32xf32>,
    } else {
    }
    return
  }
  func.func @transform_0(%arg0: i32, %arg1: i32, %arg2: i32) -> (i32, i32, i32) {
    %c0_i32 = arith.constant 0 : i32
    %c0_i32_0 = arith.constant 0 : i32
    return %arg0, %arg1, %c0_i32 : i32, i32, i32
  }
  func.func @transform_1(%arg0: i32, %arg1: i32, %arg2: i32) -> (i32, i32, i32) {
    %0 = arith.minsi %arg2, %arg1 : i32
    %c0_i32 = arith.constant 0 : i32
    %c0_i32_0 = arith.constant 0 : i32
    return %arg0, %0, %c0_i32 : i32, i32, i32
  }
  func.func @transform_2(%arg0: i32, %arg1: i32, %arg2: i32) -> (i32, i32) {
    %c0_i32 = arith.constant 0 : i32
    %c0_i32_0 = arith.constant 0 : i32
    %c0_i32_1 = arith.constant 0 : i32
    return %c0_i32, %c0_i32_0 : i32, i32
  }
  func.func @transform_3(%arg0: i32, %arg1: i32, %arg2: i32) -> (i32, i32) {
    %c0_i32 = arith.constant 0 : i32
    %c0_i32_0 = arith.constant 0 : i32
    %c0_i32_1 = arith.constant 0 : i32
    return %c0_i32, %c0_i32_0 : i32, i32
  }
  func.func @transform_4(%arg0: i32, %arg1: i32, %arg2: i32) -> (i32, i32) {
    %c0_i32 = arith.constant 0 : i32
    %c0_i32_0 = arith.constant 0 : i32
    %c0_i32_1 = arith.constant 0 : i32
    return %c0_i32, %c0_i32_0 : i32, i32
  }
  func.func @transform_5(%arg0: i32, %arg1: i32, %arg2: i32) -> (i32, i32) {
    %c0_i32 = arith.constant 0 : i32
    %c0_i32_0 = arith.constant 0 : i32
    %c0_i32_1 = arith.constant 0 : i32
    return %c0_i32, %c0_i32_0 : i32, i32
  }
  func.func @transform_6(%arg0: i32, %arg1: i32, %arg2: i32) -> (i32, i32) {
    %c0_i32 = arith.constant 0 : i32
    %c0_i32_0 = arith.constant 0 : i32
    %c0_i32_1 = arith.constant 0 : i32
    return %c0_i32, %c0_i32_0 : i32, i32
  }
  func.func @transform_7(%arg0: i32, %arg1: i32, %arg2: i32) -> (i32, i32) {
    %c0_i32 = arith.constant 0 : i32
    %c0_i32_0 = arith.constant 0 : i32
    %c0_i32_1 = arith.constant 0 : i32
    return %c0_i32, %c0_i32_0 : i32, i32
  }
  func.func @transform_8(%arg0: i32, %arg1: i32, %arg2: i32) -> (i32, i32) {
    %c0_i32 = arith.constant 0 : i32
    %c0_i32_0 = arith.constant 0 : i32
    %c0_i32_1 = arith.constant 0 : i32
    return %c0_i32, %c0_i32_0 : i32, i32
  }
  func.func @transform_9(%arg0: i32, %arg1: i32, %arg2: i32) -> (i32, i32) {
    %c0_i32 = arith.constant 0 : i32
    %c0_i32_0 = arith.constant 0 : i32
    %c0_i32_1 = arith.constant 0 : i32
    return %c0_i32, %c0_i32_0 : i32, i32
  }
  func.func @transform_10(%arg0: i32, %arg1: i32, %arg2: i32) -> (i32, i32) {
    %c0_i32 = arith.constant 0 : i32
    %c0_i32_0 = arith.constant 0 : i32
    %c0_i32_1 = arith.constant 0 : i32
    return %c0_i32, %c0_i32_0 : i32, i32
  }
  func.func @transform_11(%arg0: i32, %arg1: i32, %arg2: i32) -> (i32, i32) {
    %c0_i32 = arith.constant 0 : i32
    %c0_i32_0 = arith.constant 0 : i32
    %c0_i32_1 = arith.constant 0 : i32
    return %c0_i32, %c0_i32_0 : i32, i32
  }
  func.func @transform_12(%arg0: i32, %arg1: i32, %arg2: i32) -> (i32, i32) {
    %c0_i32 = arith.constant 0 : i32
    %c0_i32_0 = arith.constant 0 : i32
    %c0_i32_1 = arith.constant 0 : i32
    return %c0_i32, %c0_i32_0 : i32, i32
  }
  func.func @transform_13(%arg0: i32, %arg1: i32, %arg2: i32) -> (i32, i32) {
    %c0_i32 = arith.constant 0 : i32
    %c0_i32_0 = arith.constant 0 : i32
    %c0_i32_1 = arith.constant 0 : i32
    return %c0_i32, %c0_i32_0 : i32, i32
  }
  func.func @transform_14(%arg0: i32, %arg1: i32, %arg2: i32) -> (i32, i32, i32) {
    %c0_i32 = arith.constant 0 : i32
    %c0_i32_0 = arith.constant 0 : i32
    return %arg0, %arg1, %c0_i32 : i32, i32, i32
  }
  func.func @transform_15(%arg0: i32, %arg1: i32, %arg2: i32) -> (i32, i32, i32, i32) {
    %c0_i32 = arith.constant 0 : i32
    %c0_i32_0 = arith.constant 0 : i32
    %c0_i32_1 = arith.constant 0 : i32
    return %arg0, %arg1, %c0_i32, %c0_i32_0 : i32, i32, i32, i32
  }
}

module attributes {stable_mosaic.version = 11 : i64} {
  func.func @ben_block_kernel(%arg0: i32, %arg1: i32, %arg2: i32, %arg3: memref<1x8x32xf32, #tpu.memory_space<vmem>>, %arg4: memref<1x8x32xf32, #tpu.memory_space<vmem>>, %arg5: memref<1x32xf32, #tpu.memory_space<vmem>>, %arg6: memref<1x32xf32, #tpu.memory_space<vmem>>, %arg7: memref<32x32xbf16, #tpu.memory_space<vmem>>, %arg8: memref<32x32xbf16, #tpu.memory_space<vmem>>, %arg9: memref<32x32xbf16, #tpu.memory_space<vmem>>, %arg10: memref<32x32xbf16, #tpu.memory_space<vmem>>, %arg11: memref<1x32xf32, #tpu.memory_space<vmem>>, %arg12: memref<1x32xf32, #tpu.memory_space<vmem>>, %arg13: memref<1x32xf32, #tpu.memory_space<vmem>>, %arg14: memref<32x128xbf16, #tpu.memory_space<vmem>>, %arg15: memref<1x128xf32, #tpu.memory_space<vmem>>, %arg16: memref<128x32xbf16, #tpu.memory_space<vmem>>, %arg17: memref<1x8x32xf32, #tpu.memory_space<vmem>>, %arg18: memref<1x1x8x128xf32, #tpu.memory_space<vmem>>, %arg19: memref<4x8x8xbf16, #tpu.memory_space<vmem>>, %arg20: memref<4x8x1xf32, #tpu.memory_space<vmem>>, %arg21: memref<4x8x1xf32, #tpu.memory_space<vmem>>, %arg22: memref<4x8x8xf32, #tpu.memory_space<vmem>>) attributes {dimension_semantics = [#tpu.dimension_semantics<parallel>, #tpu.dimension_semantics<parallel>, #tpu.dimension_semantics<arbitrary>], iteration_bounds = array<i64: 2, 1, 1>, scalar_prefetch = 0 : i64, scratch_operands = 4 : i64, tpu.core_type = #tpu.core_type<tc>, window_params = [{transform_indices = @transform_0, window_bounds = array<i64: 1, 8, 32>}, {transform_indices = @transform_1, window_bounds = array<i64: 1, 8, 32>}, {pipeline_mode = #tpu.pipeline_mode<synchronous>, transform_indices = @transform_2, window_bounds = array<i64: 1, 32>}, {pipeline_mode = #tpu.pipeline_mode<synchronous>, transform_indices = @transform_3, window_bounds = array<i64: 1, 32>}, {pipeline_mode = #tpu.pipeline_mode<synchronous>, transform_indices = @transform_4, window_bounds = array<i64: 32, 32>}, {pipeline_mode = #tpu.pipeline_mode<synchronous>, transform_indices = @transform_5, window_bounds = array<i64: 32, 32>}, {pipeline_mode = #tpu.pipeline_mode<synchronous>, transform_indices = @transform_6, window_bounds = array<i64: 32, 32>}, {pipeline_mode = #tpu.pipeline_mode<synchronous>, transform_indices = @transform_7, window_bounds = array<i64: 32, 32>}, {pipeline_mode = #tpu.pipeline_mode<synchronous>, transform_indices = @transform_8, window_bounds = array<i64: 1, 32>}, {pipeline_mode = #tpu.pipeline_mode<synchronous>, transform_indices = @transform_9, window_bounds = array<i64: 1, 32>}, {pipeline_mode = #tpu.pipeline_mode<synchronous>, transform_indices = @transform_10, window_bounds = array<i64: 1, 32>}, {pipeline_mode = #tpu.pipeline_mode<synchronous>, transform_indices = @transform_11, window_bounds = array<i64: 32, 128>}, {pipeline_mode = #tpu.pipeline_mode<synchronous>, transform_indices = @transform_12, window_bounds = array<i64: 1, 128>}, {pipeline_mode = #tpu.pipeline_mode<synchronous>, transform_indices = @transform_13, window_bounds = array<i64: 128, 32>}, {transform_indices = @transform_14, window_bounds = array<i64: 1, 8, 32>}, {transform_indices = @transform_15, window_bounds = array<i64: 1, 1, 8, 128>}]} {
    %0 = tpu.iota {dimensions = array<i32: 0>} : vector<8x128xi32>
    %c0_i32 = arith.constant 0 : i32
    %1 = arith.cmpi eq, %arg2, %c0_i32 : i32
    %2 = arith.extui %1 : i1 to i32
    %c0_i32_0 = arith.constant 0 : i32
    %3 = arith.cmpi ne, %2, %c0_i32_0 : i32
    scf.if %3 {
      %c0 = arith.constant 0 : index
      %c0_3 = arith.constant 0 : index
      %c0_4 = arith.constant 0 : index
      %10 = vector.load %arg3[%c0, %c0_3, %c0_4] : memref<1x8x32xf32, #tpu.memory_space<vmem>>, vector<1x8x32xf32>
      %11 = vector.shape_cast %10 : vector<1x8x32xf32> to vector<8x32xf32>
      %c0_5 = arith.constant 0 : index
      %c0_6 = arith.constant 0 : index
      %12 = vector.load %arg5[%c0_5, %c0_6] : memref<1x32xf32, #tpu.memory_space<vmem>>, vector<1x32xf32>
      %13 = vector.shape_cast %12 : vector<1x32xf32> to vector<32xf32>
      %c0_7 = arith.constant 0 : index
      %c0_8 = arith.constant 0 : index
      %14 = vector.load %arg6[%c0_7, %c0_8] : memref<1x32xf32, #tpu.memory_space<vmem>>, vector<1x32xf32>
      %15 = vector.shape_cast %14 : vector<1x32xf32> to vector<32xf32>
      %cst = arith.constant dense<0.000000e+00> : vector<8xf32>
      %16 = vector.multi_reduction <add>, %11, %cst [1] : vector<8x32xf32> to vector<8xf32>
      %17 = vector.shape_cast %16 : vector<8xf32> to vector<8x1xf32>
      %cst_9 = arith.constant 3.200000e+01 : f32
      %18 = vector.broadcast %cst_9 : f32 to vector<8x1xf32>
      %19 = arith.divf %17, %18 : vector<8x1xf32>
      %20 = vector.broadcast %19 : vector<8x1xf32> to vector<8x32xf32>
      %21 = arith.subf %11, %20 : vector<8x32xf32>
      %22 = arith.mulf %21, %21 : vector<8x32xf32>
      %cst_10 = arith.constant dense<0.000000e+00> : vector<8xf32>
      %23 = vector.multi_reduction <add>, %22, %cst_10 [1] : vector<8x32xf32> to vector<8xf32>
      %24 = vector.shape_cast %23 : vector<8xf32> to vector<8x1xf32>
      %cst_11 = arith.constant 3.200000e+01 : f32
      %25 = vector.broadcast %cst_11 : f32 to vector<8x1xf32>
      %26 = arith.divf %24, %25 : vector<8x1xf32>
      %27 = vector.broadcast %19 : vector<8x1xf32> to vector<8x32xf32>
      %28 = arith.subf %11, %27 : vector<8x32xf32>
      %cst_12 = arith.constant 9.99999974E-6 : f32
      %29 = vector.broadcast %cst_12 : f32 to vector<8x1xf32>
      %30 = arith.addf %26, %29 : vector<8x1xf32>
      %31 = math.rsqrt %30 : vector<8x1xf32>
      %32 = vector.broadcast %31 : vector<8x1xf32> to vector<8x32xf32>
      %33 = arith.mulf %28, %32 : vector<8x32xf32>
      %34 = vector.shape_cast %13 : vector<32xf32> to vector<1x32xf32>
      %35 = vector.broadcast %34 : vector<1x32xf32> to vector<8x32xf32>
      %36 = arith.mulf %33, %35 : vector<8x32xf32>
      %37 = vector.shape_cast %15 : vector<32xf32> to vector<1x32xf32>
      %38 = vector.broadcast %37 : vector<1x32xf32> to vector<8x32xf32>
      %39 = arith.addf %36, %38 : vector<8x32xf32>
      %c0_i32_13 = arith.constant 0 : i32
      %40 = vector.broadcast %c0_i32_13 : i32 to vector<8x128xi32>
      %41 = arith.cmpi eq, %0, %40 : vector<8x128xi32>
      %cst_14 = arith.constant dense<0.000000e+00> : vector<8xf32>
      %42 = vector.multi_reduction <add>, %39, %cst_14 [1] : vector<8x32xf32> to vector<8xf32>
      %43 = vector.shape_cast %42 : vector<8xf32> to vector<8x1xf32>
      %cst_15 = arith.constant 3.200000e+01 : f32
      %44 = vector.broadcast %cst_15 : f32 to vector<8x1xf32>
      %45 = arith.divf %43, %44 : vector<8x1xf32>
      %46 = vector.broadcast %45 : vector<8x1xf32> to vector<8x32xf32>
      %47 = arith.subf %39, %46 : vector<8x32xf32>
      %48 = arith.mulf %47, %47 : vector<8x32xf32>
      %cst_16 = arith.constant dense<0.000000e+00> : vector<8xf32>
      %49 = vector.multi_reduction <add>, %48, %cst_16 [1] : vector<8x32xf32> to vector<8xf32>
      %50 = vector.shape_cast %49 : vector<8xf32> to vector<8x1xf32>
      %cst_17 = arith.constant 3.100000e+01 : f32
      %51 = vector.broadcast %cst_17 : f32 to vector<8x1xf32>
      %52 = arith.divf %50, %51 : vector<8x1xf32>
      %53 = math.sqrt %52 : vector<8x1xf32>
      %54 = vector.shape_cast %53 : vector<8x1xf32> to vector<1x8x1xf32>
      %cst_18 = arith.constant dense<0.000000e+00> : vector<1xf32>
      %55 = vector.multi_reduction <add>, %54, %cst_18 [1, 2] : vector<1x8x1xf32> to vector<1xf32>
      %56 = vector.shape_cast %55 : vector<1xf32> to vector<1x1x1xf32>
      %57 = vector.extract %56[0, 0, 0] : f32 from vector<1x1x1xf32>
      %58 = vector.broadcast %57 : f32 to vector<1x1xf32>
      %cst_19 = arith.constant 0.000000e+00 : f32
      %59 = vector.shape_cast %58 : vector<1x1xf32> to vector<1x1xf32>
      %60 = vector.broadcast %59 : vector<1x1xf32> to vector<8x128xf32>
      %61 = vector.broadcast %cst_19 : f32 to vector<8x128xf32>
      %62 = arith.select %41, %60, %61 : vector<8x128xi1>, vector<8x128xf32>
      %c0_20 = arith.constant 0 : index
      %c0_21 = arith.constant 0 : index
      %c0_22 = arith.constant 0 : index
      %c0_23 = arith.constant 0 : index
      %63 = vector.load %arg18[%c0_20, %c0_21, %c0_22, %c0_23] : memref<1x1x8x128xf32, #tpu.memory_space<vmem>>, vector<1x1x8x128xf32>
      %64 = vector.shape_cast %63 : vector<1x1x8x128xf32> to vector<8x128xf32>
      %65 = vector.shape_cast %62 : vector<8x128xf32> to vector<1x1x8x128xf32>
      tpu.vector_store %arg18[%c0_20, %c0_21, %c0_22, %c0_23], %65 {strides = array<i32>} : memref<1x1x8x128xf32, #tpu.memory_space<vmem>>, vector<1x1x8x128xf32>,
      %66 = arith.truncf %39 : vector<8x32xf32> to vector<8x32xbf16>
      %c0_24 = arith.constant 0 : index
      %c0_25 = arith.constant 0 : index
      %67 = vector.load %arg8[%c0_24, %c0_25] : memref<32x32xbf16, #tpu.memory_space<vmem>>, vector<32x32xbf16>
      %cst_26 = arith.constant dense<0.000000e+00> : vector<8x32xf32>
      %68 = tpu.matmul %66, %67, %cst_26 {dimension_numbers = #tpu.dot_dimension_numbers<[1], [0], [0], [1], [0, 0, 1, 1], [], []>} : vector<8x32xbf16>, vector<32x32xbf16>, vector<8x32xf32> -> vector<8x32xf32>
      %cst_27 = arith.constant 0.353553385 : f32
      %69 = vector.broadcast %cst_27 : f32 to vector<8x32xf32>
      %70 = arith.mulf %68, %69 : vector<8x32xf32>
      %71 = vector.shape_cast %70 : vector<8x32xf32> to vector<8x4x8xf32>
      %72 = tpu.transpose %71, [1, 0, 2] : vector<8x4x8xf32> -> vector<4x8x8xf32>
      %73 = arith.truncf %72 : vector<4x8x8xf32> to vector<4x8x8xbf16>
      %c0_28 = arith.constant 0 : index
      %c0_29 = arith.constant 0 : index
      %c0_30 = arith.constant 0 : index
      %74 = vector.load %arg19[%c0_28, %c0_29, %c0_30] : memref<4x8x8xbf16, #tpu.memory_space<vmem>>, vector<4x8x8xbf16>
      tpu.vector_store %arg19[%c0_28, %c0_29, %c0_30], %73 {strides = array<i32>} : memref<4x8x8xbf16, #tpu.memory_space<vmem>>, vector<4x8x8xbf16>,
      %cst_31 = arith.constant -1.000000e+30 : f32
      %75 = vector.broadcast %cst_31 : f32 to vector<4x8x1xf32>
      %c0_32 = arith.constant 0 : index
      %c0_33 = arith.constant 0 : index
      %c0_34 = arith.constant 0 : index
      %76 = vector.load %arg20[%c0_32, %c0_33, %c0_34] : memref<4x8x1xf32, #tpu.memory_space<vmem>>, vector<4x8x1xf32>
      tpu.vector_store %arg20[%c0_32, %c0_33, %c0_34], %75 {strides = array<i32>} : memref<4x8x1xf32, #tpu.memory_space<vmem>>, vector<4x8x1xf32>,
      %cst_35 = arith.constant 0.000000e+00 : f32
      %77 = vector.broadcast %cst_35 : f32 to vector<4x8x1xf32>
      %c0_36 = arith.constant 0 : index
      %c0_37 = arith.constant 0 : index
      %c0_38 = arith.constant 0 : index
      %78 = vector.load %arg21[%c0_36, %c0_37, %c0_38] : memref<4x8x1xf32, #tpu.memory_space<vmem>>, vector<4x8x1xf32>
      tpu.vector_store %arg21[%c0_36, %c0_37, %c0_38], %77 {strides = array<i32>} : memref<4x8x1xf32, #tpu.memory_space<vmem>>, vector<4x8x1xf32>,
      %cst_39 = arith.constant 0.000000e+00 : f32
      %79 = vector.broadcast %cst_39 : f32 to vector<4x8x8xf32>
      %c0_40 = arith.constant 0 : index
      %c0_41 = arith.constant 0 : index
      %c0_42 = arith.constant 0 : index
      %80 = vector.load %arg22[%c0_40, %c0_41, %c0_42] : memref<4x8x8xf32, #tpu.memory_space<vmem>>, vector<4x8x8xf32>
      tpu.vector_store %arg22[%c0_40, %c0_41, %c0_42], %79 {strides = array<i32>} : memref<4x8x8xf32, #tpu.memory_space<vmem>>, vector<4x8x8xf32>,
    } else {
    }
    %4 = arith.cmpi sle, %arg2, %arg1 : i32
    %5 = arith.extui %4 : i1 to i32
    %c0_i32_1 = arith.constant 0 : i32
    %6 = arith.cmpi ne, %5, %c0_i32_1 : i32
    scf.if %6 {
      %c0 = arith.constant 0 : index
      %c0_3 = arith.constant 0 : index
      %c0_4 = arith.constant 0 : index
      %10 = vector.load %arg4[%c0, %c0_3, %c0_4] : memref<1x8x32xf32, #tpu.memory_space<vmem>>, vector<1x8x32xf32>
      %11 = vector.shape_cast %10 : vector<1x8x32xf32> to vector<8x32xf32>
      %c0_5 = arith.constant 0 : index
      %c0_6 = arith.constant 0 : index
      %12 = vector.load %arg5[%c0_5, %c0_6] : memref<1x32xf32, #tpu.memory_space<vmem>>, vector<1x32xf32>
      %13 = vector.shape_cast %12 : vector<1x32xf32> to vector<32xf32>
      %c0_7 = arith.constant 0 : index
      %c0_8 = arith.constant 0 : index
      %14 = vector.load %arg6[%c0_7, %c0_8] : memref<1x32xf32, #tpu.memory_space<vmem>>, vector<1x32xf32>
      %15 = vector.shape_cast %14 : vector<1x32xf32> to vector<32xf32>
      %cst = arith.constant dense<0.000000e+00> : vector<8xf32>
      %16 = vector.multi_reduction <add>, %11, %cst [1] : vector<8x32xf32> to vector<8xf32>
      %17 = vector.shape_cast %16 : vector<8xf32> to vector<8x1xf32>
      %cst_9 = arith.constant 3.200000e+01 : f32
      %18 = vector.broadcast %cst_9 : f32 to vector<8x1xf32>
      %19 = arith.divf %17, %18 : vector<8x1xf32>
      %20 = vector.broadcast %19 : vector<8x1xf32> to vector<8x32xf32>
      %21 = arith.subf %11, %20 : vector<8x32xf32>
      %22 = arith.mulf %21, %21 : vector<8x32xf32>
      %cst_10 = arith.constant dense<0.000000e+00> : vector<8xf32>
      %23 = vector.multi_reduction <add>, %22, %cst_10 [1] : vector<8x32xf32> to vector<8xf32>
      %24 = vector.shape_cast %23 : vector<8xf32> to vector<8x1xf32>
      %cst_11 = arith.constant 3.200000e+01 : f32
      %25 = vector.broadcast %cst_11 : f32 to vector<8x1xf32>
      %26 = arith.divf %24, %25 : vector<8x1xf32>
      %27 = vector.broadcast %19 : vector<8x1xf32> to vector<8x32xf32>
      %28 = arith.subf %11, %27 : vector<8x32xf32>
      %cst_12 = arith.constant 9.99999974E-6 : f32
      %29 = vector.broadcast %cst_12 : f32 to vector<8x1xf32>
      %30 = arith.addf %26, %29 : vector<8x1xf32>
      %31 = math.rsqrt %30 : vector<8x1xf32>
      %32 = vector.broadcast %31 : vector<8x1xf32> to vector<8x32xf32>
      %33 = arith.mulf %28, %32 : vector<8x32xf32>
      %34 = vector.shape_cast %13 : vector<32xf32> to vector<1x32xf32>
      %35 = vector.broadcast %34 : vector<1x32xf32> to vector<8x32xf32>
      %36 = arith.mulf %33, %35 : vector<8x32xf32>
      %37 = vector.shape_cast %15 : vector<32xf32> to vector<1x32xf32>
      %38 = vector.broadcast %37 : vector<1x32xf32> to vector<8x32xf32>
      %39 = arith.addf %36, %38 : vector<8x32xf32>
      %40 = arith.truncf %39 : vector<8x32xf32> to vector<8x32xbf16>
      %c0_13 = arith.constant 0 : index
      %c0_14 = arith.constant 0 : index
      %41 = vector.load %arg7[%c0_13, %c0_14] : memref<32x32xbf16, #tpu.memory_space<vmem>>, vector<32x32xbf16>
      %cst_15 = arith.constant dense<0.000000e+00> : vector<8x32xf32>
      %42 = tpu.matmul %40, %41, %cst_15 {dimension_numbers = #tpu.dot_dimension_numbers<[1], [0], [0], [1], [0, 0, 1, 1], [], []>} : vector<8x32xbf16>, vector<32x32xbf16>, vector<8x32xf32> -> vector<8x32xf32>
      %c0_16 = arith.constant 0 : index
      %c0_17 = arith.constant 0 : index
      %43 = vector.load %arg9[%c0_16, %c0_17] : memref<32x32xbf16, #tpu.memory_space<vmem>>, vector<32x32xbf16>
      %cst_18 = arith.constant dense<0.000000e+00> : vector<8x32xf32>
      %44 = tpu.matmul %40, %43, %cst_18 {dimension_numbers = #tpu.dot_dimension_numbers<[1], [0], [0], [1], [0, 0, 1, 1], [], []>} : vector<8x32xbf16>, vector<32x32xbf16>, vector<8x32xf32> -> vector<8x32xf32>
      %45 = vector.shape_cast %42 : vector<8x32xf32> to vector<8x4x8xf32>
      %46 = tpu.transpose %45, [1, 0, 2] : vector<8x4x8xf32> -> vector<4x8x8xf32>
      %47 = arith.truncf %46 : vector<4x8x8xf32> to vector<4x8x8xbf16>
      %48 = vector.shape_cast %44 : vector<8x32xf32> to vector<8x4x8xf32>
      %49 = tpu.transpose %48, [1, 0, 2] : vector<8x4x8xf32> -> vector<4x8x8xf32>
      %50 = arith.truncf %49 : vector<4x8x8xf32> to vector<4x8x8xbf16>
      %c0_19 = arith.constant 0 : index
      %c0_20 = arith.constant 0 : index
      %c0_21 = arith.constant 0 : index
      %51 = vector.load %arg19[%c0_19, %c0_20, %c0_21] : memref<4x8x8xbf16, #tpu.memory_space<vmem>>, vector<4x8x8xbf16>
      "tpu.trace_start"() <{level = 10 : i32, message = "hqd,hkd->hqk"}> : () -> ()
      %cst_22 = arith.constant dense<0.000000e+00> : vector<4x8x8xf32>
      %52 = tpu.matmul %51, %47, %cst_22 {dimension_numbers = #tpu.dot_dimension_numbers<[2], [2], [1], [1], [0, 0, 0, 1, 1, 1], [0], [0]>} : vector<4x8x8xbf16>, vector<4x8x8xbf16>, vector<4x8x8xf32> -> vector<4x8x8xf32>
      "tpu.trace_stop"() : () -> ()
      %c8_i32 = arith.constant 8 : i32
      %53 = arith.muli %arg1, %c8_i32 : i32
      %54 = tpu.iota {dimensions = array<i32: 0>} : vector<8x8xi32>
      %55 = vector.broadcast %53 : i32 to vector<8x8xi32>
      %56 = arith.addi %55, %54 : vector<8x8xi32>
      %c8_i32_23 = arith.constant 8 : i32
      %57 = arith.muli %arg2, %c8_i32_23 : i32
      %58 = tpu.iota {dimensions = array<i32: 1>} : vector<8x8xi32>
      %59 = vector.broadcast %57 : i32 to vector<8x8xi32>
      %60 = arith.addi %59, %58 : vector<8x8xi32>
      %61 = arith.cmpi sle, %60, %56 : vector<8x8xi32>
      %62 = vector.shape_cast %61 : vector<8x8xi1> to vector<1x8x8xi1>
      %cst_24 = arith.constant -1.000000e+30 : f32
      %63 = vector.shape_cast %62 : vector<1x8x8xi1> to vector<1x8x8xi1>
      %64 = vector.broadcast %63 : vector<1x8x8xi1> to vector<4x8x8xi1>
      %65 = vector.broadcast %cst_24 : f32 to vector<4x8x8xf32>
      %66 = arith.select %64, %52, %65 : vector<4x8x8xi1>, vector<4x8x8xf32>
      %c0_25 = arith.constant 0 : index
      %c0_26 = arith.constant 0 : index
      %c0_27 = arith.constant 0 : index
      %67 = vector.load %arg20[%c0_25, %c0_26, %c0_27] : memref<4x8x1xf32, #tpu.memory_space<vmem>>, vector<4x8x1xf32>
      %cst_28 = arith.constant dense<0xFF800000> : vector<4x8xf32>
      %68 = vector.multi_reduction <maximumf>, %66, %cst_28 [2] : vector<4x8x8xf32> to vector<4x8xf32>
      %69 = vector.shape_cast %68 : vector<4x8xf32> to vector<4x8x1xf32>
      %70 = arith.maximumf %67, %69 : vector<4x8x1xf32>
      %c0_29 = arith.constant 0 : index
      %c0_30 = arith.constant 0 : index
      %c0_31 = arith.constant 0 : index
      %71 = vector.load %arg20[%c0_29, %c0_30, %c0_31] : memref<4x8x1xf32, #tpu.memory_space<vmem>>, vector<4x8x1xf32>
      %72 = arith.subf %71, %70 : vector<4x8x1xf32>
      %73 = math.exp %72 : vector<4x8x1xf32>
      %74 = vector.broadcast %70 : vector<4x8x1xf32> to vector<4x8x8xf32>
      %75 = arith.subf %66, %74 : vector<4x8x8xf32>
      %76 = math.exp %75 : vector<4x8x8xf32>
      %c0_32 = arith.constant 0 : index
      %c0_33 = arith.constant 0 : index
      %c0_34 = arith.constant 0 : index
      %77 = vector.load %arg21[%c0_32, %c0_33, %c0_34] : memref<4x8x1xf32, #tpu.memory_space<vmem>>, vector<4x8x1xf32>
      %78 = arith.mulf %73, %77 : vector<4x8x1xf32>
      %cst_35 = arith.constant dense<0.000000e+00> : vector<4x8xf32>
      %79 = vector.multi_reduction <add>, %76, %cst_35 [2] : vector<4x8x8xf32> to vector<4x8xf32>
      %80 = vector.shape_cast %79 : vector<4x8xf32> to vector<4x8x1xf32>
      %81 = arith.addf %78, %80 : vector<4x8x1xf32>
      %c0_36 = arith.constant 0 : index
      %c0_37 = arith.constant 0 : index
      %c0_38 = arith.constant 0 : index
      %82 = vector.load %arg21[%c0_36, %c0_37, %c0_38] : memref<4x8x1xf32, #tpu.memory_space<vmem>>, vector<4x8x1xf32>
      tpu.vector_store %arg21[%c0_36, %c0_37, %c0_38], %81 {strides = array<i32>} : memref<4x8x1xf32, #tpu.memory_space<vmem>>, vector<4x8x1xf32>,
      %c0_39 = arith.constant 0 : index
      %c0_40 = arith.constant 0 : index
      %c0_41 = arith.constant 0 : index
      %83 = vector.load %arg22[%c0_39, %c0_40, %c0_41] : memref<4x8x8xf32, #tpu.memory_space<vmem>>, vector<4x8x8xf32>
      %84 = vector.broadcast %73 : vector<4x8x1xf32> to vector<4x8x8xf32>
      %85 = arith.mulf %84, %83 : vector<4x8x8xf32>
      %86 = arith.truncf %76 : vector<4x8x8xf32> to vector<4x8x8xbf16>
      "tpu.trace_start"() <{level = 10 : i32, message = "hqk,hkd->hqd"}> : () -> ()
      %cst_42 = arith.constant dense<0.000000e+00> : vector<4x8x8xf32>
      %87 = tpu.matmul %86, %50, %cst_42 {dimension_numbers = #tpu.dot_dimension_numbers<[2], [1], [1], [2], [0, 0, 0, 1, 1, 2], [0], [0]>} : vector<4x8x8xbf16>, vector<4x8x8xbf16>, vector<4x8x8xf32> -> vector<4x8x8xf32>
      "tpu.trace_stop"() : () -> ()
      %88 = arith.addf %85, %87 : vector<4x8x8xf32>
      %c0_43 = arith.constant 0 : index
      %c0_44 = arith.constant 0 : index
      %c0_45 = arith.constant 0 : index
      %89 = vector.load %arg22[%c0_43, %c0_44, %c0_45] : memref<4x8x8xf32, #tpu.memory_space<vmem>>, vector<4x8x8xf32>
      tpu.vector_store %arg22[%c0_43, %c0_44, %c0_45], %88 {strides = array<i32>} : memref<4x8x8xf32, #tpu.memory_space<vmem>>, vector<4x8x8xf32>,
      %c0_46 = arith.constant 0 : index
      %c0_47 = arith.constant 0 : index
      %c0_48 = arith.constant 0 : index
      %90 = vector.load %arg20[%c0_46, %c0_47, %c0_48] : memref<4x8x1xf32, #tpu.memory_space<vmem>>, vector<4x8x1xf32>
      tpu.vector_store %arg20[%c0_46, %c0_47, %c0_48], %70 {strides = array<i32>} : memref<4x8x1xf32, #tpu.memory_space<vmem>>, vector<4x8x1xf32>,
    } else {
    }
    %7 = arith.cmpi eq, %arg2, %arg1 : i32
    %8 = arith.extui %7 : i1 to i32
    %c0_i32_2 = arith.constant 0 : i32
    %9 = arith.cmpi ne, %8, %c0_i32_2 : i32
    scf.if %9 {
      %c0 = arith.constant 0 : index
      %c0_3 = arith.constant 0 : index
      %c0_4 = arith.constant 0 : index
      %10 = vector.load %arg3[%c0, %c0_3, %c0_4] : memref<1x8x32xf32, #tpu.memory_space<vmem>>, vector<1x8x32xf32>
      %11 = vector.shape_cast %10 : vector<1x8x32xf32> to vector<8x32xf32>
      %c0_5 = arith.constant 0 : index
      %c0_6 = arith.constant 0 : index
      %c0_7 = arith.constant 0 : index
      %12 = vector.load %arg22[%c0_5, %c0_6, %c0_7] : memref<4x8x8xf32, #tpu.memory_space<vmem>>, vector<4x8x8xf32>
      %c0_8 = arith.constant 0 : index
      %c0_9 = arith.constant 0 : index
      %c0_10 = arith.constant 0 : index
      %13 = vector.load %arg21[%c0_8, %c0_9, %c0_10] : memref<4x8x1xf32, #tpu.memory_space<vmem>>, vector<4x8x1xf32>
      %14 = tpu.reciprocal %13 {approx = true} : vector<4x8x1xf32> -> vector<4x8x1xf32>
      %15 = vector.broadcast %14 : vector<4x8x1xf32> to vector<4x8x8xf32>
      %16 = arith.mulf %12, %15 : vector<4x8x8xf32>
      %17 = tpu.transpose %16, [1, 0, 2] : vector<4x8x8xf32> -> vector<8x4x8xf32>
      %18 = vector.shape_cast %17 : vector<8x4x8xf32> to vector<8x32xf32>
      %19 = arith.truncf %18 : vector<8x32xf32> to vector<8x32xbf16>
      %c0_11 = arith.constant 0 : index
      %c0_12 = arith.constant 0 : index
      %20 = vector.load %arg10[%c0_11, %c0_12] : memref<32x32xbf16, #tpu.memory_space<vmem>>, vector<32x32xbf16>
      %cst = arith.constant dense<0.000000e+00> : vector<8x32xf32>
      %21 = tpu.matmul %19, %20, %cst {dimension_numbers = #tpu.dot_dimension_numbers<[1], [0], [0], [1], [0, 0, 1, 1], [], []>} : vector<8x32xbf16>, vector<32x32xbf16>, vector<8x32xf32> -> vector<8x32xf32>
      %c0_13 = arith.constant 0 : index
      %c0_14 = arith.constant 0 : index
      %22 = vector.load %arg11[%c0_13, %c0_14] : memref<1x32xf32, #tpu.memory_space<vmem>>, vector<1x32xf32>
      %23 = vector.shape_cast %22 : vector<1x32xf32> to vector<32xf32>
      %24 = vector.shape_cast %23 : vector<32xf32> to vector<1x32xf32>
      %25 = vector.broadcast %24 : vector<1x32xf32> to vector<8x32xf32>
      %26 = arith.addf %21, %25 : vector<8x32xf32>
      %27 = arith.addf %11, %26 : vector<8x32xf32>
      %c0_15 = arith.constant 0 : index
      %c0_16 = arith.constant 0 : index
      %28 = vector.load %arg12[%c0_15, %c0_16] : memref<1x32xf32, #tpu.memory_space<vmem>>, vector<1x32xf32>
      %29 = vector.shape_cast %28 : vector<1x32xf32> to vector<32xf32>
      %c0_17 = arith.constant 0 : index
      %c0_18 = arith.constant 0 : index
      %30 = vector.load %arg13[%c0_17, %c0_18] : memref<1x32xf32, #tpu.memory_space<vmem>>, vector<1x32xf32>
      %31 = vector.shape_cast %30 : vector<1x32xf32> to vector<32xf32>
      %cst_19 = arith.constant dense<0.000000e+00> : vector<8xf32>
      %32 = vector.multi_reduction <add>, %27, %cst_19 [1] : vector<8x32xf32> to vector<8xf32>
      %33 = vector.shape_cast %32 : vector<8xf32> to vector<8x1xf32>
      %cst_20 = arith.constant 3.200000e+01 : f32
      %34 = vector.broadcast %cst_20 : f32 to vector<8x1xf32>
      %35 = arith.divf %33, %34 : vector<8x1xf32>
      %36 = vector.broadcast %35 : vector<8x1xf32> to vector<8x32xf32>
      %37 = arith.subf %27, %36 : vector<8x32xf32>
      %38 = arith.mulf %37, %37 : vector<8x32xf32>
      %cst_21 = arith.constant dense<0.000000e+00> : vector<8xf32>
      %39 = vector.multi_reduction <add>, %38, %cst_21 [1] : vector<8x32xf32> to vector<8xf32>
      %40 = vector.shape_cast %39 : vector<8xf32> to vector<8x1xf32>
      %cst_22 = arith.constant 3.200000e+01 : f32
      %41 = vector.broadcast %cst_22 : f32 to vector<8x1xf32>
      %42 = arith.divf %40, %41 : vector<8x1xf32>
      %43 = vector.broadcast %35 : vector<8x1xf32> to vector<8x32xf32>
      %44 = arith.subf %27, %43 : vector<8x32xf32>
      %cst_23 = arith.constant 9.99999974E-6 : f32
      %45 = vector.broadcast %cst_23 : f32 to vector<8x1xf32>
      %46 = arith.addf %42, %45 : vector<8x1xf32>
      %47 = math.rsqrt %46 : vector<8x1xf32>
      %48 = vector.broadcast %47 : vector<8x1xf32> to vector<8x32xf32>
      %49 = arith.mulf %44, %48 : vector<8x32xf32>
      %50 = vector.shape_cast %29 : vector<32xf32> to vector<1x32xf32>
      %51 = vector.broadcast %50 : vector<1x32xf32> to vector<8x32xf32>
      %52 = arith.mulf %49, %51 : vector<8x32xf32>
      %53 = vector.shape_cast %31 : vector<32xf32> to vector<1x32xf32>
      %54 = vector.broadcast %53 : vector<1x32xf32> to vector<8x32xf32>
      %55 = arith.addf %52, %54 : vector<8x32xf32>
      %56 = arith.truncf %55 : vector<8x32xf32> to vector<8x32xbf16>
      %cst_24 = arith.constant 0.000000e+00 : f32
      %57 = vector.broadcast %cst_24 : f32 to vector<8x32xf32>
      %c0_25 = arith.constant 0 : index
      %c0_26 = arith.constant 0 : index
      %58 = vector.load %arg14[%c0_25, %c0_26] : memref<32x128xbf16, #tpu.memory_space<vmem>>, vector<32x128xbf16>
      %cst_27 = arith.constant dense<0.000000e+00> : vector<8x128xf32>
      %59 = tpu.matmul %56, %58, %cst_27 {dimension_numbers = #tpu.dot_dimension_numbers<[1], [0], [0], [1], [0, 0, 1, 1], [], []>} : vector<8x32xbf16>, vector<32x128xbf16>, vector<8x128xf32> -> vector<8x128xf32>
      %c0_28 = arith.constant 0 : index
      %c0_29 = arith.constant 0 : index
      %60 = vector.load %arg15[%c0_28, %c0_29] : memref<1x128xf32, #tpu.memory_space<vmem>>, vector<1x128xf32>
      %61 = vector.shape_cast %60 : vector<1x128xf32> to vector<128xf32>
      %62 = vector.shape_cast %61 : vector<128xf32> to vector<1x128xf32>
      %63 = vector.broadcast %62 : vector<1x128xf32> to vector<8x128xf32>
      %64 = arith.addf %59, %63 : vector<8x128xf32>
      %cst_30 = arith.constant 0.636619746 : f32
      %65 = math.sqrt %cst_30 : f32
      %cst_31 = arith.constant 5.000000e-01 : f32
      %66 = vector.broadcast %cst_31 : f32 to vector<8x128xf32>
      %67 = arith.mulf %66, %64 : vector<8x128xf32>
      %cst_32 = arith.constant 4.471500e-02 : f32
      %68 = vector.broadcast %cst_32 : f32 to vector<8x128xf32>
      %69 = arith.mulf %68, %64 : vector<8x128xf32>
      %70 = arith.mulf %69, %64 : vector<8x128xf32>
      %71 = arith.mulf %70, %64 : vector<8x128xf32>
      %72 = arith.addf %64, %71 : vector<8x128xf32>
      %73 = vector.broadcast %65 : f32 to vector<8x128xf32>
      %74 = arith.mulf %73, %72 : vector<8x128xf32>
      %75 = math.tanh %74 : vector<8x128xf32>
      %cst_33 = arith.constant 1.000000e+00 : f32
      %76 = vector.broadcast %cst_33 : f32 to vector<8x128xf32>
      %77 = arith.addf %76, %75 : vector<8x128xf32>
      %78 = arith.mulf %67, %77 : vector<8x128xf32>
      %79 = arith.truncf %78 : vector<8x128xf32> to vector<8x128xbf16>
      %c0_34 = arith.constant 0 : index
      %c0_35 = arith.constant 0 : index
      %80 = vector.load %arg16[%c0_34, %c0_35] : memref<128x32xbf16, #tpu.memory_space<vmem>>, vector<128x32xbf16>
      %cst_36 = arith.constant dense<0.000000e+00> : vector<8x32xf32>
      %81 = tpu.matmul %79, %80, %cst_36 {dimension_numbers = #tpu.dot_dimension_numbers<[1], [0], [0], [1], [0, 0, 1, 1], [], []>} : vector<8x128xbf16>, vector<128x32xbf16>, vector<8x32xf32> -> vector<8x32xf32>
      %82 = arith.addf %57, %81 : vector<8x32xf32>
      %83 = arith.addf %82, %26 : vector<8x32xf32>
      %c0_37 = arith.constant 0 : index
      %c0_38 = arith.constant 0 : index
      %c0_39 = arith.constant 0 : index
      %c0_40 = arith.constant 0 : index
      %84 = vector.load %arg18[%c0_37, %c0_38, %c0_39, %c0_40] : memref<1x1x8x128xf32, #tpu.memory_space<vmem>>, vector<1x1x8x128xf32>
      %85 = vector.shape_cast %84 : vector<1x1x8x128xf32> to vector<8x128xf32>
      %c1_i32 = arith.constant 1 : i32
      %86 = vector.broadcast %c1_i32 : i32 to vector<8x128xi32>
      %87 = arith.cmpi eq, %0, %86 : vector<8x128xi32>
      %cst_41 = arith.constant dense<0.000000e+00> : vector<8xf32>
      %88 = vector.multi_reduction <add>, %26, %cst_41 [1] : vector<8x32xf32> to vector<8xf32>
      %89 = vector.shape_cast %88 : vector<8xf32> to vector<8x1xf32>
      %cst_42 = arith.constant 3.200000e+01 : f32
      %90 = vector.broadcast %cst_42 : f32 to vector<8x1xf32>
      %91 = arith.divf %89, %90 : vector<8x1xf32>
      %92 = vector.broadcast %91 : vector<8x1xf32> to vector<8x32xf32>
      %93 = arith.subf %26, %92 : vector<8x32xf32>
      %94 = arith.mulf %93, %93 : vector<8x32xf32>
      %cst_43 = arith.constant dense<0.000000e+00> : vector<8xf32>
      %95 = vector.multi_reduction <add>, %94, %cst_43 [1] : vector<8x32xf32> to vector<8xf32>
      %96 = vector.shape_cast %95 : vector<8xf32> to vector<8x1xf32>
      %cst_44 = arith.constant 3.100000e+01 : f32
      %97 = vector.broadcast %cst_44 : f32 to vector<8x1xf32>
      %98 = arith.divf %96, %97 : vector<8x1xf32>
      %99 = math.sqrt %98 : vector<8x1xf32>
      %100 = vector.shape_cast %99 : vector<8x1xf32> to vector<1x8x1xf32>
      %cst_45 = arith.constant dense<0.000000e+00> : vector<1xf32>
      %101 = vector.multi_reduction <add>, %100, %cst_45 [1, 2] : vector<1x8x1xf32> to vector<1xf32>
      %102 = vector.shape_cast %101 : vector<1xf32> to vector<1x1x1xf32>
      %103 = vector.extract %102[0, 0, 0] : f32 from vector<1x1x1xf32>
      %104 = vector.broadcast %103 : f32 to vector<1x1xf32>
      %cst_46 = arith.constant 0.000000e+00 : f32
      %105 = vector.shape_cast %104 : vector<1x1xf32> to vector<1x1xf32>
      %106 = vector.broadcast %105 : vector<1x1xf32> to vector<8x128xf32>
      %107 = vector.broadcast %cst_46 : f32 to vector<8x128xf32>
      %108 = arith.select %87, %106, %107 : vector<8x128xi1>, vector<8x128xf32>
      %109 = arith.addf %85, %108 : vector<8x128xf32>
      %c2_i32 = arith.constant 2 : i32
      %110 = vector.broadcast %c2_i32 : i32 to vector<8x128xi32>
      %111 = arith.cmpi eq, %0, %110 : vector<8x128xi32>
      %cst_47 = arith.constant dense<0.000000e+00> : vector<8xf32>
      %112 = vector.multi_reduction <add>, %83, %cst_47 [1] : vector<8x32xf32> to vector<8xf32>
      %113 = vector.shape_cast %112 : vector<8xf32> to vector<8x1xf32>
      %cst_48 = arith.constant 3.200000e+01 : f32
      %114 = vector.broadcast %cst_48 : f32 to vector<8x1xf32>
      %115 = arith.divf %113, %114 : vector<8x1xf32>
      %116 = vector.broadcast %115 : vector<8x1xf32> to vector<8x32xf32>
      %117 = arith.subf %83, %116 : vector<8x32xf32>
      %118 = arith.mulf %117, %117 : vector<8x32xf32>
      %cst_49 = arith.constant dense<0.000000e+00> : vector<8xf32>
      %119 = vector.multi_reduction <add>, %118, %cst_49 [1] : vector<8x32xf32> to vector<8xf32>
      %120 = vector.shape_cast %119 : vector<8xf32> to vector<8x1xf32>
      %cst_50 = arith.constant 3.100000e+01 : f32
      %121 = vector.broadcast %cst_50 : f32 to vector<8x1xf32>
      %122 = arith.divf %120, %121 : vector<8x1xf32>
      %123 = math.sqrt %122 : vector<8x1xf32>
      %124 = vector.shape_cast %123 : vector<8x1xf32> to vector<1x8x1xf32>
      %cst_51 = arith.constant dense<0.000000e+00> : vector<1xf32>
      %125 = vector.multi_reduction <add>, %124, %cst_51 [1, 2] : vector<1x8x1xf32> to vector<1xf32>
      %126 = vector.shape_cast %125 : vector<1xf32> to vector<1x1x1xf32>
      %127 = vector.extract %126[0, 0, 0] : f32 from vector<1x1x1xf32>
      %128 = vector.broadcast %127 : f32 to vector<1x1xf32>
      %cst_52 = arith.constant 0.000000e+00 : f32
      %129 = vector.shape_cast %128 : vector<1x1xf32> to vector<1x1xf32>
      %130 = vector.broadcast %129 : vector<1x1xf32> to vector<8x128xf32>
      %131 = vector.broadcast %cst_52 : f32 to vector<8x128xf32>
      %132 = arith.select %111, %130, %131 : vector<8x128xi1>, vector<8x128xf32>
      %133 = arith.addf %109, %132 : vector<8x128xf32>
      %c0_53 = arith.constant 0 : index
      %c0_54 = arith.constant 0 : index
      %c0_55 = arith.constant 0 : index
      %c0_56 = arith.constant 0 : index
      %134 = vector.load %arg18[%c0_53, %c0_54, %c0_55, %c0_56] : memref<1x1x8x128xf32, #tpu.memory_space<vmem>>, vector<1x1x8x128xf32>
      %135 = vector.shape_cast %134 : vector<1x1x8x128xf32> to vector<8x128xf32>
      %136 = vector.shape_cast %133 : vector<8x128xf32> to vector<1x1x8x128xf32>
      tpu.vector_store %arg18[%c0_53, %c0_54, %c0_55, %c0_56], %136 {strides = array<i32>} : memref<1x1x8x128xf32, #tpu.memory_space<vmem>>, vector<1x1x8x128xf32>,
      %137 = arith.addf %11, %83 : vector<8x32xf32>
      %c0_57 = arith.constant 0 : index
      %c0_58 = arith.constant 0 : index
      %c0_59 = arith.constant 0 : index
      %138 = vector.load %arg17[%c0_57, %c0_58, %c0_59] : memref<1x8x32xf32, #tpu.memory_space<vmem>>, vector<1x8x32xf32>
      %139 = vector.shape_cast %138 : vector<1x8x32xf32> to vector<8x32xf32>
      %140 = vector.shape_cast %137 : vector<8x32xf32> to vector<1x8x32xf32>
      tpu.vector_store %arg17[%c0_57, %c0_58, %c0_59], %140 {strides = array<i32>} : memref<1x8x32xf32, #tpu.memory_space<vmem>>, vector<1x8x32xf32>,
    } else {
    }
    return
  }
  func.func @transform_0(%arg0: i32, %arg1: i32, %arg2: i32) -> (i32, i32, i32) {
    %c0_i32 = arith.constant 0 : i32
    %c0_i32_0 = arith.constant 0 : i32
    return %arg0, %arg1, %c0_i32 : i32, i32, i32
  }
  func.func @transform_1(%arg0: i32, %arg1: i32, %arg2: i32) -> (i32, i32, i32) {
    %0 = arith.minsi %arg2, %arg1 : i32
    %c0_i32 = arith.constant 0 : i32
    %c0_i32_0 = arith.constant 0 : i32
    return %arg0, %0, %c0_i32 : i32, i32, i32
  }
  func.func @transform_2(%arg0: i32, %arg1: i32, %arg2: i32) -> (i32, i32) {
    %c0_i32 = arith.constant 0 : i32
    %c0_i32_0 = arith.constant 0 : i32
    %c0_i32_1 = arith.constant 0 : i32
    return %c0_i32, %c0_i32_0 : i32, i32
  }
  func.func @transform_3(%arg0: i32, %arg1: i32, %arg2: i32) -> (i32, i32) {
    %c0_i32 = arith.constant 0 : i32
    %c0_i32_0 = arith.constant 0 : i32
    %c0_i32_1 = arith.constant 0 : i32
    return %c0_i32, %c0_i32_0 : i32, i32
  }
  func.func @transform_4(%arg0: i32, %arg1: i32, %arg2: i32) -> (i32, i32) {
    %c0_i32 = arith.constant 0 : i32
    %c0_i32_0 = arith.constant 0 : i32
    %c0_i32_1 = arith.constant 0 : i32
    return %c0_i32, %c0_i32_0 : i32, i32
  }
  func.func @transform_5(%arg0: i32, %arg1: i32, %arg2: i32) -> (i32, i32) {
    %c0_i32 = arith.constant 0 : i32
    %c0_i32_0 = arith.constant 0 : i32
    %c0_i32_1 = arith.constant 0 : i32
    return %c0_i32, %c0_i32_0 : i32, i32
  }
  func.func @transform_6(%arg0: i32, %arg1: i32, %arg2: i32) -> (i32, i32) {
    %c0_i32 = arith.constant 0 : i32
    %c0_i32_0 = arith.constant 0 : i32
    %c0_i32_1 = arith.constant 0 : i32
    return %c0_i32, %c0_i32_0 : i32, i32
  }
  func.func @transform_7(%arg0: i32, %arg1: i32, %arg2: i32) -> (i32, i32) {
    %c0_i32 = arith.constant 0 : i32
    %c0_i32_0 = arith.constant 0 : i32
    %c0_i32_1 = arith.constant 0 : i32
    return %c0_i32, %c0_i32_0 : i32, i32
  }
  func.func @transform_8(%arg0: i32, %arg1: i32, %arg2: i32) -> (i32, i32) {
    %c0_i32 = arith.constant 0 : i32
    %c0_i32_0 = arith.constant 0 : i32
    %c0_i32_1 = arith.constant 0 : i32
    return %c0_i32, %c0_i32_0 : i32, i32
  }
  func.func @transform_9(%arg0: i32, %arg1: i32, %arg2: i32) -> (i32, i32) {
    %c0_i32 = arith.constant 0 : i32
    %c0_i32_0 = arith.constant 0 : i32
    %c0_i32_1 = arith.constant 0 : i32
    return %c0_i32, %c0_i32_0 : i32, i32
  }
  func.func @transform_10(%arg0: i32, %arg1: i32, %arg2: i32) -> (i32, i32) {
    %c0_i32 = arith.constant 0 : i32
    %c0_i32_0 = arith.constant 0 : i32
    %c0_i32_1 = arith.constant 0 : i32
    return %c0_i32, %c0_i32_0 : i32, i32
  }
  func.func @transform_11(%arg0: i32, %arg1: i32, %arg2: i32) -> (i32, i32) {
    %c0_i32 = arith.constant 0 : i32
    %c0_i32_0 = arith.constant 0 : i32
    %c0_i32_1 = arith.constant 0 : i32
    return %c0_i32, %c0_i32_0 : i32, i32
  }
  func.func @transform_12(%arg0: i32, %arg1: i32, %arg2: i32) -> (i32, i32) {
    %c0_i32 = arith.constant 0 : i32
    %c0_i32_0 = arith.constant 0 : i32
    %c0_i32_1 = arith.constant 0 : i32
    return %c0_i32, %c0_i32_0 : i32, i32
  }
  func.func @transform_13(%arg0: i32, %arg1: i32, %arg2: i32) -> (i32, i32) {
    %c0_i32 = arith.constant 0 : i32
    %c0_i32_0 = arith.constant 0 : i32
    %c0_i32_1 = arith.constant 0 : i32
    return %c0_i32, %c0_i32_0 : i32, i32
  }
  func.func @transform_14(%arg0: i32, %arg1: i32, %arg2: i32) -> (i32, i32, i32) {
    %c0_i32 = arith.constant 0 : i32
    %c0_i32_0 = arith.constant 0 : i32
    return %arg0, %arg1, %c0_i32 : i32, i32, i32
  }
  func.func @transform_15(%arg0: i32, %arg1: i32, %arg2: i32) -> (i32, i32, i32, i32) {
    %c0_i32 = arith.constant 0 : i32
    %c0_i32_0 = arith.constant 0 : i32
    %c0_i32_1 = arith.constant 0 : i32
    return %arg0, %arg1, %c0_i32, %c0_i32_0 : i32, i32, i32, i32
  }
}

</mosaic_0001>

<bundles_post_ra>
// kernel: tpu_custom_call.1
= control target key start
LH: loop header
LB: loop body
LE: loop exit
PB: predicated region body
PF: predicated region fallthrough
CT: control target
= control target key end

     0   :  { %s3338_s0 = inlined_call_operand.vmem [shape: f32[2,8,32], index: 0, kind: input, shape index: {}]   ;;  %s3339_s1 = inlined_call_operand.vmem [shape: f32[2,8,32], index: 1, kind: input, shape index: {}]   ;;  %s3340_s2 = inlined_call_operand.vmem [shape: f32[1,32], index: 2, kind: input, shape index: {}]   ;;  %s3341_s3 = inlined_call_operand.vmem [shape: f32[1,32], index: 3, kind: input, shape index: {}]   ;;  %s3342_s4 = inlined_call_operand.vmem [shape: bf16[32,32], index: 4, kind: input, shape index: {}]   ;;  %s3343_s5 = inlined_call_operand.vmem [shape: bf16[32,32], index: 5, kind: input, shape index: {}]   ;;  %s3344_s6 = inlined_call_operand.vmem [shape: bf16[32,32], index: 6, kind: input, shape index: {}]   ;;  %s3345_s7 = inlined_call_operand.hbm [shape: bf16[32,32], index: 7, kind: input, shape index: {}]   ;;  %s3346_s8 = inlined_call_operand.vmem [shape: f32[1,32], index: 8, kind: input, shape index: {}]   ;;  %s3347_s9 = inlined_call_operand.vmem [shape: f32[1,32], index: 9, kind: input, shape index: {}]   ;;  %s3348_s10 = inlined_call_operand.vmem [shape: f32[1,32], index: 10, kind: input, shape index: {}]   ;;  %s3349_s11 = inlined_call_operand.hbm [shape: bf16[32,128], index: 11, kind: input, shape index: {}]   ;;  %s3350_s12 = inlined_call_operand.vmem [shape: f32[1,128], index: 12, kind: input, shape index: {}]   ;;  %s3351_s13 = inlined_call_operand.vmem [shape: bf16[128,32], index: 13, kind: input, shape index: {}]   ;;  %s3352_s14 = inlined_call_operand.hbm [shape: f32[2,8,32], index: 14, kind: output, shape index: {0}]   ;;  %s3353_s15 = inlined_call_operand.hbm [shape: f32[2,1,8,128], index: 15, kind: output, shape index: {1}]  }
   0x1   :  { %3363 = sst [smem:[#allocation25_spill]] %s3338_s0 }
   0x2   :  { %3364 = sst [smem:[#allocation26_spill]] %s3339_s1 }
   0x3   :  { %3365 = sst [smem:[#allocation27_spill]] %s3340_s2 }
   0x4   :  { %3366 = sst [smem:[#allocation28_spill]] %s3353_s15 }
   0x5   :  { %21 = vsyncpa [#allocation7], 0 }
   0x6   :  { %22 = vsyncpa [#allocation10], 0 }
   0x7   :  { %23 = vsyncpa [#allocation8], 0 }
   0x8   :  { %25 = vsyncpa [#allocation8 + $0x1], 0 }
   0x9   :  { %26 = vsyncpa [#allocation13], 0 }
   0xa   :  { %28 = vsyncpa [#allocation13 + $0x1], 0  ;;  %s2753_s18 = smov 0   ;;  %s2755_s19 = smov 0  }
   0xb   :  { %s2757_s20 = smov 0   ;;  %s2759_s21 = smov 0  }
   0xc   :  { %s2761_s22 = smov 0   ;;  %s2763_s23 = smov 0  }
   0xd LB: > { %3367 = sst [smem:[#allocation18_spill]] %s2634_s18  ;;  %s2184_s24 = sadd.s32 4294967295, %s2654_s23   ;;  %s2654_s23 = sphi %s2763_s23, %s34_s23   ;;  %s2650_s22 = sphi %s2761_s22, %s3389_s22   ;;  %s2646_s21 = sphi %s2759_s21, %s3388_s21   ;;  %s2642_s20 = sphi %s2757_s20, %s3387_s20   ;;  %s2638_s19 = sphi %s2755_s19, %s3391_s19   ;;  %s2634_s18 = sphi %s2753_s18, %s3390_s18  }
   0xe   : > { %3368 = sst [smem:[#allocation19_spill]] %s2642_s20  ;;  %s2185_s25 = sadd.s32 4294967294, %s2654_s23  }
   0xf   : > { %3369 = sst [smem:[#allocation20_spill]] %s2650_s22  ;;  %s53_s26 = sadd.s32 1, %s2650_s22 }
  0x10   : > { %3370 = sst [smem:[#allocation21_spill]] %s2654_s23  ;;  %s374_s27 = sadd.s32 1, %s2642_s20 }
  0x11   : > { %p55_p0 = scmp.ge.s32.totalorder %s53_s26, 2  ;;  %p384_p1 = scmp.ne.s32.totalorder %s2642_s20, %s2638_s19 }
  0x12   : > { %p385_p2 = scmp.eq.s32.totalorder %s2184_s24, 1  ;;  %p390_p3 = scmp.ne.s32.totalorder %s2638_s19, %s2634_s18 }
  0x13   : > { %s3393_s26 = smov (%p55_p0, %s53_s26), 0  ;;  %p391_p5 = scmp.eq.s32.totalorder %s2185_s25, 1 }
  0x14   : > { %3371 = sst [smem:[#allocation22_spill]] %s3393_s26  ;;  %p2793_p4 = por %p385_p2, %p384_p1 }
  0x15   : > { %s369_s29 = ssub.s32 %s2650_s22, %s3393_s26  ;;  %p2186_p6 = scmp.ge.s32.totalorder %s2654_s23, 1 }
  0x16   : > { %p372_p7 = scmp.eq.s32.totalorder %s369_s29, 0  ;;  %p2800_p8 = por %p391_p5, %p390_p3 }
  0x17   : > { %p426_p9 = scmp.lt.s32.totalorder %s2654_s23, 3  ;;  %p2812_p11 = scmp.eq.s32.totalorder %s2184_s24, 0 }
  0x18   : > { %s3373_s30 = scalar_select %p2800_p8, 1, 0 }
  0x19   : > { %s2806_s16 = scalar_select %p372_p7, %s2642_s20, %s374_s27  }
  0x1a   : > { %3374 = sst [smem:[#allocation23_spill]] %s3373_s30  ;;  %p2808_p10 = pnand %p2186_p6, %p426_p9 }
  0x1b   : > { %3375 = sst [smem:[#allocation24_spill]] %s2806_s16  ;;  %s452_s29 = sshll.u32 %s3345_s7, 4  ;;  %s453_s29 = int_to_ptr.hbm [resolvable:$true] %s452_s29 }
  0x1c   : > { %p2324_p12 = pneg %p2808_p10  ;;  %s2656_s22 = smov [#allocation6]  }
  0x1d   : > { %s454_s27 = sshll.u32 %s2656_s22, 4  ;;  %s475_s24 = sshll.u32 %s3349_s11, 4  ;;  %s455_s27 = int_to_ptr.vmem [resolvable:$true] %s454_s27  ;;  %s476_s24 = int_to_ptr.hbm [resolvable:$true] %s475_s24 }
  0x1e   : > { %p2325_p13 = pnand %p2812_p11, %p2324_p12  ;;  %s2657_s30 = smov 64  }
  0x1f   : > { %s2658_s23 = smov 4   ;;  %s2659_s15 = smov [#allocation9]  }
  0x20   : > { %2327 = dma.hbm_to_vmem [thread:$0]  (!%p2325_p13), %s453_s29, 256, %s455_s27, [#allocation7], %s2657_s30, %s2657_s30, %s2658_s23  }
  0x21   : > { %s477_s26 = sshll.u32 %s2659_s15, 4  ;;  %523 = sbr.rel (%p2808_p10) target bundleno = 2536 (0x9e8), region = 76  ;;  %s478_s26 = int_to_ptr.vmem [resolvable:$true] %s477_s26 }
  0x22   : > { %2330 = dma.hbm_to_vmem [thread:$0]  (!%p2325_p13), %s476_s24, 256, %s478_s26, [#allocation10], %s2657_s30, %s2657_s30, %s2658_s23  }
  0x26   : > { %2617 = dma.done.wait (%p2812_p11), [#allocation7], 256  }
  0x27   : > { %2619 = vsyncadd (%p2812_p11), [#allocation7], 4294967040 }
  0x28   : > { %2621 = dma.done.wait (%p2812_p11), [#allocation10], 256  }
  0x29   : > { %2623 = vsyncadd (%p2812_p11), [#allocation10], 4294967040  ;;  %p593_p0 = scmp.lt.s32.totalorder %s2646_s21, 1  ;;  %s3378_s1 = sld [smem:[#allocation26_spill]]  ;;  %vm621_vm0 = vcmask 261120   ;;  %v2660_v4 = vmov 32.0  }
  0x2a   : > { %s3379_s0 = sld [smem:[#allocation25_spill]]  ;;  %2434 = vrcp.f32 %v2660_v4  ;;  %v2291_v21 = vld [vmem:[%s3342_s4 + $0x8] sm:$0xff]  ;;  %v2290_v22 = vld [vmem:[%s3342_s4] sm:$0xff]  ;;  %s2661_s23 = smov 104   ;;  %vm748_vm8 = vcmask 1047556   ;;  %vm862_vm9 = vcmask 60416  }
  0x2b   : > { %s594_s15 = scalar_select %p593_p0, %s2646_s21, 1  ;;  %951 = vmatpush.bf16.msra.mxu2 %v2291_v21  ;;  %v2289_v23 = vld [vmem:[%s3343_s5 + $0x8] sm:$0xff]  ;;  %v2288_v25 = vld [vmem:[%s3343_s5] sm:$0xff]  ;;  %vm875_vm10 = vcmask 64512   ;;  %vm689_vm12 = vcmask 7168   ;;  %vm1460_vm13 = vcmask 1043456  }
  0x2c   : > { %729 = vmatpush.bf16.msra.mxu0 %v2289_v23  ;;  %v2293_v28 = vld [vmem:[%s3344_s6 + $0x8] sm:$0xff]  ;;  %v2292_v30 = vld [vmem:[%s3344_s6] sm:$0xff]  ;;  %s3380_s2 = sld [smem:[#allocation27_spill]]  ;;  %s2663_s16 = smov 112   ;;  %vm1712_vm14 = vcmask 130048   ;;  %vm1714_vm15 = vcmask 195584  }
  0x2d   : > { %s2195_s20 = sshll.u32 %s594_s15, 3  ;;  %v2427_v45 = vld [vmem:[%s3341_s3] ss:$0 sm:$0xff]  ;;  %s2669_s17 = smov 24  }
  0x2e   : > { %v2429_v55 = vld [vmem:[%s3341_s3] ss:$0 sm:$0xff]  ;;  %s2670_s18 = smov 16   ;;  %s2671_s29 = smov 8  }
  0x2f   : > { %s608_s30 = scalar_lea.vmem %s3378_s1, %s2195_s20  ;;  %952 = vmatpush.bf16.msra.mxu2 %v2290_v22  ;;  %s2284_s24 = sshll.u32 %s2646_s21, 3 }
  0x30   : > { %v884_v0 = vld [vmem:[%s608_s30] sm:$0xff]  ;;  %s2845_s25 = scalar_lea.vmem %s3379_s0, %s2195_s20  ;;  %v2435_v5 = vpop.eup %2434  ;;  %730 = vmatpush.bf16.msra.mxu0 %v2288_v25  ;;  %s2662_s30 = smov 120  }
  0x31   : > { %v888_v1 = vsel %vm621_vm0, %v884_v0, 0.0  ;;  %v618_v2 = vld [vmem:[%s2845_s25] sm:$0xff]  ;;  %v626_v6 = vmul.f32 32.0, %v2435_v5  ;;  %vm630_vm1 = vweird.f32 %v2435_v5  ;;  %s2019_s15 = scalar_lea.hbm %s3352_s14, %s2284_s24  ;;  %s2556_s0 = scalar_lea.hbm %s3352_s14, 16 }
  0x32   : > { %889 = vadd.xlane.f32.xlu0 %v888_v1  ;;  %v622_v3 = vsel %vm621_vm0, %v618_v2, 0.0  ;;  %v2426_v41 = vld [vmem:[%s3380_s2] ss:$0 sm:$0xff]  ;;  %s2023_s22 = sshll.u32 %s2019_s15, 4  ;;  %s2024_s22 = int_to_ptr.hbm [resolvable:$true] %s2023_s22 }
  0x33   : > { %v627_v7 = vsub.f32 1.0, %v626_v6  ;;  %980 = vmatpush.bf16.msrb.mxu2 %v2293_v28  ;;  %v2428_v52 = vld [vmem:[%s3380_s2] ss:$0 sm:$0xff] }
  0x35   : > { %v628_v8 = vmul.f32 %v2435_v5, %v627_v7  ;;  %v2664_v7 = vmov 1983009808  }
  0x37   : > { %v629_v9 = vadd.f32 %v2435_v5, %v628_v8  ;;  %981 = vmatpush.bf16.msrb.mxu2 %v2292_v30  ;;  %v753_v8 = vunpack.c.l.s4 %v2664_v7 }
  0x39   : > { %v2849_v10 = vsel %vm630_vm1, %v2435_v5, %v629_v9 }
  0x3a   : > { %623 = vadd.xlane.f32.xlu0 %v622_v3 }
  0xa5   : > { %v890_v11 = vpop.xlane.xlu0 %889 }
  0xa6   : > { %v898_v12 = vmul.f32 %v890_v11, %v2849_v10 }
  0xa8   : > { %v899_v13 = vsub.f32 %v884_v0, %v898_v12 }
  0xaa   : > { %v900_v14 = vmul.f32 %v899_v13, %v899_v13 }
  0xac   : > { %v901_v15 = vsel %vm621_vm0, %v900_v14, 0.0  ;;  %v2899_v14 = vunpack.c.0.s8 %v753_v8 }
  0xad   : > { %902 = vadd.xlane.f32.xlu1 %v901_v15  ;;  %v624_v16 = vpop.xlane.xlu0 %623 }
  0xae   : > { %v632_v17 = vmul.f32 %v2849_v10, %v624_v16 }
  0xb0   : > { %v633_v18 = vsub.f32 %v618_v2, %v632_v17 }
  0xb2   : > { %v634_v19 = vmul.f32 %v633_v18, %v633_v18 }
  0xb4   : > { %v635_v20 = vsel %vm621_vm0, %v634_v19, 0.0  ;;  %v2665_v19 = vmov 1934713408  }
  0xb5   : > { %636 = vadd.xlane.f32.xlu1 %v635_v20  ;;  %v777_v20 = vunpack.c.l.s4 %v2665_v19 }
 0x120   : > { %v903_v24 = vpop.xlane.xlu1 %902 }
 0x121   : > { %v904_v26 = vmul.f32 %v903_v24, %v2849_v10 }
 0x123   : > { %v905_v27 = vadd.f32 1e-05, %v904_v26 }
 0x125   : > { %2436 = vrsqrt.f32 %v905_v27  ;;  %vm912_vm3 = vweird.f32 %v905_v27 }
 0x128   : > { %v637_v29 = vpop.xlane.xlu1 %636 }
 0x129   : > { %v638_v31 = vmul.f32 %v637_v29, %v2849_v10 }
 0x12b   : > { %v2437_v32 = vpop.eup %2436  ;;  %v639_v33 = vadd.f32 1e-05, %v638_v31 }
 0x12c   : > { %v907_v34 = vmul.f32 %v2437_v32, %v905_v27  ;;  %vm913_vm2 = vweird.f32 %v2437_v32 }
 0x12d   : > { %2438 = vrsqrt.f32 %v639_v33  ;;  %vm914_vm4 = vmor %vm912_vm3, %vm913_vm2  ;;  %vm646_vm6 = vweird.f32 %v639_v33 }
 0x12e   : > { %v908_v35 = vmul.f32 %v2437_v32, %v907_v34 }
 0x130   : > { %v909_v36 = vmul.f32 0.5, %v908_v35 }
 0x132   : > { %v910_v37 = vsub.f32 1.5, %v909_v36 }
 0x133   : > { %v2439_v38 = vpop.eup %2438 }
 0x134   : > { %v911_v39 = vmul.f32 %v2437_v32, %v910_v37  ;;  %v641_v40 = vmul.f32 %v2439_v38, %v639_v33  ;;  %vm647_vm5 = vweird.f32 %v2439_v38 }
 0x135   : > { %vm648_vm7 = vmor %vm646_vm6, %vm647_vm5 }
 0x136   : > { %v915_v42 = vsel %vm914_vm4, %v2437_v32, %v911_v39  ;;  %v642_v43 = vmul.f32 %v2439_v38, %v641_v40  ;;  %v2909_v32 = vunpack.c.0.s8 %v777_v20 }
 0x137   : > { %v916_v44 = vmul.f32 %v915_v42, %v899_v13 }
 0x138   : > { %v643_v46 = vmul.f32 0.5, %v642_v43 }
 0x139   : > { %v920_v47 = vmul.f32 %v2426_v41, %v916_v44 }
 0x13a   : > { %v644_v48 = vsub.f32 1.5, %v643_v46 }
 0x13b   : > { %v924_v49 = vadd.f32 %v2427_v45, %v920_v47 }
 0x13c   : > { %v645_v50 = vmul.f32 %v2439_v38, %v644_v48 }
 0x13d   : > { %v925_v51 = vpack.c.bf16 %v924_v49, %v924_v49 }
 0x13e   : > { %v649_v53 = vsel %vm648_vm7, %v2439_v38, %v645_v50 }
 0x13f   : > { %v650_v54 = vmul.f32 %v649_v53, %v633_v18  ;;  %2214 = vmatmul.msk.bf16.vlgmr.msra.gmra.mxu2 %vm621_vm0, %v925_v51 }
 0x141   : > { %v654_v56 = vmul.f32 %v2428_v52, %v650_v54 }
 0x143   : > { %v2888_v57 = vadd.f32 %v2429_v55, %v654_v56 }
 0x145   : > { %v703_v58 = vpack.c.bf16 %v2888_v57, %v2888_v57 }
 0x147   : > { %2205 = vmatmul.msk.bf16.vlgmr.msra.gmra.mxu0 %vm621_vm0, %v703_v58 }
 0x14f   : > { %2223 = vmatmul.msk.bf16.vlgmr.msrb.gmra.mxu2 %vm621_vm0, %v925_v51 }
 0x1c2   : > { %v954_v59 = vpop.f32.mrf.mxu2 }
 0x1c3   : > { %v1000_v15 = vrot.slane %v954_v59, 4 }
 0x1c4   : > { %v732_v60 = vpop.f32.mrf.mxu0 }
 0x1c5   : > { %v736_v61 = vmul.f32 0.35355338, %v732_v60 }
 0x1c7   : > { %v2418_v62 = vpack.i.bf16 %v954_v59, %v736_v61  ;;  %v750_v12 = vrot.slane %v736_v61, 4 }
 0x1c9   : > { %2419 = vrot.lane.b32.xlu0 %v2418_v62, %s2661_s23  ;;  %2409 = vrot.lane.b32.xlu2 %v2418_v62, %s2662_s30 }
 0x1ca   : > { %v956_v63 = vpop.f32.mrf.mxu2 }
 0x1cc   : > { %v734_v0 = vpop.f32.mrf.mxu0 }
 0x1d1   : > { %2414 = vrot.lane.b32.xlu2 %v2418_v62, %s2663_s16 }
 0x1d2   : > { %v2895_v1 = vpop.f32.mrf.mxu2 }
 0x1d3   : > { %1113 = vrot.lane.b32.xlu0 %v2895_v1, %s2662_s30  ;;  %s2550_s30 = sshra.s32 %s2024_s22, 4  ;;  %s2551_s30 = int_to_ptr.hbm [resolvable:$true] %s2550_s30 }
 0x1d4   : > { %p2557_p5 = scmp.lt.s32.totalorder %s2551_s30, %s3352_s14 }
 0x1da   : > { %v985_v2 = vpop.f32.mrf.mxu2 }
 0x1db   : > { %1119 = vrot.lane.b32.xlu0 %v2895_v1, %s2661_s23 }
 0x223   : > { %v2410_v3 = vpop.permute.xlu2 %2409 }
 0x224   : > { %v2412_v13 = vunpack.i.h.bf16 %v2410_v3  ;;  %v2411_v16 = vunpack.i.l.bf16 %v2410_v3 }
 0x226   : > { %v1012_v23 = vrot.slane %v2412_v13, 4  ;;  %v762_v26 = vrot.slane %v2411_v16, 4 }
 0x22b   : > { %v2415_v4 = vpop.permute.xlu2 %2414 }
 0x22c   : > { %v2416_v5 = vunpack.i.l.bf16 %v2415_v4  ;;  %v2417_v6 = vunpack.i.h.bf16 %v2415_v4 }
 0x22e   : > { %v747_v9 = vrot.slane %v2416_v5, 4  ;;  %v997_v11 = vrot.slane %v2417_v6, 4  ;;  %v751_v17 = vsel %vm748_vm8, %v2416_v5, %v750_v12  ;;  %v1001_v22 = vsel %vm748_vm8, %v2417_v6, %v1000_v15 }
 0x22f   : > { %v759_v24 = vperm.slane %v751_v17, %v2899_v14  ;;  %v1009_v31 = vperm.slane %v1001_v22, %v2899_v14 }
 0x230   : > { %v749_v18 = vsel %vm748_vm8, %v747_v9, %v736_v61  ;;  %v999_v21 = vsel %vm748_vm8, %v997_v11, %v954_v59 }
 0x231   : > { %v755_v27 = vperm.slane %v749_v18, %v2899_v14  ;;  %v1005_v30 = vperm.slane %v999_v21, %v2899_v14  ;;  %v786_v37 = vrot.slane %v759_v24, 4  ;;  %v1036_v48 = vrot.slane %v1009_v31, 4 }
 0x233   : > { %v774_v40 = vrot.slane %v755_v27, 4  ;;  %v1024_v47 = vrot.slane %v1005_v30, 4 }
 0x23b   : > { %v2420_v25 = vpop.permute.xlu0 %2419 }
 0x23c   : > { %v2422_v28 = vunpack.i.h.bf16 %v2420_v25  ;;  %v2421_v29 = vunpack.i.l.bf16 %v2420_v25 }
 0x23e   : > { %v1010_v33 = vrot.slane %v2422_v28, 4  ;;  %v760_v34 = vrot.slane %v2421_v29, 4  ;;  %v763_v35 = vsel %vm748_vm8, %v2421_v29, %v762_v26  ;;  %v1013_v36 = vsel %vm748_vm8, %v2422_v28, %v1012_v23 }
 0x23f   : > { %v771_v38 = vperm.slane %v763_v35, %v2899_v14  ;;  %v1021_v39 = vperm.slane %v1013_v36, %v2899_v14 }
 0x240   : > { %v761_v41 = vsel %vm748_vm8, %v760_v34, %v2411_v16  ;;  %v1011_v42 = vsel %vm748_vm8, %v1010_v33, %v2412_v13 }
 0x241   : > { %v767_v43 = vperm.slane %v761_v41, %v2899_v14  ;;  %v784_v44 = vrot.slane %v771_v38, 4  ;;  %v787_v45 = vsel %vm748_vm8, %v771_v38, %v786_v37  ;;  %v1017_v46 = vperm.slane %v1011_v42, %v2899_v14 }
 0x242   : > { %v795_v49 = vperm.slane %v787_v45, %v2909_v32  ;;  %v1034_v50 = vrot.slane %v1021_v39, 4  ;;  %v1037_v63 = vsel %vm748_vm8, %v1021_v39, %v1036_v48 }
 0x243   : > { %v772_v51 = vrot.slane %v767_v43, 4  ;;  %v775_v52 = vsel %vm748_vm8, %v767_v43, %v774_v40  ;;  %v785_v53 = vsel %vm748_vm8, %v784_v44, %v759_v24  ;;  %v1022_v54 = vrot.slane %v1017_v46, 4 }
 0x244   : > { %v783_v55 = vperm.slane %v775_v52, %v2909_v32  ;;  %v791_v56 = vperm.slane %v785_v53, %v2909_v32  ;;  %v802_v58 = vrot.slane %v795_v49, 4  ;;  %v1025_v59 = vsel %vm748_vm8, %v1017_v46, %v1024_v47 }
 0x245   : > { %v773_v60 = vsel %vm748_vm8, %v772_v51, %v755_v27  ;;  %v1023_v61 = vsel %vm748_vm8, %v1022_v54, %v1005_v30  ;;  %v1035_v62 = vsel %vm748_vm8, %v1034_v50, %v1009_v31  ;;  %v1033_v7 = vperm.slane %v1025_v59, %v2909_v32 }
 0x246   : > { %v779_v0 = vperm.slane %v773_v60, %v2909_v32  ;;  %v798_v2 = vrot.slane %v783_v55, 4  ;;  %v800_v3 = vrot.slane %v791_v56, 4  ;;  %v803_v4 = vsel %vm748_vm8, 0.0, %v802_v58 }
 0x247   : > { %v815_v5 = vsel %vm748_vm8, %v802_v58, %v791_v56  ;;  %v820_v6 = vrot.slane %v803_v4, 4  ;;  %v1041_v8 = vperm.slane %v1035_v62, %v2909_v32  ;;  %v1045_v21 = vperm.slane %v1037_v63, %v2909_v32 }
 0x248   : > { %v796_v9 = vrot.slane %v779_v0, 4  ;;  %v799_v11 = vsel %vm748_vm8, 0.0, %v798_v2  ;;  %v801_v12 = vsel %vm748_vm8, 0.0, %v800_v3  ;;  %v804_v13 = vsel %vm748_vm8, %v798_v2, %v779_v0 }
 0x249   : > { %v808_v15 = vperm.slane %v804_v13, %v2899_v14  ;;  %v809_v16 = vrot.slane %v799_v11, 4  ;;  %v819_v17 = vperm.slane %v815_v5, %v2899_v14  ;;  %v821_v18 = vsel %vm748_vm8, %v820_v6, %v801_v12 }
 0x24a   : > { %v797_v19 = vsel %vm748_vm8, 0.0, %v796_v9  ;;  %v825_v20 = vperm.slane %v821_v18, %v2899_v14  ;;  %v1029_v27 = vperm.slane %v1023_v61, %v2909_v32  ;;  %v1052_v28 = vrot.slane %v1045_v21, 4 }
 0x24b   : > { %v810_v22 = vsel %vm748_vm8, %v809_v16, %v797_v19  ;;  %v828_v23 = vrot.slane %v808_v15, 4  ;;  %v840_v24 = vrot.slane %v819_v17, 4  ;;  %v1048_v30 = vrot.slane %v1033_v7, 4 }
 0x24c   : > { %v814_v25 = vperm.slane %v810_v22, %v2899_v14  ;;  %v838_v26 = vrot.slane %v825_v20, 4  ;;  %v1050_v31 = vrot.slane %v1041_v8, 4  ;;  %v1053_v39 = vsel %vm748_vm8, 0.0, %v1052_v28 }
 0x24d   : > { %v841_v29 = vsel %vm748_vm8, %v825_v20, %v840_v24  ;;  %v1046_v42 = vrot.slane %v1029_v27, 4  ;;  %v1049_v47 = vsel %vm748_vm8, 0.0, %v1048_v30  ;;  %v1070_v48 = vrot.slane %v1053_v39, 4 }
 0x24e   : > { %v826_v33 = vrot.slane %v814_v25, 4  ;;  %v829_v34 = vsel %vm748_vm8, %v814_v25, %v828_v23  ;;  %v839_v35 = vsel %vm748_vm8, %v838_v26, %v819_v17  ;;  %v849_v36 = vperm.slane %v841_v29, %v2909_v32 }
 0x24f   : > { %v837_v37 = vperm.slane %v829_v34, %v2909_v32  ;;  %v845_v38 = vperm.slane %v839_v35, %v2909_v32  ;;  %v1051_v49 = vsel %vm748_vm8, 0.0, %v1050_v31  ;;  %v1047_v56 = vsel %vm748_vm8, 0.0, %v1046_v42 }
 0x250   : > { %v827_v40 = vsel %vm748_vm8, %v826_v33, %v808_v15  ;;  %v854_v41 = vrot.slane %v849_v36, 4  ;;  %v1054_v59 = vsel %vm748_vm8, %v1048_v30, %v1029_v27  ;;  %v1059_v60 = vrot.slane %v1049_v47, 4 }
 0x251   : > { %v833_v43 = vperm.slane %v827_v40, %v2909_v32  ;;  %v850_v44 = vrot.slane %v845_v38, 4  ;;  %v856_v45 = vrot.slane %v837_v37, 4  ;;  %v1065_v61 = vsel %vm748_vm8, %v1052_v28, %v1041_v8 }
 0x252   : > { %v855_v46 = vsel %vm748_vm8, %v854_v41, %v837_v37  ;;  %v1058_v63 = vperm.slane %v1054_v59, %v2899_v14  ;;  %v1069_v0 = vperm.slane %v1065_v61, %v2899_v14  ;;  %v1071_v2 = vsel %vm748_vm8, %v1070_v48, %v1051_v49 }
 0x253   : > { %v851_v50 = vsel %vm748_vm8, %v850_v44, %v833_v43  ;;  %v852_v51 = vrot.slane %v833_v43, 4  ;;  %v857_v52 = vsel %vm748_vm8, %v849_v36, %v856_v45  ;;  %v860_v53 = vpack.c.bf16 %v855_v46, %v855_v46 }
 0x254   : > { %v858_v54 = vpack.c.bf16 %v851_v50, %v851_v50  ;;  %v861_v55 = vpack.c.bf16 %v857_v52, %v857_v52  ;;  %v1060_v3 = vsel %vm748_vm8, %v1059_v60, %v1047_v56  ;;  %v1075_v4 = vperm.slane %v1071_v2, %v2899_v14 }
 0x255   : > { %v853_v58 = vsel %vm748_vm8, %v845_v38, %v852_v51  ;;  %865 = vst.msk [vmem:[#allocation2 + $0x8] sm:$0xf] %vm862_vm9, %v860_v53  ;;  %v1064_v5 = vperm.slane %v1060_v3, %v2899_v14  ;;  %v1078_v6 = vrot.slane %v1058_v63, 4  ;;  %v1090_v7 = vrot.slane %v1069_v0, 4 }
 0x256   : > { %v859_v62 = vpack.c.bf16 %v853_v58, %v853_v58  ;;  %866 = vst.msk [vmem:[#allocation2 + $0xc] sm:$0xf] %vm862_vm9, %v861_v55  ;;  %v1088_v8 = vrot.slane %v1075_v4, 4  ;;  %v612_v41 = vlaneseq  ;;  %v2666_v59 = vmov -1e+30  }
 0x257   : > { %863 = vst.msk [vmem:[#allocation2] sm:$0xf] %vm862_vm9, %v858_v54  ;;  %v1079_v9 = vsel %vm748_vm8, %v1064_v5, %v1078_v6  ;;  %v1091_v11 = vsel %vm748_vm8, %v1075_v4, %v1090_v7  ;;  %v1076_v12 = vrot.slane %v1064_v5, 4 }
 0x258   : > { %864 = vst.msk [vmem:[#allocation2 + $0x4] sm:$0xf] %vm862_vm9, %v859_v62  ;;  %v1087_v13 = vperm.slane %v1079_v9, %v2909_v32  ;;  %v1099_v15 = vperm.slane %v1091_v11, %v2909_v32  ;;  %v1089_v16 = vsel %vm748_vm8, %v1088_v8, %v1069_v0  ;;  %v2995_v43 = vshrl.u32 %v612_v41, 7 }
 0x259   : > { %v1077_v17 = vsel %vm748_vm8, %v1076_v12, %v1058_v63  ;;  %v1095_v18 = vperm.slane %v1089_v16, %v2909_v32  ;;  %v1322_v44 = vand.u32 127, %v612_v41  ;;  %870 = vst.msk [vmem:[#allocation3 + $0x18] sm:$0xff] %vm689_vm12, %v2666_v59  ;;  %v2667_v62 = vmov 0  }
 0x25a   : > { %v1104_v19 = vrot.slane %v1099_v15, 4  ;;  %v1106_v20 = vrot.slane %v1087_v13, 4  ;;  %v1083_v21 = vperm.slane %v1077_v17, %v2909_v32  ;;  %867 = vst.msk [vmem:[#allocation3] sm:$0xff] %vm689_vm12, %v2666_v59  ;;  %2424 = vset.pattern.permute.xlu2 %v2667_v62  ;;  %2423 = vset.pattern.permute.xlu0 %v2667_v62  ;;  %v2668_v63 = vmov 0.0  }
 0x25b   : > { %v1100_v22 = vrot.slane %v1095_v18, 4  ;;  %vm1325_vm11 = vcmp.le.s32.totalorder %v1322_v44, %v2995_v43  ;;  %868 = vst.msk [vmem:[#allocation3 + $0x8] sm:$0xff] %vm689_vm12, %v2666_v59  ;;  %2425 = vset.pattern.permute.xlu1 %v2667_v62 }
 0x25c   : > { %v1105_v23 = vsel %vm748_vm8, %v1104_v19, %v1087_v13  ;;  %v1107_v24 = vsel %vm748_vm8, %v1099_v15, %v1106_v20  ;;  %v1102_v25 = vrot.slane %v1083_v21, 4  ;;  %v1238_v37 = vld [vmem:[#allocation2 + $0x8] sm:$0xf]  ;;  %869 = vst.msk [vmem:[#allocation3 + $0x10] sm:$0xff] %vm689_vm12, %v2666_v59  ;;  %v1114_v19 = vpop.permute.xlu0 %1113 }
 0x25d   : > { %v1110_v26 = vpack.c.bf16 %v1105_v23, %v1105_v23  ;;  %v1101_v27 = vsel %vm748_vm8, %v1100_v22, %v1083_v21  ;;  %v1111_v28 = vpack.c.bf16 %v1107_v24, %v1107_v24  ;;  %v1239_v38 = vld [vmem:[#allocation2 + $0xc] sm:$0xf]  ;;  %874 = vst.msk [vmem:[#allocation4 + $0x18] sm:$0xff] %vm689_vm12, %v2668_v63  ;;  %v1136_v21 = vrot.slane %v1114_v19, 4 }
 0x25e   : > { %v1108_v29 = vpack.c.bf16 %v1101_v27, %v1101_v27  ;;  %v1103_v30 = vsel %vm748_vm8, %v1095_v18, %v1102_v25  ;;  %v1236_v39 = vld [vmem:[#allocation2] sm:$0xf]  ;;  %871 = vst.msk [vmem:[#allocation4] sm:$0xff] %vm689_vm12, %v2668_v63 }
 0x25f   : > { %v1283_v31 = vsel %vm875_vm10, %v1110_v26, 0  ;;  %v1302_v33 = vsel %vm875_vm10, %v1111_v28, 0  ;;  %v1109_v34 = vpack.c.bf16 %v1103_v30, %v1103_v30  ;;  %v1237_v40 = vld [vmem:[#allocation2 + $0x4] sm:$0xf]  ;;  %872 = vst.msk [vmem:[#allocation4 + $0x8] sm:$0xff] %vm689_vm12, %v2668_v63  ;;  %v1124_v26 = vrot.slane %v2895_v1, 4 }
 0x260   : > { %1292 = vmatpush.bf16.xpose.msra.mxu1 %v1283_v31  ;;  %v1245_v35 = vsel %vm875_vm10, %v1108_v29, 0  ;;  %1311 = vmatpush.bf16.xpose.msra.mxu2 %v1302_v33  ;;  %873 = vst.msk [vmem:[#allocation4 + $0x10] sm:$0xff] %vm689_vm12, %v2668_v63  ;;  %v3036_v0 = vld [vmem:[#allocation3 + $0x18] sm:$0xff] }
 0x261   : > { %1254 = vmatpush.bf16.xpose.msra.mxu3 %v1245_v35  ;;  %v1264_v36 = vsel %vm875_vm10, %v1109_v34, 0  ;;  %876 = vst.msk [vmem:[#allocation5] sm:$0xff] %vm875_vm10, %v2668_v63  ;;  %v3038_v2 = vld [vmem:[#allocation3] sm:$0xff] }
 0x262   : > { %1273 = vmatpush.bf16.xpose.msrb.mxu0 %v1264_v36  ;;  %877 = vst.msk [vmem:[#allocation5 + $0x8] sm:$0xff] %vm875_vm10, %v2668_v63  ;;  %v3066_v15 = vld [vmem:[#allocation3 + $0x8] sm:$0xff] }
 0x263   : > { %878 = vst.msk [vmem:[#allocation5 + $0x10] sm:$0xff] %vm875_vm10, %v2668_v63  ;;  %v3056_v9 = vld [vmem:[#allocation3 + $0x10] sm:$0xff] }
 0x264   : > { %879 = vst.msk [vmem:[#allocation5 + $0x18] sm:$0xff] %vm875_vm10, %v2668_v63  ;;  %v1120_v20 = vpop.permute.xlu0 %1119 }
 0x265   : > { %v1134_v22 = vrot.slane %v1120_v20, 4  ;;  %v1137_v23 = vsel %vm748_vm8, %v1120_v20, %v1136_v21 }
 0x266   : > { %v1145_v25 = vperm.slane %v1137_v23, %v2899_v14 }
 0x267   : > { %2226 = vmatmul.msk.bf16.vlgmr.msra.gmra.mxu1 %vm875_vm10, %v1238_v37  ;;  %2227 = vmatmul.msk.bf16.vlgmr.msra.gmra.mxu2 %vm875_vm10, %v1239_v38  ;;  %v1135_v24 = vsel %vm748_vm8, %v1134_v22, %v1114_v19 }
 0x268   : > { %2224 = vmatmul.msk.bf16.vlgmr.msra.gmra.mxu3 %vm875_vm10, %v1236_v39  ;;  %v1141_v27 = vperm.slane %v1135_v24, %v2899_v14  ;;  %v1158_v31 = vrot.slane %v1145_v25, 4 }
 0x269   : > { %2225 = vmatmul.msk.bf16.vlgmr.msrb.gmra.mxu0 %vm875_vm10, %v1237_v40 }
 0x26a   : > { %v1146_v35 = vrot.slane %v1141_v27, 4 }
 0x2e4   : > { %v1294_v42 = vpop.f32.mrf.mxu1 }
 0x2e5   : > { %v3012_v54 = vsel %vm1325_vm11, %v1294_v42, -1e+30 }
 0x2e6   : > { %v1275_v45 = vpop.f32.mrf.mxu0  ;;  %v1342_v58 = vsel %vm875_vm10, %v3012_v54, -inf }
 0x2e7   : > { %v3020_v60 = vsel %vm1325_vm11, %v1275_v45, -1e+30 }
 0x2e8   : > { %v1339_v61 = vsel %vm875_vm10, %v3020_v60, -inf }
 0x2ea   : > { %v1313_v46 = vpop.f32.mrf.mxu2 }
 0x2eb   : > { %v1256_v47 = vpop.f32.mrf.mxu3  ;;  %v3000_v48 = vsel %vm1325_vm11, %v1313_v46, -1e+30 }
 0x2ec   : > { %v3004_v49 = vsel %vm1325_vm11, %v1256_v47, -1e+30  ;;  %v1296_v50 = vpop.f32.mrf.mxu1  ;;  %v1345_v51 = vsel %vm875_vm10, %v3000_v48, -inf }
 0x2ed   : > { %1346 = vmax.xlane.f32.xlu2 %v1345_v51  ;;  %v1336_v52 = vsel %vm875_vm10, %v3004_v49, -inf }
 0x2ee   : > { %1337 = vmax.xlane.f32.xlu1 %v1336_v52  ;;  %v1277_v53 = vpop.f32.mrf.mxu0 }
 0x2f2   : > { %v1315_v55 = vpop.f32.mrf.mxu2 }
 0x2f3   : > { %v1258_v56 = vpop.f32.mrf.mxu3 }
 0x2f6   : > { %1343 = vmax.xlane.f32.xlu1 %v1342_v58 }
 0x2fe   : > { %1340 = vmax.xlane.f32.xlu1 %v1339_v61 }
 0x317   : > { %1116 = vrot.lane.b32.xlu1 %v2895_v1, %s2663_s16  ;;  %s2552_s16 = scalar_lea.hbm %s2551_s30, 8 }
 0x318   : > { %p2553_p1 = scmp.ne.s32.totalorder %s2551_s30, %s2552_s16  ;;  %p2558_p6 = scmp.lt.s32.totalorder %s2556_s0, %s2552_s16 }
 0x31a   : > { %p2554_p2 = pnand %p2553_p1, %p2793_p4  ;;  %p2559_p7 = por %p2558_p6, %p2557_p5 }
 0x31c   : > { %p2555_p3 = pneg %p2554_p2 }
 0x31e   : > { %p2560_p9 = pnand %p2559_p7, %p2555_p3 }
 0x360   : > { %v1347_v3 = vpop.xlane.xlu2 %1346 }
 0x361   : > { %v3041_v4 = vmax.f32 %v3036_v0, %v1347_v3  ;;  %v1338_v5 = vpop.xlane.xlu1 %1337 }
 0x362   : > { %v3044_v6 = vmax.f32 %v3038_v2, %v1338_v5 }
 0x363   : > { %v1355_v7 = vsub.f32 %v3036_v0, %v3041_v4  ;;  %1545 = vst.msk [vmem:[#allocation3 + $0x18] sm:$0xff] %vm689_vm12, %v3041_v4  ;;  %1381 = vperm.xlu2 %2424, %v3041_v4   ;;  %v1398_v4 = vld [vmem:[#allocation4 + $0x10] sm:$0xff] }
 0x364   : > { %v1352_v8 = vsub.f32 %v3038_v2, %v3044_v6  ;;  %1542 = vst.msk [vmem:[#allocation3] sm:$0xff] %vm689_vm12, %v3044_v6  ;;  %1366 = vperm.xlu0 %2423, %v3044_v6  }
 0x369   : > { %v1344_v11 = vpop.xlane.xlu1 %1343 }
 0x36a   : > { %v3059_v12 = vmax.f32 %v3056_v9, %v1344_v11 }
 0x36c   : > { %v1354_v13 = vsub.f32 %v3056_v9, %v3059_v12  ;;  %1544 = vst.msk [vmem:[#allocation3 + $0x10] sm:$0xff] %vm689_vm12, %v3059_v12  ;;  %1376 = vperm.xlu1 %2425, %v3059_v12   ;;  %v1362_v9 = vmul.f32 1.442695, %v1355_v7 }
 0x371   : > { %v1341_v16 = vpop.xlane.xlu1 %1340 }
 0x372   : > { %v3069_v17 = vmax.f32 %v3066_v15, %v1341_v16 }
 0x374   : > { %v1353_v18 = vsub.f32 %v3066_v15, %v3069_v17  ;;  %1543 = vst.msk [vmem:[#allocation3 + $0x8] sm:$0xff] %vm689_vm12, %v3069_v17  ;;  %1371 = vperm.xlu0 %2423, %v3069_v17  }
 0x389   : > { %v1117_v28 = vpop.permute.xlu1 %1116 }
 0x38a   : > { %v1122_v29 = vrot.slane %v1117_v28, 4  ;;  %v1125_v30 = vsel %vm748_vm8, %v1117_v28, %v1124_v26 }
 0x38b   : > { %v1133_v33 = vperm.slane %v1125_v30, %v2899_v14 }
 0x38c   : > { %v1123_v34 = vsel %vm748_vm8, %v1122_v29, %v2895_v1 }
 0x38d   : > { %v1129_v36 = vperm.slane %v1123_v34, %v2899_v14  ;;  %v1159_v37 = vsel %vm748_vm8, %v1158_v31, %v1133_v33  ;;  %v1160_v38 = vrot.slane %v1133_v33, 4 }
 0x38e   : > { %v1165_v39 = vperm.slane %v1159_v37, %v2909_v32 }
 0x38f   : > { %v1147_v40 = vsel %vm748_vm8, %v1146_v35, %v1129_v36  ;;  %v1148_v41 = vrot.slane %v1129_v36, 4  ;;  %v1161_v42 = vsel %vm748_vm8, %v1145_v25, %v1160_v38 }
 0x390   : > { %v1153_v44 = vperm.slane %v1147_v40, %v2909_v32  ;;  %v1169_v45 = vperm.slane %v1161_v42, %v2909_v32  ;;  %v1174_v47 = vrot.slane %v1165_v39, 4 }
 0x391   : > { %v1149_v46 = vsel %vm748_vm8, %v1141_v27, %v1148_v41 }
 0x392   : > { %v1157_v1 = vperm.slane %v1149_v46, %v2909_v32  ;;  %v1176_v50 = vrot.slane %v1169_v45, 4  ;;  %v1170_v51 = vrot.slane %v1153_v44, 4  ;;  %v1175_v61 = vsel %vm748_vm8, 0.0, %v1174_v47 }
 0x394   : > { %v1172_v52 = vrot.slane %v1157_v1, 4  ;;  %v1177_v53 = vsel %vm748_vm8, 0.0, %v1176_v50  ;;  %v1189_v55 = vsel %vm748_vm8, %v1176_v50, %v1165_v39  ;;  %v1171_v16 = vsel %vm748_vm8, 0.0, %v1170_v51 }
 0x395   : > { %v1193_v56 = vperm.slane %v1189_v55, %v2899_v14  ;;  %v1194_v58 = vrot.slane %v1177_v53, 4 }
 0x396   : > { %v1173_v59 = vsel %vm748_vm8, 0.0, %v1172_v52  ;;  %v1178_v62 = vsel %vm748_vm8, %v1172_v52, %v1153_v44 }
 0x397   : > { %v1183_v63 = vrot.slane %v1173_v59, 4  ;;  %v1195_v3 = vsel %vm748_vm8, %v1194_v58, %v1175_v61  ;;  %v1182_v5 = vperm.slane %v1178_v62, %v2899_v14  ;;  %v1214_v11 = vrot.slane %v1193_v56, 4 }
 0x398   : > { %v1199_v19 = vperm.slane %v1195_v3, %v2899_v14  ;;  %v1356_v61 = vmul.f32 1.442695, %v1352_v8 }
 0x399   : > { %v1184_v20 = vsel %vm748_vm8, %v1183_v63, %v1171_v16  ;;  %v1202_v21 = vrot.slane %v1182_v5, 4 }
 0x39a   : > { %v1188_v22 = vperm.slane %v1184_v20, %v2899_v14  ;;  %v1215_v23 = vsel %vm748_vm8, %v1199_v19, %v1214_v11  ;;  %v1212_v24 = vrot.slane %v1199_v19, 4 }
 0x39b   : > { %v1223_v25 = vperm.slane %v1215_v23, %v2909_v32 }
 0x39c   : > { %v1203_v26 = vsel %vm748_vm8, %v1188_v22, %v1202_v21  ;;  %v1200_v27 = vrot.slane %v1188_v22, 4  ;;  %v1213_v28 = vsel %vm748_vm8, %v1212_v24, %v1193_v56 }
 0x39d   : > { %v1211_v29 = vperm.slane %v1203_v26, %v2909_v32  ;;  %v1228_v30 = vrot.slane %v1223_v25, 4  ;;  %v1219_v31 = vperm.slane %v1213_v28, %v2909_v32 }
 0x39e   : > { %v1201_v33 = vsel %vm748_vm8, %v1200_v27, %v1182_v5 }
 0x39f   : > { %v1229_v34 = vsel %vm748_vm8, %v1228_v30, %v1211_v29  ;;  %v1230_v35 = vrot.slane %v1211_v29, 4  ;;  %v1207_v36 = vperm.slane %v1201_v33, %v2909_v32  ;;  %v1224_v37 = vrot.slane %v1219_v31, 4  ;;  %v1396_v33 = vld [vmem:[#allocation4] sm:$0xff] }
 0x3a0   : > { %v1234_v38 = vpack.c.bf16 %v1229_v34, %v1229_v34 }
 0x3a1   : > { %v1225_v39 = vsel %vm748_vm8, %v1224_v37, %v1207_v36  ;;  %v1226_v40 = vrot.slane %v1207_v36, 4  ;;  %v1231_v41 = vsel %vm748_vm8, %v1223_v25, %v1230_v35 }
 0x3a2   : > { %v1500_v42 = vsel %vm1460_vm13, %v1234_v38, 0  ;;  %v1232_v44 = vpack.c.bf16 %v1225_v39, %v1225_v39  ;;  %v1235_v45 = vpack.c.bf16 %v1231_v41, %v1231_v41  ;;  %v1425_v41 = vld [vmem:[#allocation5] sm:$0xff] }
 0x3a3   : > { %1509 = vmatpush.bf16.msrb.mxu1 %v1500_v42  ;;  %v1227_v46 = vsel %vm748_vm8, %v1219_v31, %v1226_v40  ;;  %v1397_v40 = vld [vmem:[#allocation4 + $0x8] sm:$0xff] }
 0x3a4   : > { %v1462_v1 = vsel %vm1460_vm13, %v1232_v44, 0  ;;  %v1519_v47 = vsel %vm1460_vm13, %v1235_v45, 0  ;;  %v1233_v50 = vpack.c.bf16 %v1227_v46, %v1227_v46 }
 0x3a5   : > { %1471 = vmatpush.bf16.msrb.mxu3 %v1462_v1  ;;  %1528 = vmatpush.bf16.msrb.mxu2 %v1519_v47 }
 0x3a6   : > { %v1481_v51 = vsel %vm1460_vm13, %v1233_v50, 0 }
 0x3a7   : > { %1490 = vmatpush.bf16.msra.mxu0 %v1481_v51  ;;  %v1427_v51 = vld [vmem:[#allocation5 + $0x10] sm:$0xff] }
 0x3bd   : > { %v1382_v52 = vpop.permute.xlu2 %1381 }
 0x3be   : > { %v1387_v53 = vsub.f32 %v3000_v48, %v1382_v52 }
 0x3c0   : > { %v1394_v55 = vmul.f32 1.442695, %v1387_v53 }
 0x3c2   : > { %2440 = vpow2.f32 %v1394_v55 }
 0x3c3   : > { %2442 = vpow2.f32 %v1356_v61 }
 0x3c8   : > { %v2441_v56 = vpop.eup %2440 }
 0x3c9   : > { %v1456_v58 = vpack.c.bf16 %v2441_v56, %v2441_v56  ;;  %v1413_v59 = vsel %vm875_vm10, %v2441_v56, 0.0  ;;  %v2443_v11 = vpop.eup %2442 }
 0x3ca   : > { %1414 = vadd.xlane.f32.xlu2 %v1413_v59  ;;  %v1400_v34 = vmul.f32 %v2443_v11, %v1396_v33 }
 0x3cb   : > { %2231 = vmatmul.msk.bf16.vlgmr.msrb.gmra.mxu2 %vm875_vm10, %v1456_v58 }
 0x3d6   : > { %v1367_v62 = vpop.permute.xlu0 %1366 }
 0x3d7   : > { %v1384_v63 = vsub.f32 %v3004_v49, %v1367_v62 }
 0x3d9   : > { %v1388_v3 = vmul.f32 1.442695, %v1384_v63  ;;  %v1426_v63 = vld [vmem:[#allocation5 + $0x8] sm:$0xff] }
 0x3db   : > { %2444 = vpow2.f32 %v1388_v3 }
 0x3de   : > { %v1377_v48 = vpop.permute.xlu1 %1376 }
 0x3df   : > { %v1386_v5 = vsub.f32 %v3012_v54, %v1377_v48  ;;  %v1360_v54 = vmul.f32 1.442695, %v1354_v13  ;;  %v1399_v13 = vld [vmem:[#allocation4 + $0x18] sm:$0xff] }
 0x3e1   : > { %v2445_v16 = vpop.eup %2444  ;;  %v1392_v19 = vmul.f32 1.442695, %v1386_v5 }
 0x3e2   : > { %1431 = vperm.xlu2 %2424, %v2443_v11   ;;  %v1404_v20 = vsel %vm875_vm10, %v2445_v16, 0.0  ;;  %v1453_v21 = vpack.c.bf16 %v2445_v16, %v2445_v16 }
 0x3e3   : > { %2446 = vpow2.f32 %v1392_v19  ;;  %1405 = vadd.xlane.f32.xlu0 %v1404_v20 }
 0x3e4   : > { %2228 = vmatmul.msk.bf16.vlgmr.msrb.gmra.mxu3 %vm875_vm10, %v1453_v21 }
 0x3e6   : > { %v1372_v2 = vpop.permute.xlu0 %1371 }
 0x3e7   : > { %v1385_v49 = vsub.f32 %v3020_v60, %v1372_v2  ;;  %v1358_v60 = vmul.f32 1.442695, %v1353_v18  ;;  %v1428_v2 = vld [vmem:[#allocation5 + $0x18] sm:$0xff] }
 0x3e9   : > { %v2447_v6 = vpop.eup %2446  ;;  %v1390_v8 = vmul.f32 1.442695, %v1385_v49 }
 0x3ea   : > { %v1410_v22 = vsel %vm875_vm10, %v2447_v6, 0.0  ;;  %v1455_v23 = vpack.c.bf16 %v2447_v6, %v2447_v6 }
 0x3eb   : > { %2448 = vpow2.f32 %v1390_v8  ;;  %1411 = vadd.xlane.f32.xlu1 %v1410_v22 }
 0x3ec   : > { %2230 = vmatmul.msk.bf16.vlgmr.msrb.gmra.mxu1 %vm875_vm10, %v1455_v23  ;;  %2450 = vpow2.f32 %v1360_v54 }
 0x3ed   : > { %2452 = vpow2.f32 %v1358_v60 }
 0x3ee   : > { %2454 = vpow2.f32 %v1362_v9 }
 0x3f1   : > { %v2449_v24 = vpop.eup %2448 }
 0x3f2   : > { %v1454_v25 = vpack.c.bf16 %v2449_v24, %v2449_v24  ;;  %v1407_v26 = vsel %vm875_vm10, %v2449_v24, 0.0  ;;  %v2451_v27 = vpop.eup %2450 }
 0x3f3   : > { %1408 = vadd.xlane.f32.xlu1 %v1407_v26  ;;  %v2453_v28 = vpop.eup %2452  ;;  %v1402_v7 = vmul.f32 %v2451_v27, %v1398_v4 }
 0x3f4   : > { %2229 = vmatmul.msk.bf16.vlgmr.msra.gmra.mxu0 %vm875_vm10, %v1454_v25  ;;  %v2455_v12 = vpop.eup %2454  ;;  %v1401_v44 = vmul.f32 %v2453_v28, %v1397_v40 }
 0x3f5   : > { %v1403_v29 = vmul.f32 %v2455_v12, %v1399_v13 }
 0x3f7   : > { %1441 = vperm.xlu0 %2423, %v2451_v27  }
 0x3ff   : > { %1436 = vperm.xlu0 %2423, %v2453_v28  }
 0x40c   : > { %1446 = vperm.xlu1 %2425, %v2455_v12  }
 0x43d   : > { %v1415_v30 = vpop.xlane.xlu2 %1414 }
 0x43e   : > { %v1419_v31 = vadd.f32 %v1415_v30, %v1403_v29 }
 0x440   : > { %1424 = vst.msk [vmem:[#allocation4 + $0x18] sm:$0xff] %vm689_vm12, %v1419_v31 }
 0x445   : > { %v1432_v42 = vpop.permute.xlu2 %1431 }
 0x446   : > { %v1449_v45 = vmul.f32 %v1432_v42, %v1425_v41 }
 0x447   : > { %v1558_v15 = vld [vmem:[#allocation4 + $0x18] sm:$0xff] }
 0x448   : > { %2456 = vrcp.f32 %v1558_v15 }
 0x44e   : > { %v2457_v17 = vpop.eup %2456  ;;  %v1530_v18 = vpop.f32.mrf.mxu2 }
 0x44f   : > { %1580 = vperm.xlu1 %2425, %v2457_v17  }
 0x456   : > { %v1406_v35 = vpop.xlane.xlu0 %1405  ;;  %v1532_v36 = vpop.f32.mrf.mxu2 }
 0x457   : > { %v1416_v0 = vadd.f32 %v1406_v35, %v1400_v34 }
 0x459   : > { %1421 = vst.msk [vmem:[#allocation4] sm:$0xff] %vm689_vm12, %v1416_v0 }
 0x45e   : > { %v1412_v37 = vpop.xlane.xlu1 %1411 }
 0x45f   : > { %v1418_v38 = vadd.f32 %v1412_v37, %v1402_v7 }
 0x460   : > { %v1555_v39 = vld [vmem:[#allocation4] sm:$0xff] }
 0x461   : > { %1423 = vst.msk [vmem:[#allocation4 + $0x10] sm:$0xff] %vm689_vm12, %v1418_v38  ;;  %2458 = vrcp.f32 %v1555_v39 }
 0x466   : > { %v1409_v46 = vpop.xlane.xlu1 %1408 }
 0x467   : > { %v2459_v1 = vpop.eup %2458  ;;  %v1417_v47 = vadd.f32 %v1409_v46, %v1401_v44  ;;  %v1473_v50 = vpop.f32.mrf.mxu3 }
 0x468   : > { %v1534_v52 = vadd.f32 %v1473_v50, %v1449_v45  ;;  %1565 = vperm.xlu2 %2424, %v2459_v1   ;;  %v1557_v53 = vld [vmem:[#allocation4 + $0x10] sm:$0xff] }
 0x469   : > { %1422 = vst.msk [vmem:[#allocation4 + $0x8] sm:$0xff] %vm689_vm12, %v1417_v47  ;;  %v1442_v55 = vpop.permute.xlu0 %1441  ;;  %v1511_v56 = vpop.f32.mrf.mxu1  ;;  %2460 = vrcp.f32 %v1557_v53 }
 0x46a   : > { %1538 = vst.msk [vmem:[#allocation5] sm:$0xff] %vm875_vm10, %v1534_v52  ;;  %v1451_v58 = vmul.f32 %v1442_v55, %v1427_v51 }
 0x46c   : > { %v1536_v59 = vadd.f32 %v1511_v56, %v1451_v58 }
 0x46e   : > { %1540 = vst.msk [vmem:[#allocation5 + $0x10] sm:$0xff] %vm875_vm10, %v1536_v59 }
 0x46f   : > { %v2461_v61 = vpop.eup %2460  ;;  %v1475_v62 = vpop.f32.mrf.mxu3 }
 0x470   : > { %1575 = vperm.xlu0 %2423, %v2461_v61   ;;  %v1556_v3 = vld [vmem:[#allocation4 + $0x8] sm:$0xff] }
 0x471   : > { %v1437_v48 = vpop.permute.xlu0 %1436  ;;  %v1492_v5 = vpop.f32.mrf.mxu0  ;;  %2462 = vrcp.f32 %v1556_v3  ;;  %v1551_v23 = vld [vmem:[#allocation5] sm:$0xff] }
 0x472   : > { %v1450_v11 = vmul.f32 %v1437_v48, %v1426_v63  ;;  %v1513_v16 = vpop.f32.mrf.mxu1 }
 0x474   : > { %v1535_v19 = vadd.f32 %v1492_v5, %v1450_v11 }
 0x475   : > { %v1553_v54 = vld [vmem:[#allocation5 + $0x10] sm:$0xff] }
 0x476   : > { %1539 = vst.msk [vmem:[#allocation5 + $0x8] sm:$0xff] %vm875_vm10, %v1535_v19 }
 0x477   : > { %v2463_v20 = vpop.eup %2462 }
 0x478   : > { %1570 = vperm.xlu0 %2423, %v2463_v20  }
 0x479   : > { %v1494_v21 = vpop.f32.mrf.mxu0 }
 0x47d   : > { %v1552_v15 = vld [vmem:[#allocation5 + $0x8] sm:$0xff] }
 0x47e   : > { %v1447_v49 = vpop.permute.xlu1 %1446 }
 0x47f   : > { %v1452_v6 = vmul.f32 %v1447_v49, %v1428_v2 }
 0x481   : > { %v1537_v8 = vadd.f32 %v1530_v18, %v1452_v6 }
 0x483   : > { %1541 = vst.msk [vmem:[#allocation5 + $0x18] sm:$0xff] %vm875_vm10, %v1537_v8 }
 0x48a   : > { %v1554_v28 = vld [vmem:[#allocation5 + $0x18] sm:$0xff] }
 0x4c1   : > { %v1581_v60 = vpop.permute.xlu1 %1580 }
 0x4c2   : > { %v1566_v22 = vpop.permute.xlu2 %1565  ;;  %v1586_v12 = vmul.f32 %v1581_v60, %v1554_v28 }
 0x4c3   : > { %v1583_v25 = vmul.f32 %v1566_v22, %v1551_v23 }
 0x4c4   : > { %v1600_v17 = vrot.slane %v1586_v12, 4 }
 0x4c5   : > { %v1590_v9 = vrot.slane %v1583_v25, 4 }
 0x4e2   : > { %v1576_v24 = vpop.permute.xlu0 %1575 }
 0x4e3   : > { %v1585_v26 = vmul.f32 %v1576_v24, %v1553_v54 }
 0x4e5   : > { %v1587_v27 = vrot.slane %v1585_v26, 4  ;;  %v1591_v29 = vsel %vm748_vm8, %v1585_v26, %v1590_v9 }
 0x4e6   : > { %v1599_v33 = vperm.slane %v1591_v29, %v2899_v14 }
 0x4e7   : > { %v1589_v13 = vsel %vm748_vm8, %v1587_v27, %v1583_v25 }
 0x4e8   : > { %v1595_v30 = vperm.slane %v1589_v13, %v2899_v14  ;;  %v1626_v7 = vrot.slane %v1599_v33, 4 }
 0x4ea   : > { %v1571_v31 = vpop.permute.xlu0 %1570  ;;  %v1614_v36 = vrot.slane %v1595_v30, 4 }
 0x4eb   : > { %v1584_v18 = vmul.f32 %v1571_v31, %v1552_v15  ;;  %v660_v31 = vsel %vm621_vm0, %v2888_v57, 0.0  ;;  %v2295_v15 = vld [vmem:[#allocation6 + $0x8] sm:$0xff] }
 0x4ec   : > { %1747 = vmatpush.bf16.msra.mxu3 %v2295_v15 }
 0x4ed   : > { %v1601_v34 = vsel %vm748_vm8, %v1600_v17, %v1584_v18  ;;  %v1602_v35 = vrot.slane %v1584_v18, 4 }
 0x4ee   : > { %v1607_v0 = vperm.slane %v1601_v34, %v2899_v14 }
 0x4ef   : > { %v1603_v4 = vsel %vm748_vm8, %v1586_v12, %v1602_v35 }
 0x4f0   : > { %v1611_v37 = vperm.slane %v1603_v4, %v2899_v14  ;;  %v1612_v38 = vrot.slane %v1607_v0, 4  ;;  %v1615_v39 = vsel %vm748_vm8, %v1607_v0, %v1614_v36  ;;  %v2430_v4 = vld [vmem:[%s3346_s8] ss:$0 sm:$0xff] }
 0x4f1   : > { %v1623_v40 = vperm.slane %v1615_v39, %v2909_v32 }
 0x4f2   : > { %v1613_v41 = vsel %vm748_vm8, %v1612_v38, %v1595_v30  ;;  %v1624_v42 = vrot.slane %v1611_v37, 4  ;;  %v1627_v44 = vsel %vm748_vm8, %v1611_v37, %v1626_v7  ;;  %v3202_v37 = vld [vmem:[%s2845_s25] sm:$0xff] }
 0x4f3   : > { %v1619_v45 = vperm.slane %v1613_v41, %v2909_v32  ;;  %v1635_v46 = vperm.slane %v1627_v44, %v2909_v32  ;;  %v1638_v1 = vrot.slane %v1623_v40, 4 }
 0x4f4   : > { %v1625_v47 = vsel %vm748_vm8, %v1624_v42, %v1599_v33 }
 0x4f5   : > { %v1631_v50 = vperm.slane %v1625_v47, %v2909_v32  ;;  %v1636_v51 = vrot.slane %v1619_v45, 4  ;;  %v1639_v52 = vsel %vm748_vm8, 0.0, %v1638_v1  ;;  %v1642_v53 = vrot.slane %v1635_v46, 4 }
 0x4f6   : > { %v1644_v55 = vsel %vm748_vm8, %v1638_v1, %v1619_v45  ;;  %v1649_v56 = vrot.slane %v1639_v52, 4 }
 0x4f7   : > { %v1643_v58 = vsel %vm748_vm8, 0.0, %v1642_v53  ;;  %v1637_v59 = vsel %vm748_vm8, 0.0, %v1636_v51  ;;  %v1640_v61 = vrot.slane %v1631_v50, 4  ;;  %v1648_v62 = vperm.slane %v1644_v55, %v2899_v14 }
 0x4f8   : > { %v1660_v63 = vrot.slane %v1643_v58, 4  ;;  %v1650_v3 = vsel %vm748_vm8, %v1649_v56, %v1637_v59  ;;  %v1655_v48 = vsel %vm748_vm8, %v1642_v53, %v1631_v50  ;;  %v2672_v50 = vmov 31.0  }
 0x4f9   : > { %v1641_v5 = vsel %vm748_vm8, 0.0, %v1640_v61  ;;  %v1654_v11 = vperm.slane %v1650_v3, %v2899_v14  ;;  %v1659_v16 = vperm.slane %v1655_v48, %v2899_v14  ;;  %v1668_v19 = vrot.slane %v1648_v62, 4 }
 0x4fa   : > { %v1661_v20 = vsel %vm748_vm8, %v1660_v63, %v1641_v5  ;;  %2464 = vrcp.f32 %v2672_v50 }
 0x4fb   : > { %v1665_v21 = vperm.slane %v1661_v20, %v2899_v14  ;;  %v1669_v2 = vsel %vm748_vm8, %v1654_v11, %v1668_v19  ;;  %v1680_v49 = vrot.slane %v1659_v16, 4  ;;  %v1666_v6 = vrot.slane %v1654_v11, 4 }
 0x4fc   : > { %v1677_v8 = vperm.slane %v1669_v2, %v2909_v32 }
 0x4fd   : > { %v1681_v22 = vsel %vm748_vm8, %v1665_v21, %v1680_v49  ;;  %v1667_v23 = vsel %vm748_vm8, %v1666_v6, %v1648_v62  ;;  %v1678_v54 = vrot.slane %v1665_v21, 4 }
 0x4fe   : > { %v1689_v24 = vperm.slane %v1681_v22, %v2909_v32  ;;  %v1696_v25 = vrot.slane %v1677_v8, 4  ;;  %v1673_v26 = vperm.slane %v1667_v23, %v2909_v32 }
 0x4ff   : > { %v1679_v60 = vsel %vm748_vm8, %v1678_v54, %v1659_v16 }
 0x500   : > { %v1697_v14 = vsel %vm748_vm8, %v1689_v24, %v1696_v25  ;;  %v1694_v27 = vrot.slane %v1689_v24, 4  ;;  %v1685_v28 = vperm.slane %v1679_v60, %v2909_v32  ;;  %v1692_v9 = vrot.slane %v1673_v26, 4  ;;  %v2294_v32 = vld [vmem:[#allocation6] sm:$0xff]  ;;  %v2465_v51 = vpop.eup %2464  ;;  %v2297_v60 = vld [vmem:[#allocation9 + $0x8] sm:$0xff] }
 0x501   : > { %1707 = vrot.lane.b32.xlu0 %v1697_v14, %s2669_s17  ;;  %1748 = vmatpush.bf16.msra.mxu3 %v2294_v32  ;;  %v670_v52 = vmul.f32 31.0, %v2465_v51  ;;  %vm674_vm1 = vweird.f32 %v2465_v51  ;;  %v2296_v14 = vld [vmem:[#allocation9] sm:$0xff] }
 0x502   : > { %v1695_v12 = vsel %vm748_vm8, %v1694_v27, %v1677_v8  ;;  %v1690_v13 = vrot.slane %v1685_v28, 4  ;;  %v1693_v29 = vsel %vm748_vm8, %v1685_v28, %v1692_v9  ;;  %1824 = vmatpush.bf16.msrb.mxu0 %v2297_v60 }
 0x503   : > { %1703 = vrot.lane.b32.xlu1 %v1695_v12, %s2670_s18  ;;  %1699 = vrot.lane.b32.xlu2 %v1693_v29, %s2671_s29  ;;  %v671_v56 = vsub.f32 1.0, %v670_v52  ;;  %s3261_s18 = sand.u32 1, %s2638_s19  }
 0x504   : > { %v1691_v30 = vsel %vm748_vm8, %v1690_v13, %v1673_v26  ;;  %s3362_s29 = sshll.u32 %s3261_s18, 3  ;;  %s2003_s23 = scalar_lea.sflag [#allocation8], %s3261_s18 }
 0x505   : > { %v672_v61 = vmul.f32 %v2465_v51, %v671_v56  ;;  %s3269_s27 = scalar_lea.vmem [#allocation11], %s3362_s29 }
 0x506   : > { %1825 = vmatpush.bf16.msrb.mxu0 %v2296_v14  ;;  %s2021_s20 = sshll.u32 %s3269_s27, 4  ;;  %s2022_s20 = int_to_ptr.vmem [resolvable:$true] %s2021_s20 }
 0x507   : > { %v673_v3 = vadd.f32 %v2465_v51, %v672_v61  ;;  %v2305_v61 = vld [vmem:[%s3351_s13 + $0x38] sm:$0xff] }
 0x508   : > { %1905 = vmatpush.bf16.msra.mxu1 %v2305_v61 }
 0x509   : > { %v3218_v11 = vsel %vm674_vm1, %v2465_v51, %v673_v3  ;;  %v2301_v3 = vld [vmem:[%s3351_s13 + $0x18] sm:$0xff] }
 0x52b   : > { %661 = vadd.xlane.f32.xlu0 %v660_v31 }
 0x55d   : > { %v1700_v17 = vpop.permute.xlu2 %1699 }
 0x55e   : > { %v1711_v18 = vsel %vm875_vm10, %v1691_v30, %v1700_v17 }
 0x573   : > { %v1708_v34 = vpop.permute.xlu0 %1707 }
 0x575   : > { %v1704_v33 = vpop.permute.xlu1 %1703 }
 0x576   : > { %v1713_v35 = vsel %vm1712_vm14, %v1711_v18, %v1704_v33 }
 0x577   : > { %v1715_v36 = vsel %vm1714_vm15, %v1713_v35, %v1708_v34  ;;  %v2431_v35 = vld [vmem:[%s3347_s9] ss:$0 sm:$0xff] }
 0x578   : > { %v1716_v0 = vpack.c.bf16 %v1715_v36, %v1715_v36 }
 0x57a   : > { %2240 = vmatmul.msk.bf16.vlgmr.msra.gmra.mxu3 %vm621_vm0, %v1716_v0 }
 0x59e   : > { %v662_v41 = vpop.xlane.xlu0 %661 }
 0x59f   : > { %v663_v44 = vmul.f32 %v662_v41, %v2849_v10 }
 0x5a1   : > { %v664_v45 = vsub.f32 %v2888_v57, %v663_v44 }
 0x5a3   : > { %v665_v1 = vmul.f32 %v664_v45, %v664_v45 }
 0x5a5   : > { %v666_v47 = vsel %vm621_vm0, %v665_v1, 0.0 }
 0x5fd   : > { %v1750_v7 = vpop.f32.mrf.mxu3 }
 0x5fe   : > { %v3204_v38 = vadd.f32 %v2430_v4, %v1750_v7  ;;  %v2432_v7 = vld [vmem:[%s3348_s10] ss:$0 sm:$0xff] }
 0x600   : > { %v1754_v39 = vadd.f32 %v3204_v38, %v3202_v37  ;;  %v1920_v46 = vsel %vm621_vm0, %v3204_v38, 0.0 }
 0x602   : > { %v1757_v40 = vsel %vm621_vm0, %v1754_v39, 0.0 }
 0x603   : > { %1758 = vadd.xlane.f32.xlu2 %v1757_v40 }
 0x605   : > { %v1752_v42 = vpop.f32.mrf.mxu3 }
 0x60b   : > { %1921 = vadd.xlane.f32.xlu2 %v1920_v46 }
 0x613   : > { %667 = vadd.xlane.f32.xlu2 %v666_v47 }
 0x676   : > { %v1759_v53 = vpop.xlane.xlu2 %1758 }
 0x677   : > { %v1767_v55 = vmul.f32 %v1759_v53, %v2849_v10 }
 0x679   : > { %v1768_v58 = vsub.f32 %v1754_v39, %v1767_v55 }
 0x67b   : > { %v1769_v59 = vmul.f32 %v1768_v58, %v1768_v58 }
 0x67d   : > { %v1770_v57 = vsel %vm621_vm0, %v1769_v59, 0.0 }
 0x67e   : > { %1771 = vadd.xlane.f32.xlu1 %v1770_v57  ;;  %v1922_v62 = vpop.xlane.xlu2 %1921  ;;  %v2304_v57 = vld [vmem:[%s3351_s13 + $0x30] sm:$0xff] }
 0x67f   : > { %v1923_v63 = vmul.f32 %v1922_v62, %v2849_v10  ;;  %1906 = vmatpush.bf16.msra.mxu1 %v2304_v57  ;;  %v2303_v62 = vld [vmem:[%s3351_s13 + $0x28] sm:$0xff] }
 0x681   : > { %v1924_v48 = vsub.f32 %v3204_v38, %v1923_v63  ;;  %v2302_v63 = vld [vmem:[%s3351_s13 + $0x20] sm:$0xff] }
 0x683   : > { %v1925_v5 = vmul.f32 %v1924_v48, %v1924_v48  ;;  %1907 = vmatpush.bf16.msra.mxu1 %v2303_v62  ;;  %v2300_v48 = vld [vmem:[%s3351_s13 + $0x10] sm:$0xff] }
 0x685   : > { %v1926_v16 = vsel %vm621_vm0, %v1925_v5, 0.0  ;;  %v2299_v5 = vld [vmem:[%s3351_s13 + $0x8] sm:$0xff] }
 0x686   : > { %1927 = vadd.xlane.f32.xlu0 %v1926_v16  ;;  %v668_v19 = vpop.xlane.xlu2 %667  ;;  %v2298_v16 = vld [vmem:[%s3351_s13] sm:$0xff] }
 0x687   : > { %v676_v20 = vmul.f32 %v3218_v11, %v668_v19  ;;  %1908 = vmatpush.bf16.msra.mxu1 %v2302_v63 }
 0x689   : > { %2466 = vrsqrt.f32 %v676_v20  ;;  %vm684_vm2 = vcmp.eq.f32.partialorder %v676_v20, inf  ;;  %v687_v54 = vand.u32 2147483648, %v676_v20  ;;  %vm686_vm3 = vcmp.eq.f32.partialorder %v676_v20, 0.0 }
 0x68b   : > { %1909 = vmatpush.bf16.msra.mxu1 %v2301_v3 }
 0x68f   : > { %v2467_v21 = vpop.eup %2466  ;;  %1910 = vmatpush.bf16.msra.mxu1 %v2300_v48 }
 0x690   : > { %v678_v2 = vmul.f32 %v2467_v21, %v676_v20 }
 0x692   : > { %v679_v49 = vmul.f32 %v2467_v21, %v678_v2 }
 0x693   : > { %1911 = vmatpush.bf16.msra.mxu1 %v2299_v5 }
 0x694   : > { %v680_v6 = vmul.f32 0.5, %v679_v49  ;;  %v2433_v49 = vld [vmem:[%s3350_s12] ss:$0 sm:$0xff] }
 0x696   : > { %v681_v8 = vsub.f32 1.5, %v680_v6 }
 0x697   : > { %1912 = vmatpush.bf16.msra.mxu1 %v2298_v16 }
 0x698   : > { %v682_v22 = vmul.f32 %v2467_v21, %v681_v8 }
 0x69a   : > { %v683_v23 = vmul.f32 %v682_v22, %v676_v20 }
 0x69c   : > { %v685_v24 = vsel %vm684_vm2, %v676_v20, %v683_v23 }
 0x69d   : > { %v688_v25 = vsel %vm686_vm3, %v687_v54, %v685_v24 }
 0x69e   : > { %v690_v26 = vsel %vm689_vm12, %v688_v25, 0.0 }
 0x69f   : > { %691 = vadd.xlane.f32.xlu2 %v690_v26 }
 0x6f1   : > { %v1772_v27 = vpop.xlane.xlu1 %1771 }
 0x6f2   : > { %v1773_v28 = vmul.f32 %v1772_v27, %v2849_v10 }
 0x6f4   : > { %v1774_v9 = vadd.f32 1e-05, %v1773_v28 }
 0x6f6   : > { %2468 = vrsqrt.f32 %v1774_v9  ;;  %vm1781_vm5 = vweird.f32 %v1774_v9 }
 0x6f9   : > { %v1928_v12 = vpop.xlane.xlu0 %1927 }
 0x6fa   : > { %v1936_v13 = vmul.f32 %v1928_v12, %v3218_v11 }
 0x6fc   : > { %v2469_v29 = vpop.eup %2468  ;;  %2470 = vrsqrt.f32 %v1936_v13  ;;  %vm1944_vm7 = vcmp.eq.f32.partialorder %v1936_v13, inf  ;;  %v1947_v46 = vand.u32 2147483648, %v1936_v13  ;;  %vm1946_vm8 = vcmp.eq.f32.partialorder %v1936_v13, 0.0 }
 0x6fd   : > { %v1776_v30 = vmul.f32 %v2469_v29, %v1774_v9  ;;  %vm1782_vm4 = vweird.f32 %v2469_v29 }
 0x6fe   : > { %vm1783_vm6 = vmor %vm1781_vm5, %vm1782_vm4 }
 0x6ff   : > { %v1777_v31 = vmul.f32 %v2469_v29, %v1776_v30 }
 0x701   : > { %v1778_v15 = vmul.f32 0.5, %v1777_v31 }
 0x702   : > { %v2471_v32 = vpop.eup %2470 }
 0x703   : > { %v1779_v17 = vsub.f32 1.5, %v1778_v15  ;;  %v1938_v18 = vmul.f32 %v2471_v32, %v1936_v13 }
 0x705   : > { %v1780_v33 = vmul.f32 %v2469_v29, %v1779_v17  ;;  %v1939_v34 = vmul.f32 %v2471_v32, %v1938_v18 }
 0x707   : > { %v1784_v36 = vsel %vm1783_vm6, %v2469_v29, %v1780_v33  ;;  %v1940_v0 = vmul.f32 0.5, %v1939_v34 }
 0x708   : > { %v1785_v4 = vmul.f32 %v1784_v36, %v1768_v58 }
 0x709   : > { %v1941_v39 = vsub.f32 1.5, %v1940_v0 }
 0x70a   : > { %v1789_v40 = vmul.f32 %v2431_v35, %v1785_v4 }
 0x70b   : > { %v1942_v41 = vmul.f32 %v2471_v32, %v1941_v39 }
 0x70c   : > { %v1793_v42 = vadd.f32 %v2432_v7, %v1789_v40 }
 0x70d   : > { %v1943_v44 = vmul.f32 %v1942_v41, %v1936_v13 }
 0x70e   : > { %v1794_v45 = vpack.c.bf16 %v1793_v42, %v1793_v42 }
 0x70f   : > { %v1945_v1 = vsel %vm1944_vm7, %v1936_v13, %v1943_v44 }
 0x710   : > { %2249 = vmatmul.msk.bf16.vlgmr.msrb.gmra.mxu0 %vm621_vm0, %v1794_v45  ;;  %v1948_v47 = vsel %vm1946_vm8, %v1947_v46, %v1945_v1 }
 0x711   : > { %v1950_v50 = vsel %vm689_vm12, %v1948_v47, 0.0 }
 0x712   : > { %v692_v51 = vpop.xlane.xlu2 %691  ;;  %1951 = vadd.xlane.f32.xlu0 %v1950_v50 }
 0x713   : > { %v693_v52 = vrot.slane %v692_v51, 4 }
 0x715   : > { %v694_v53 = vadd.f32 %v693_v52, %v692_v51 }
 0x717   : > { %v695_v55 = vrot.slane %v694_v53, 2 }
 0x719   : > { %v696_v56 = vadd.f32 %v695_v55, %v694_v53 }
 0x71b   : > { %v697_v58 = vrot.slane %v696_v56, 1 }
 0x71d   : > { %v698_v59 = vadd.f32 %v697_v58, %v696_v56 }
 0x71f   : > { %2306 = vpush %v698_v59 }
 0x785   : > { %v1952_v19 = vpop.xlane.xlu0 %1951 }
 0x786   : > { %v1953_v20 = vrot.slane %v1952_v19, 4 }
 0x788   : > { %v1954_v21 = vadd.f32 %v1953_v20, %v1952_v19 }
 0x78a   : > { %v1955_v2 = vrot.slane %v1954_v21, 2 }
 0x78c   : > { %v1956_v6 = vadd.f32 %v1955_v2, %v1954_v21 }
 0x78d   : > { %v1827_v8 = vpop.f32.mrf.mxu0 }
 0x78e   : > { %v1828_v22 = vadd.f32 %v2433_v49, %v1827_v8  ;;  %v1957_v23 = vrot.slane %v1956_v6, 1 }
 0x790   : > { %v1832_v54 = vmul.f32 0.044715, %v1828_v22  ;;  %v1958_v24 = vadd.f32 %v1957_v23, %v1956_v6  ;;  %v1831_v9 = vmul.f32 0.5, %v1828_v22 }
 0x792   : > { %v1833_v25 = vmul.f32 %v1832_v54, %v1828_v22  ;;  %2308 = vpush %v1958_v24 }
 0x794   : > { %v1834_v26 = vmul.f32 %v1833_v25, %v1828_v22 }
 0x795   : > { %v1829_v60 = vpop.f32.mrf.mxu0 }
 0x796   : > { %v1835_v14 = vadd.f32 %v1834_v26, %v1828_v22 }
 0x798   : > { %v1836_v27 = vmul.f32 0.7978845, %v1835_v14 }
 0x79a   : > { %2472 = vtanh.f32 %v1836_v27 }
 0x7a0   : > { %v2473_v28 = vpop.eup %2472 }
 0x7a1   : > { %v1838_v12 = vadd.f32 1.0, %v2473_v28 }
 0x7a3   : > { %v1839_v13 = vmul.f32 %v1838_v12, %v1831_v9 }
 0x7a5   : > { %v1840_v29 = vpack.c.bf16 %v1839_v13, %v1839_v13 }
 0x7a7   : > { %1913 = vmatmul.bf16.vlgmr.msra.gmra.mxu1 %v1840_v29 }
 0x824   : > { %v1914_v30 = vpop.f32.mrf.mxu1 }
 0x825   : > { %v1915_v31 = vadd.f32 %v1914_v30, %v3204_v38 }
 0x827   : > { %v2000_v15 = vadd.f32 %v1915_v31, %v3202_v37  ;;  %v1964_v32 = vsel %vm621_vm0, %v1915_v31, 0.0 }
 0x828   : > { %1965 = vadd.xlane.f32.xlu1 %v1964_v32 }
 0x829   : > { %2001 = vst.msk [vmem:[%s3269_s27] sm:$0xff] %vm621_vm0, %v2000_v15 }
 0x82c   : > { %v1916_v17 = vpop.f32.mrf.mxu1 }
 0x89b   : > { %v1966_v18 = vpop.xlane.xlu1 %1965 }
 0x89c   : > { %v1967_v33 = vmul.f32 %v1966_v18, %v2849_v10 }
 0x89e   : > { %v1968_v34 = vsub.f32 %v1915_v31, %v1967_v33 }
 0x8a0   : > { %v1969_v35 = vmul.f32 %v1968_v34, %v1968_v34 }
 0x8a2   : > { %v1970_v36 = vsel %vm621_vm0, %v1969_v35, 0.0 }
 0x8a3   : > { %1971 = vadd.xlane.f32.xlu1 %v1970_v36 }
 0x916   : > { %v1972_v38 = vpop.xlane.xlu1 %1971 }
 0x917   : > { %v1973_v37 = vmul.f32 %v1972_v38, %v3218_v11 }
 0x919   : > { %2474 = vrsqrt.f32 %v1973_v37  ;;  %vm1981_vm9 = vcmp.eq.f32.partialorder %v1973_v37, inf  ;;  %v1984_v42 = vand.u32 2147483648, %v1973_v37  ;;  %vm1983_vm0 = vcmp.eq.f32.partialorder %v1973_v37, 0.0 }
 0x91f   : > { %v2475_v0 = vpop.eup %2474 }
 0x920   : > { %v1975_v4 = vmul.f32 %v2475_v0, %v1973_v37 }
 0x922   : > { %v1976_v7 = vmul.f32 %v2475_v0, %v1975_v4 }
 0x924   : > { %v1977_v39 = vmul.f32 0.5, %v1976_v7 }
 0x926   : > { %v1978_v40 = vsub.f32 1.5, %v1977_v39 }
 0x928   : > { %v1979_v41 = vmul.f32 %v2475_v0, %v1978_v40 }
 0x92a   : > { %v1980_v10 = vmul.f32 %v1979_v41, %v1973_v37 }
 0x92c   : > { %v1982_v44 = vsel %vm1981_vm9, %v1973_v37, %v1980_v10 }
 0x92d   : > { %v1985_v45 = vsel %vm1983_vm0, %v1984_v42, %v1982_v44 }
 0x92e   : > { %v1986_v11 = vsel %vm689_vm12, %v1985_v45, 0.0 }
 0x92f   : > { %1987 = vadd.xlane.f32.xlu1 %v1986_v11 }
 0x930   : > { %2563 = shalt.err (!%p2560_p9)
}
 0x931   : > { %2320 = dma.vmem_to_hbm [thread:$0]  (%p2793_p4), %s2022_s20, 128, %s2024_s22, %s2003_s23   ;;  %vm1919_vm10 = vcmp.eq.s32.totalorder %v2995_v43, 1  ;;  %vm659_vm11 = vcmp.eq.s32.totalorder %v2995_v43, 0  ;;  %vm1963_vm12 = vcmp.eq.s32.totalorder %v2995_v43, 2 }
 0x932   : > { %s2307_s29 = spop %2306  ;;  %s3381_s27 = sld [smem:[#allocation28_spill]] }
 0x933   : > { %s2309_s1 = spop %2308  ;;  %v700_v56 = vstv %s2307_s29  ;;  %s3382_s26 = sshll.u32 %s3261_s18, 3 }
 0x934   : > { %v1960_v55 = vstv %s2309_s1  ;;  %s592_s15 = scalar_lea.vmem [#allocation12], %s3382_s26  ;;  %v701_v59 = vsel %vm659_vm11, %v700_v56, 0.0  ;;  %s2008_s21 = scalar_lea.sflag [#allocation13], %s3261_s18 }
 0x935   : > { %v1961_v58 = vsel %vm1919_vm10, %v1960_v55, 0.0  ;;  %s2036_s20 = sshll.u32 %s592_s15, 4  ;;  %s2037_s20 = int_to_ptr.vmem [resolvable:$true] %s2036_s20 }
 0x936   : > { %v1962_v61 = vadd.f32 %v1961_v58, %v701_v59 }
 0x938   : > { %s2034_s25 = scalar_lea.hbm %s3381_s27, %s2284_s24  ;;  %s2584_s29 = scalar_lea.hbm %s3381_s27, 16 }
 0x939   : > { %s2038_s23 = sshll.u32 %s2034_s25, 4  ;;  %s2039_s23 = int_to_ptr.hbm [resolvable:$true] %s2038_s23 }
 0x93a   : > { %s2578_s30 = sshra.s32 %s2039_s23, 4  ;;  %s2579_s30 = int_to_ptr.hbm [resolvable:$true] %s2578_s30 }
 0x93b   : > { %s2580_s24 = scalar_lea.hbm %s2579_s30, 8  ;;  %p2585_p13 = scmp.lt.s32.totalorder %s2579_s30, %s3381_s27 }
 0x93c   : > { %p2581_p10 = scmp.ne.s32.totalorder %s2579_s30, %s2580_s24  ;;  %p2586_p0 = scmp.lt.s32.totalorder %s2584_s29, %s2580_s24 }
 0x93e   : > { %p2582_p11 = pnand %p2581_p10, %p2793_p4  ;;  %p2587_p1 = por %p2586_p0, %p2585_p13 }
 0x940   : > { %p2583_p12 = pneg %p2582_p11 }
 0x942   : > { %p2588_p2 = pnand %p2587_p1, %p2583_p12 }
 0x9a2   : > { %v1988_v46 = vpop.xlane.xlu1 %1987 }
 0x9a3   : > { %v1989_v1 = vrot.slane %v1988_v46, 4 }
 0x9a5   : > { %v1990_v47 = vadd.f32 %v1989_v1, %v1988_v46 }
 0x9a7   : > { %v1991_v50 = vrot.slane %v1990_v47, 2 }
 0x9a9   : > { %v1992_v51 = vadd.f32 %v1991_v50, %v1990_v47 }
 0x9ab   : > { %v1993_v52 = vrot.slane %v1992_v51, 1 }
 0x9ad   : > { %v1994_v53 = vadd.f32 %v1993_v52, %v1992_v51 }
 0x9af   : > { %2310 = vpush %v1994_v53 }
 0x9e0   : > { %s2311_s22 = spop %2310 }
 0x9e1   : > { %v1996_v57 = vstv %s2311_s22 }
 0x9e2   : > { %v1997_v62 = vsel %vm1963_vm12, %v1996_v57, 0.0 }
 0x9e3   : > { %v1998_v63 = vadd.f32 %v1997_v62, %v1962_v61 }
 0x9e5   : > { %1999 = vst [vmem:[%s592_s15] sm:$0xff] %v1998_v63 }
 0x9e6   : > { %2591 = shalt.err (!%p2588_p2)
}
 0x9e7   : > { %2321 = dma.vmem_to_hbm [thread:$0]  (%p2793_p4), %s2037_s20, 128, %s2039_s23, %s2008_s21  }
 0x9e8 PF: > { %s3383_s18 = sld [smem:[#allocation21_spill]] }
 0x9e9   : > { %s3384_s2 = sld [smem:[#allocation18_spill]] }
 0x9ee   : > { %p2342_p3 = scmp.ge.s32.totalorder %s3383_s18, 2 }
 0x9ef   : > { %s2050_s26 = sand.u32 1, %s3384_s2  }
 0x9f0   : > { %p2332_p5 = pnand %p2342_p3, %p2800_p8  ;;  %s2051_s15 = scalar_lea.sflag [#allocation8], %s2050_s26 }
 0x9f2   : > { %p2333_p6 = pneg %p2332_p5 }
 0x9f4   : > { %2625 = dma.done.wait (%p2333_p6), %s2051_s15, 128  }
 0x9f5   : > { %2627 = vsyncadd (%p2333_p6), %s2051_s15, 4294967168  ;;  %s2061_s22 = scalar_lea.sflag [#allocation13], %s2050_s26 }
 0x9f6   : > { %2629 = dma.done.wait (%p2333_p6), %s2061_s22, 128  }
 0x9f7   : > { %2631 = vsyncadd (%p2333_p6), %s2061_s22, 4294967168  ;;  %s34_s23 = sadd.s32 1, %s3383_s18   ;;  %s3386_s28 = sld [smem:[#allocation19_spill]] }
 0x9f8   : > { %p31_p7 = scmp.ge.s32.totalorder %s34_s23, 4   ;;  %s3387_s20 = sld [smem:[#allocation24_spill]] }
 0x9f9   : > { %s3388_s21 = sld [smem:[#allocation20_spill]]  ;;  %s3390_s18 = smov %s2638_s19 }
 0x9fa   : > { %s3389_s22 = sld [smem:[#allocation22_spill]]  ;;  %33 = sbr.rel (!%p31_p7) target bundleno = 13 (0xd), region = 152 }
 0x9fd   : > { %s3391_s19 = smov %s3386_s28 }
 0x9ff   :  { %2067 = vsyncpa [#allocation7], 1 }
 0xa00   :  { %2069 = vsyncpa [#allocation7 + $0x1], 1 }
 0xa01   :  { %2070 = vsyncpa [#allocation10], 1 }
 0xa02   :  { %2071 = vsyncpa [#allocation8], 1 }
 0xa03   :  { %2073 = vsyncpa [#allocation8 + $0x1], 1 }
 0xa04   :  { %2074 = vsyncpa [#allocation13], 1 }
 0xa05   :  { %2076 = vsyncpa [#allocation13 + $0x1], 1 }

// kernel: tpu_custom_call.1
= control target key start
LH: loop header
LB: loop body
LE: loop exit
PB: predicated region body
PF: predicated region fallthrough
CT: control target
= control target key end

     0   :  { %s3338_s0 = inlined_call_operand.vmem [shape: f32[2,8,32], index: 0, kind: input, shape index: {}]   ;;  %s3339_s1 = inlined_call_operand.vmem [shape: f32[2,8,32], index: 1, kind: input, shape index: {}]   ;;  %s3340_s2 = inlined_call_operand.vmem [shape: f32[1,32], index: 2, kind: input, shape index: {}]   ;;  %s3341_s3 = inlined_call_operand.vmem [shape: f32[1,32], index: 3, kind: input, shape index: {}]   ;;  %s3342_s4 = inlined_call_operand.vmem [shape: bf16[32,32], index: 4, kind: input, shape index: {}]   ;;  %s3343_s5 = inlined_call_operand.vmem [shape: bf16[32,32], index: 5, kind: input, shape index: {}]   ;;  %s3344_s6 = inlined_call_operand.vmem [shape: bf16[32,32], index: 6, kind: input, shape index: {}]   ;;  %s3345_s7 = inlined_call_operand.hbm [shape: bf16[32,32], index: 7, kind: input, shape index: {}]   ;;  %s3346_s8 = inlined_call_operand.vmem [shape: f32[1,32], index: 8, kind: input, shape index: {}]   ;;  %s3347_s9 = inlined_call_operand.vmem [shape: f32[1,32], index: 9, kind: input, shape index: {}]   ;;  %s3348_s10 = inlined_call_operand.vmem [shape: f32[1,32], index: 10, kind: input, shape index: {}]   ;;  %s3349_s11 = inlined_call_operand.hbm [shape: bf16[32,128], index: 11, kind: input, shape index: {}]   ;;  %s3350_s12 = inlined_call_operand.vmem [shape: f32[1,128], index: 12, kind: input, shape index: {}]   ;;  %s3351_s13 = inlined_call_operand.vmem [shape: bf16[128,32], index: 13, kind: input, shape index: {}]   ;;  %s3352_s14 = inlined_call_operand.hbm [shape: f32[2,8,32], index: 14, kind: output, shape index: {0}]   ;;  %s3353_s15 = inlined_call_operand.hbm [shape: f32[2,1,8,128], index: 15, kind: output, shape index: {1}]  }
   0x1   :  { %3363 = sst [smem:[#allocation25_spill]] %s3338_s0 }
   0x2   :  { %3364 = sst [smem:[#allocation26_spill]] %s3339_s1 }
   0x3   :  { %3365 = sst [smem:[#allocation27_spill]] %s3340_s2 }
   0x4   :  { %3366 = sst [smem:[#allocation28_spill]] %s3353_s15 }
   0x5   :  { %21 = vsyncpa [#allocation7], 0 }
   0x6   :  { %22 = vsyncpa [#allocation10], 0 }
   0x7   :  { %23 = vsyncpa [#allocation8], 0 }
   0x8   :  { %25 = vsyncpa [#allocation8 + $0x1], 0 }
   0x9   :  { %26 = vsyncpa [#allocation13], 0 }
   0xa   :  { %28 = vsyncpa [#allocation13 + $0x1], 0  ;;  %s2753_s18 = smov 0   ;;  %s2755_s19 = smov 0  }
   0xb   :  { %s2757_s20 = smov 0   ;;  %s2759_s21 = smov 0  }
   0xc   :  { %s2761_s22 = smov 0   ;;  %s2763_s23 = smov 0  }
   0xd LB: > { %3367 = sst [smem:[#allocation18_spill]] %s2634_s18  ;;  %s2184_s24 = sadd.s32 4294967295, %s2654_s23   ;;  %s2654_s23 = sphi %s2763_s23, %s34_s23   ;;  %s2650_s22 = sphi %s2761_s22, %s3389_s22   ;;  %s2646_s21 = sphi %s2759_s21, %s3388_s21   ;;  %s2642_s20 = sphi %s2757_s20, %s3387_s20   ;;  %s2638_s19 = sphi %s2755_s19, %s3391_s19   ;;  %s2634_s18 = sphi %s2753_s18, %s3390_s18  }
   0xe   : > { %3368 = sst [smem:[#allocation19_spill]] %s2642_s20  ;;  %s2185_s25 = sadd.s32 4294967294, %s2654_s23  }
   0xf   : > { %3369 = sst [smem:[#allocation20_spill]] %s2650_s22  ;;  %s53_s26 = sadd.s32 1, %s2650_s22 }
  0x10   : > { %3370 = sst [smem:[#allocation21_spill]] %s2654_s23  ;;  %s374_s27 = sadd.s32 1, %s2642_s20 }
  0x11   : > { %p55_p0 = scmp.ge.s32.totalorder %s53_s26, 2  ;;  %p384_p1 = scmp.ne.s32.totalorder %s2642_s20, %s2638_s19 }
  0x12   : > { %p385_p2 = scmp.eq.s32.totalorder %s2184_s24, 1  ;;  %p390_p3 = scmp.ne.s32.totalorder %s2638_s19, %s2634_s18 }
  0x13   : > { %s3393_s26 = smov (%p55_p0, %s53_s26), 0  ;;  %p391_p5 = scmp.eq.s32.totalorder %s2185_s25, 1 }
  0x14   : > { %3371 = sst [smem:[#allocation22_spill]] %s3393_s26  ;;  %p2793_p4 = por %p385_p2, %p384_p1 }
  0x15   : > { %s369_s29 = ssub.s32 %s2650_s22, %s3393_s26  ;;  %p2186_p6 = scmp.ge.s32.totalorder %s2654_s23, 1 }
  0x16   : > { %p372_p7 = scmp.eq.s32.totalorder %s369_s29, 0  ;;  %p2800_p8 = por %p391_p5, %p390_p3 }
  0x17   : > { %p426_p9 = scmp.lt.s32.totalorder %s2654_s23, 3  ;;  %p2812_p11 = scmp.eq.s32.totalorder %s2184_s24, 0 }
  0x18   : > { %s3373_s30 = scalar_select %p2800_p8, 1, 0 }
  0x19   : > { %s2806_s16 = scalar_select %p372_p7, %s2642_s20, %s374_s27  }
  0x1a   : > { %3374 = sst [smem:[#allocation23_spill]] %s3373_s30  ;;  %p2808_p10 = pnand %p2186_p6, %p426_p9 }
  0x1b   : > { %3375 = sst [smem:[#allocation24_spill]] %s2806_s16  ;;  %s452_s29 = sshll.u32 %s3345_s7, 4  ;;  %s453_s29 = int_to_ptr.hbm [resolvable:$true] %s452_s29 }
  0x1c   : > { %p2324_p12 = pneg %p2808_p10  ;;  %s2656_s22 = smov [#allocation6]  }
  0x1d   : > { %s454_s27 = sshll.u32 %s2656_s22, 4  ;;  %s475_s24 = sshll.u32 %s3349_s11, 4  ;;  %s455_s27 = int_to_ptr.vmem [resolvable:$true] %s454_s27  ;;  %s476_s24 = int_to_ptr.hbm [resolvable:$true] %s475_s24 }
  0x1e   : > { %p2325_p13 = pnand %p2812_p11, %p2324_p12  ;;  %s2657_s30 = smov 64  }
  0x1f   : > { %s2658_s23 = smov 4   ;;  %s2659_s15 = smov [#allocation9]  }
  0x20   : > { %2327 = dma.hbm_to_vmem [thread:$0]  (!%p2325_p13), %s453_s29, 256, %s455_s27, [#allocation7], %s2657_s30, %s2657_s30, %s2658_s23  }
  0x21   : > { %s477_s26 = sshll.u32 %s2659_s15, 4  ;;  %523 = sbr.rel (%p2808_p10) target bundleno = 2536 (0x9e8), region = 76  ;;  %s478_s26 = int_to_ptr.vmem [resolvable:$true] %s477_s26 }
  0x22   : > { %2330 = dma.hbm_to_vmem [thread:$0]  (!%p2325_p13), %s476_s24, 256, %s478_s26, [#allocation10], %s2657_s30, %s2657_s30, %s2658_s23  }
  0x26   : > { %2617 = dma.done.wait (%p2812_p11), [#allocation7], 256  }
  0x27   : > { %2619 = vsyncadd (%p2812_p11), [#allocation7], 4294967040 }
  0x28   : > { %2621 = dma.done.wait (%p2812_p11), [#allocation10], 256  }
  0x29   : > { %2623 = vsyncadd (%p2812_p11), [#allocation10], 4294967040  ;;  %p593_p0 = scmp.lt.s32.totalorder %s2646_s21, 1  ;;  %s3378_s1 = sld [smem:[#allocation26_spill]]  ;;  %vm621_vm0 = vcmask 261120   ;;  %v2660_v4 = vmov 32.0  }
  0x2a   : > { %s3379_s0 = sld [smem:[#allocation25_spill]]  ;;  %2434 = vrcp.f32 %v2660_v4  ;;  %v2291_v21 = vld [vmem:[%s3342_s4 + $0x8] sm:$0xff]  ;;  %v2290_v22 = vld [vmem:[%s3342_s4] sm:$0xff]  ;;  %s2661_s23 = smov 104   ;;  %vm748_vm8 = vcmask 1047556   ;;  %vm862_vm9 = vcmask 60416  }
  0x2b   : > { %s594_s15 = scalar_select %p593_p0, %s2646_s21, 1  ;;  %951 = vmatpush.bf16.msra.mxu2 %v2291_v21  ;;  %v2289_v23 = vld [vmem:[%s3343_s5 + $0x8] sm:$0xff]  ;;  %v2288_v25 = vld [vmem:[%s3343_s5] sm:$0xff]  ;;  %vm875_vm10 = vcmask 64512   ;;  %vm689_vm12 = vcmask 7168   ;;  %vm1460_vm13 = vcmask 1043456  }
  0x2c   : > { %729 = vmatpush.bf16.msra.mxu0 %v2289_v23  ;;  %v2293_v28 = vld [vmem:[%s3344_s6 + $0x8] sm:$0xff]  ;;  %v2292_v30 = vld [vmem:[%s3344_s6] sm:$0xff]  ;;  %s3380_s2 = sld [smem:[#allocation27_spill]]  ;;  %s2663_s16 = smov 112   ;;  %vm1712_vm14 = vcmask 130048   ;;  %vm1714_vm15 = vcmask 195584  }
  0x2d   : > { %s2195_s20 = sshll.u32 %s594_s15, 3  ;;  %v2427_v45 = vld [vmem:[%s3341_s3] ss:$0 sm:$0xff]  ;;  %s2669_s17 = smov 24  }
  0x2e   : > { %v2429_v55 = vld [vmem:[%s3341_s3] ss:$0 sm:$0xff]  ;;  %s2670_s18 = smov 16   ;;  %s2671_s29 = smov 8  }
  0x2f   : > { %s608_s30 = scalar_lea.vmem %s3378_s1, %s2195_s20  ;;  %952 = vmatpush.bf16.msra.mxu2 %v2290_v22  ;;  %s2284_s24 = sshll.u32 %s2646_s21, 3 }
  0x30   : > { %v884_v0 = vld [vmem:[%s608_s30] sm:$0xff]  ;;  %s2845_s25 = scalar_lea.vmem %s3379_s0, %s2195_s20  ;;  %v2435_v5 = vpop.eup %2434  ;;  %730 = vmatpush.bf16.msra.mxu0 %v2288_v25  ;;  %s2662_s30 = smov 120  }
  0x31   : > { %v888_v1 = vsel %vm621_vm0, %v884_v0, 0.0  ;;  %v618_v2 = vld [vmem:[%s2845_s25] sm:$0xff]  ;;  %v626_v6 = vmul.f32 32.0, %v2435_v5  ;;  %vm630_vm1 = vweird.f32 %v2435_v5  ;;  %s2019_s15 = scalar_lea.hbm %s3352_s14, %s2284_s24  ;;  %s2556_s0 = scalar_lea.hbm %s3352_s14, 16 }
  0x32   : > { %889 = vadd.xlane.f32.xlu0 %v888_v1  ;;  %v622_v3 = vsel %vm621_vm0, %v618_v2, 0.0  ;;  %v2426_v41 = vld [vmem:[%s3380_s2] ss:$0 sm:$0xff]  ;;  %s2023_s22 = sshll.u32 %s2019_s15, 4  ;;  %s2024_s22 = int_to_ptr.hbm [resolvable:$true] %s2023_s22 }
  0x33   : > { %v627_v7 = vsub.f32 1.0, %v626_v6  ;;  %980 = vmatpush.bf16.msrb.mxu2 %v2293_v28  ;;  %v2428_v52 = vld [vmem:[%s3380_s2] ss:$0 sm:$0xff] }
  0x35   : > { %v628_v8 = vmul.f32 %v2435_v5, %v627_v7  ;;  %v2664_v7 = vmov 1983009808  }
  0x37   : > { %v629_v9 = vadd.f32 %v2435_v5, %v628_v8  ;;  %981 = vmatpush.bf16.msrb.mxu2 %v2292_v30  ;;  %v753_v8 = vunpack.c.l.s4 %v2664_v7 }
  0x39   : > { %v2849_v10 = vsel %vm630_vm1, %v2435_v5, %v629_v9 }
  0x3a   : > { %623 = vadd.xlane.f32.xlu0 %v622_v3 }
  0xa5   : > { %v890_v11 = vpop.xlane.xlu0 %889 }
  0xa6   : > { %v898_v12 = vmul.f32 %v890_v11, %v2849_v10 }
  0xa8   : > { %v899_v13 = vsub.f32 %v884_v0, %v898_v12 }
  0xaa   : > { %v900_v14 = vmul.f32 %v899_v13, %v899_v13 }
  0xac   : > { %v901_v15 = vsel %vm621_vm0, %v900_v14, 0.0  ;;  %v2899_v14 = vunpack.c.0.s8 %v753_v8 }
  0xad   : > { %902 = vadd.xlane.f32.xlu1 %v901_v15  ;;  %v624_v16 = vpop.xlane.xlu0 %623 }
  0xae   : > { %v632_v17 = vmul.f32 %v2849_v10, %v624_v16 }
  0xb0   : > { %v633_v18 = vsub.f32 %v618_v2, %v632_v17 }
  0xb2   : > { %v634_v19 = vmul.f32 %v633_v18, %v633_v18 }
  0xb4   : > { %v635_v20 = vsel %vm621_vm0, %v634_v19, 0.0  ;;  %v2665_v19 = vmov 1934713408  }
  0xb5   : > { %636 = vadd.xlane.f32.xlu1 %v635_v20  ;;  %v777_v20 = vunpack.c.l.s4 %v2665_v19 }
 0x120   : > { %v903_v24 = vpop.xlane.xlu1 %902 }
 0x121   : > { %v904_v26 = vmul.f32 %v903_v24, %v2849_v10 }
 0x123   : > { %v905_v27 = vadd.f32 1e-05, %v904_v26 }
 0x125   : > { %2436 = vrsqrt.f32 %v905_v27  ;;  %vm912_vm3 = vweird.f32 %v905_v27 }
 0x128   : > { %v637_v29 = vpop.xlane.xlu1 %636 }
 0x129   : > { %v638_v31 = vmul.f32 %v637_v29, %v2849_v10 }
 0x12b   : > { %v2437_v32 = vpop.eup %2436  ;;  %v639_v33 = vadd.f32 1e-05, %v638_v31 }
 0x12c   : > { %v907_v34 = vmul.f32 %v2437_v32, %v905_v27  ;;  %vm913_vm2 = vweird.f32 %v2437_v32 }
 0x12d   : > { %2438 = vrsqrt.f32 %v639_v33  ;;  %vm914_vm4 = vmor %vm912_vm3, %vm913_vm2  ;;  %vm646_vm6 = vweird.f32 %v639_v33 }
 0x12e   : > { %v908_v35 = vmul.f32 %v2437_v32, %v907_v34 }
 0x130   : > { %v909_v36 = vmul.f32 0.5, %v908_v35 }
 0x132   : > { %v910_v37 = vsub.f32 1.5, %v909_v36 }
 0x133   : > { %v2439_v38 = vpop.eup %2438 }
 0x134   : > { %v911_v39 = vmul.f32 %v2437_v32, %v910_v37  ;;  %v641_v40 = vmul.f32 %v2439_v38, %v639_v33  ;;  %vm647_vm5 = vweird.f32 %v2439_v38 }
 0x135   : > { %vm648_vm7 = vmor %vm646_vm6, %vm647_vm5 }
 0x136   : > { %v915_v42 = vsel %vm914_vm4, %v2437_v32, %v911_v39  ;;  %v642_v43 = vmul.f32 %v2439_v38, %v641_v40  ;;  %v2909_v32 = vunpack.c.0.s8 %v777_v20 }
 0x137   : > { %v916_v44 = vmul.f32 %v915_v42, %v899_v13 }
 0x138   : > { %v643_v46 = vmul.f32 0.5, %v642_v43 }
 0x139   : > { %v920_v47 = vmul.f32 %v2426_v41, %v916_v44 }
 0x13a   : > { %v644_v48 = vsub.f32 1.5, %v643_v46 }
 0x13b   : > { %v924_v49 = vadd.f32 %v2427_v45, %v920_v47 }
 0x13c   : > { %v645_v50 = vmul.f32 %v2439_v38, %v644_v48 }
 0x13d   : > { %v925_v51 = vpack.c.bf16 %v924_v49, %v924_v49 }
 0x13e   : > { %v649_v53 = vsel %vm648_vm7, %v2439_v38, %v645_v50 }
 0x13f   : > { %v650_v54 = vmul.f32 %v649_v53, %v633_v18  ;;  %2214 = vmatmul.msk.bf16.vlgmr.msra.gmra.mxu2 %vm621_vm0, %v925_v51 }
 0x141   : > { %v654_v56 = vmul.f32 %v2428_v52, %v650_v54 }
 0x143   : > { %v2888_v57 = vadd.f32 %v2429_v55, %v654_v56 }
 0x145   : > { %v703_v58 = vpack.c.bf16 %v2888_v57, %v2888_v57 }
 0x147   : > { %2205 = vmatmul.msk.bf16.vlgmr.msra.gmra.mxu0 %vm621_vm0, %v703_v58 }
 0x14f   : > { %2223 = vmatmul.msk.bf16.vlgmr.msrb.gmra.mxu2 %vm621_vm0, %v925_v51 }
 0x1c2   : > { %v954_v59 = vpop.f32.mrf.mxu2 }
 0x1c3   : > { %v1000_v15 = vrot.slane %v954_v59, 4 }
 0x1c4   : > { %v732_v60 = vpop.f32.mrf.mxu0 }
 0x1c5   : > { %v736_v61 = vmul.f32 0.35355338, %v732_v60 }
 0x1c7   : > { %v2418_v62 = vpack.i.bf16 %v954_v59, %v736_v61  ;;  %v750_v12 = vrot.slane %v736_v61, 4 }
 0x1c9   : > { %2419 = vrot.lane.b32.xlu0 %v2418_v62, %s2661_s23  ;;  %2409 = vrot.lane.b32.xlu2 %v2418_v62, %s2662_s30 }
 0x1ca   : > { %v956_v63 = vpop.f32.mrf.mxu2 }
 0x1cc   : > { %v734_v0 = vpop.f32.mrf.mxu0 }
 0x1d1   : > { %2414 = vrot.lane.b32.xlu2 %v2418_v62, %s2663_s16 }
 0x1d2   : > { %v2895_v1 = vpop.f32.mrf.mxu2 }
 0x1d3   : > { %1113 = vrot.lane.b32.xlu0 %v2895_v1, %s2662_s30  ;;  %s2550_s30 = sshra.s32 %s2024_s22, 4  ;;  %s2551_s30 = int_to_ptr.hbm [resolvable:$true] %s2550_s30 }
 0x1d4   : > { %p2557_p5 = scmp.lt.s32.totalorder %s2551_s30, %s3352_s14 }
 0x1da   : > { %v985_v2 = vpop.f32.mrf.mxu2 }
 0x1db   : > { %1119 = vrot.lane.b32.xlu0 %v2895_v1, %s2661_s23 }
 0x223   : > { %v2410_v3 = vpop.permute.xlu2 %2409 }
 0x224   : > { %v2412_v13 = vunpack.i.h.bf16 %v2410_v3  ;;  %v2411_v16 = vunpack.i.l.bf16 %v2410_v3 }
 0x226   : > { %v1012_v23 = vrot.slane %v2412_v13, 4  ;;  %v762_v26 = vrot.slane %v2411_v16, 4 }
 0x22b   : > { %v2415_v4 = vpop.permute.xlu2 %2414 }
 0x22c   : > { %v2416_v5 = vunpack.i.l.bf16 %v2415_v4  ;;  %v2417_v6 = vunpack.i.h.bf16 %v2415_v4 }
 0x22e   : > { %v747_v9 = vrot.slane %v2416_v5, 4  ;;  %v997_v11 = vrot.slane %v2417_v6, 4  ;;  %v751_v17 = vsel %vm748_vm8, %v2416_v5, %v750_v12  ;;  %v1001_v22 = vsel %vm748_vm8, %v2417_v6, %v1000_v15 }
 0x22f   : > { %v759_v24 = vperm.slane %v751_v17, %v2899_v14  ;;  %v1009_v31 = vperm.slane %v1001_v22, %v2899_v14 }
 0x230   : > { %v749_v18 = vsel %vm748_vm8, %v747_v9, %v736_v61  ;;  %v999_v21 = vsel %vm748_vm8, %v997_v11, %v954_v59 }
 0x231   : > { %v755_v27 = vperm.slane %v749_v18, %v2899_v14  ;;  %v1005_v30 = vperm.slane %v999_v21, %v2899_v14  ;;  %v786_v37 = vrot.slane %v759_v24, 4  ;;  %v1036_v48 = vrot.slane %v1009_v31, 4 }
 0x233   : > { %v774_v40 = vrot.slane %v755_v27, 4  ;;  %v1024_v47 = vrot.slane %v1005_v30, 4 }
 0x23b   : > { %v2420_v25 = vpop.permute.xlu0 %2419 }
 0x23c   : > { %v2422_v28 = vunpack.i.h.bf16 %v2420_v25  ;;  %v2421_v29 = vunpack.i.l.bf16 %v2420_v25 }
 0x23e   : > { %v1010_v33 = vrot.slane %v2422_v28, 4  ;;  %v760_v34 = vrot.slane %v2421_v29, 4  ;;  %v763_v35 = vsel %vm748_vm8, %v2421_v29, %v762_v26  ;;  %v1013_v36 = vsel %vm748_vm8, %v2422_v28, %v1012_v23 }
 0x23f   : > { %v771_v38 = vperm.slane %v763_v35, %v2899_v14  ;;  %v1021_v39 = vperm.slane %v1013_v36, %v2899_v14 }
 0x240   : > { %v761_v41 = vsel %vm748_vm8, %v760_v34, %v2411_v16  ;;  %v1011_v42 = vsel %vm748_vm8, %v1010_v33, %v2412_v13 }
 0x241   : > { %v767_v43 = vperm.slane %v761_v41, %v2899_v14  ;;  %v784_v44 = vrot.slane %v771_v38, 4  ;;  %v787_v45 = vsel %vm748_vm8, %v771_v38, %v786_v37  ;;  %v1017_v46 = vperm.slane %v1011_v42, %v2899_v14 }
 0x242   : > { %v795_v49 = vperm.slane %v787_v45, %v2909_v32  ;;  %v1034_v50 = vrot.slane %v1021_v39, 4  ;;  %v1037_v63 = vsel %vm748_vm8, %v1021_v39, %v1036_v48 }
 0x243   : > { %v772_v51 = vrot.slane %v767_v43, 4  ;;  %v775_v52 = vsel %vm748_vm8, %v767_v43, %v774_v40  ;;  %v785_v53 = vsel %vm748_vm8, %v784_v44, %v759_v24  ;;  %v1022_v54 = vrot.slane %v1017_v46, 4 }
 0x244   : > { %v783_v55 = vperm.slane %v775_v52, %v2909_v32  ;;  %v791_v56 = vperm.slane %v785_v53, %v2909_v32  ;;  %v802_v58 = vrot.slane %v795_v49, 4  ;;  %v1025_v59 = vsel %vm748_vm8, %v1017_v46, %v1024_v47 }
 0x245   : > { %v773_v60 = vsel %vm748_vm8, %v772_v51, %v755_v27  ;;  %v1023_v61 = vsel %vm748_vm8, %v1022_v54, %v1005_v30  ;;  %v1035_v62 = vsel %vm748_vm8, %v1034_v50, %v1009_v31  ;;  %v1033_v7 = vperm.slane %v1025_v59, %v2909_v32 }
 0x246   : > { %v779_v0 = vperm.slane %v773_v60, %v2909_v32  ;;  %v798_v2 = vrot.slane %v783_v55, 4  ;;  %v800_v3 = vrot.slane %v791_v56, 4  ;;  %v803_v4 = vsel %vm748_vm8, 0.0, %v802_v58 }
 0x247   : > { %v815_v5 = vsel %vm748_vm8, %v802_v58, %v791_v56  ;;  %v820_v6 = vrot.slane %v803_v4, 4  ;;  %v1041_v8 = vperm.slane %v1035_v62, %v2909_v32  ;;  %v1045_v21 = vperm.slane %v1037_v63, %v2909_v32 }
 0x248   : > { %v796_v9 = vrot.slane %v779_v0, 4  ;;  %v799_v11 = vsel %vm748_vm8, 0.0, %v798_v2  ;;  %v801_v12 = vsel %vm748_vm8, 0.0, %v800_v3  ;;  %v804_v13 = vsel %vm748_vm8, %v798_v2, %v779_v0 }
 0x249   : > { %v808_v15 = vperm.slane %v804_v13, %v2899_v14  ;;  %v809_v16 = vrot.slane %v799_v11, 4  ;;  %v819_v17 = vperm.slane %v815_v5, %v2899_v14  ;;  %v821_v18 = vsel %vm748_vm8, %v820_v6, %v801_v12 }
 0x24a   : > { %v797_v19 = vsel %vm748_vm8, 0.0, %v796_v9  ;;  %v825_v20 = vperm.slane %v821_v18, %v2899_v14  ;;  %v1029_v27 = vperm.slane %v1023_v61, %v2909_v32  ;;  %v1052_v28 = vrot.slane %v1045_v21, 4 }
 0x24b   : > { %v810_v22 = vsel %vm748_vm8, %v809_v16, %v797_v19  ;;  %v828_v23 = vrot.slane %v808_v15, 4  ;;  %v840_v24 = vrot.slane %v819_v17, 4  ;;  %v1048_v30 = vrot.slane %v1033_v7, 4 }
 0x24c   : > { %v814_v25 = vperm.slane %v810_v22, %v2899_v14  ;;  %v838_v26 = vrot.slane %v825_v20, 4  ;;  %v1050_v31 = vrot.slane %v1041_v8, 4  ;;  %v1053_v39 = vsel %vm748_vm8, 0.0, %v1052_v28 }
 0x24d   : > { %v841_v29 = vsel %vm748_vm8, %v825_v20, %v840_v24  ;;  %v1046_v42 = vrot.slane %v1029_v27, 4  ;;  %v1049_v47 = vsel %vm748_vm8, 0.0, %v1048_v30  ;;  %v1070_v48 = vrot.slane %v1053_v39, 4 }
 0x24e   : > { %v826_v33 = vrot.slane %v814_v25, 4  ;;  %v829_v34 = vsel %vm748_vm8, %v814_v25, %v828_v23  ;;  %v839_v35 = vsel %vm748_vm8, %v838_v26, %v819_v17  ;;  %v849_v36 = vperm.slane %v841_v29, %v2909_v32 }
 0x24f   : > { %v837_v37 = vperm.slane %v829_v34, %v2909_v32  ;;  %v845_v38 = vperm.slane %v839_v35, %v2909_v32  ;;  %v1051_v49 = vsel %vm748_vm8, 0.0, %v1050_v31  ;;  %v1047_v56 = vsel %vm748_vm8, 0.0, %v1046_v42 }
 0x250   : > { %v827_v40 = vsel %vm748_vm8, %v826_v33, %v808_v15  ;;  %v854_v41 = vrot.slane %v849_v36, 4  ;;  %v1054_v59 = vsel %vm748_vm8, %v1048_v30, %v1029_v27  ;;  %v1059_v60 = vrot.slane %v1049_v47, 4 }
 0x251   : > { %v833_v43 = vperm.slane %v827_v40, %v2909_v32  ;;  %v850_v44 = vrot.slane %v845_v38, 4  ;;  %v856_v45 = vrot.slane %v837_v37, 4  ;;  %v1065_v61 = vsel %vm748_vm8, %v1052_v28, %v1041_v8 }
 0x252   : > { %v855_v46 = vsel %vm748_vm8, %v854_v41, %v837_v37  ;;  %v1058_v63 = vperm.slane %v1054_v59, %v2899_v14  ;;  %v1069_v0 = vperm.slane %v1065_v61, %v2899_v14  ;;  %v1071_v2 = vsel %vm748_vm8, %v1070_v48, %v1051_v49 }
 0x253   : > { %v851_v50 = vsel %vm748_vm8, %v850_v44, %v833_v43  ;;  %v852_v51 = vrot.slane %v833_v43, 4  ;;  %v857_v52 = vsel %vm748_vm8, %v849_v36, %v856_v45  ;;  %v860_v53 = vpack.c.bf16 %v855_v46, %v855_v46 }
 0x254   : > { %v858_v54 = vpack.c.bf16 %v851_v50, %v851_v50  ;;  %v861_v55 = vpack.c.bf16 %v857_v52, %v857_v52  ;;  %v1060_v3 = vsel %vm748_vm8, %v1059_v60, %v1047_v56  ;;  %v1075_v4 = vperm.slane %v1071_v2, %v2899_v14 }
 0x255   : > { %v853_v58 = vsel %vm748_vm8, %v845_v38, %v852_v51  ;;  %865 = vst.msk [vmem:[#allocation2 + $0x8] sm:$0xf] %vm862_vm9, %v860_v53  ;;  %v1064_v5 = vperm.slane %v1060_v3, %v2899_v14  ;;  %v1078_v6 = vrot.slane %v1058_v63, 4  ;;  %v1090_v7 = vrot.slane %v1069_v0, 4 }
 0x256   : > { %v859_v62 = vpack.c.bf16 %v853_v58, %v853_v58  ;;  %866 = vst.msk [vmem:[#allocation2 + $0xc] sm:$0xf] %vm862_vm9, %v861_v55  ;;  %v1088_v8 = vrot.slane %v1075_v4, 4  ;;  %v612_v41 = vlaneseq  ;;  %v2666_v59 = vmov -1e+30  }
 0x257   : > { %863 = vst.msk [vmem:[#allocation2] sm:$0xf] %vm862_vm9, %v858_v54  ;;  %v1079_v9 = vsel %vm748_vm8, %v1064_v5, %v1078_v6  ;;  %v1091_v11 = vsel %vm748_vm8, %v1075_v4, %v1090_v7  ;;  %v1076_v12 = vrot.slane %v1064_v5, 4 }
 0x258   : > { %864 = vst.msk [vmem:[#allocation2 + $0x4] sm:$0xf] %vm862_vm9, %v859_v62  ;;  %v1087_v13 = vperm.slane %v1079_v9, %v2909_v32  ;;  %v1099_v15 = vperm.slane %v1091_v11, %v2909_v32  ;;  %v1089_v16 = vsel %vm748_vm8, %v1088_v8, %v1069_v0  ;;  %v2995_v43 = vshrl.u32 %v612_v41, 7 }
 0x259   : > { %v1077_v17 = vsel %vm748_vm8, %v1076_v12, %v1058_v63  ;;  %v1095_v18 = vperm.slane %v1089_v16, %v2909_v32  ;;  %v1322_v44 = vand.u32 127, %v612_v41  ;;  %870 = vst.msk [vmem:[#allocation3 + $0x18] sm:$0xff] %vm689_vm12, %v2666_v59  ;;  %v2667_v62 = vmov 0  }
 0x25a   : > { %v1104_v19 = vrot.slane %v1099_v15, 4  ;;  %v1106_v20 = vrot.slane %v1087_v13, 4  ;;  %v1083_v21 = vperm.slane %v1077_v17, %v2909_v32  ;;  %867 = vst.msk [vmem:[#allocation3] sm:$0xff] %vm689_vm12, %v2666_v59  ;;  %2424 = vset.pattern.permute.xlu2 %v2667_v62  ;;  %2423 = vset.pattern.permute.xlu0 %v2667_v62  ;;  %v2668_v63 = vmov 0.0  }
 0x25b   : > { %v1100_v22 = vrot.slane %v1095_v18, 4  ;;  %vm1325_vm11 = vcmp.le.s32.totalorder %v1322_v44, %v2995_v43  ;;  %868 = vst.msk [vmem:[#allocation3 + $0x8] sm:$0xff] %vm689_vm12, %v2666_v59  ;;  %2425 = vset.pattern.permute.xlu1 %v2667_v62 }
 0x25c   : > { %v1105_v23 = vsel %vm748_vm8, %v1104_v19, %v1087_v13  ;;  %v1107_v24 = vsel %vm748_vm8, %v1099_v15, %v1106_v20  ;;  %v1102_v25 = vrot.slane %v1083_v21, 4  ;;  %v1238_v37 = vld [vmem:[#allocation2 + $0x8] sm:$0xf]  ;;  %869 = vst.msk [vmem:[#allocation3 + $0x10] sm:$0xff] %vm689_vm12, %v2666_v59  ;;  %v1114_v19 = vpop.permute.xlu0 %1113 }
 0x25d   : > { %v1110_v26 = vpack.c.bf16 %v1105_v23, %v1105_v23  ;;  %v1101_v27 = vsel %vm748_vm8, %v1100_v22, %v1083_v21  ;;  %v1111_v28 = vpack.c.bf16 %v1107_v24, %v1107_v24  ;;  %v1239_v38 = vld [vmem:[#allocation2 + $0xc] sm:$0xf]  ;;  %874 = vst.msk [vmem:[#allocation4 + $0x18] sm:$0xff] %vm689_vm12, %v2668_v63  ;;  %v1136_v21 = vrot.slane %v1114_v19, 4 }
 0x25e   : > { %v1108_v29 = vpack.c.bf16 %v1101_v27, %v1101_v27  ;;  %v1103_v30 = vsel %vm748_vm8, %v1095_v18, %v1102_v25  ;;  %v1236_v39 = vld [vmem:[#allocation2] sm:$0xf]  ;;  %871 = vst.msk [vmem:[#allocation4] sm:$0xff] %vm689_vm12, %v2668_v63 }
 0x25f   : > { %v1283_v31 = vsel %vm875_vm10, %v1110_v26, 0  ;;  %v1302_v33 = vsel %vm875_vm10, %v1111_v28, 0  ;;  %v1109_v34 = vpack.c.bf16 %v1103_v30, %v1103_v30  ;;  %v1237_v40 = vld [vmem:[#allocation2 + $0x4] sm:$0xf]  ;;  %872 = vst.msk [vmem:[#allocation4 + $0x8] sm:$0xff] %vm689_vm12, %v2668_v63  ;;  %v1124_v26 = vrot.slane %v2895_v1, 4 }
 0x260   : > { %1292 = vmatpush.bf16.xpose.msra.mxu1 %v1283_v31  ;;  %v1245_v35 = vsel %vm875_vm10, %v1108_v29, 0  ;;  %1311 = vmatpush.bf16.xpose.msra.mxu2 %v1302_v33  ;;  %873 = vst.msk [vmem:[#allocation4 + $0x10] sm:$0xff] %vm689_vm12, %v2668_v63  ;;  %v3036_v0 = vld [vmem:[#allocation3 + $0x18] sm:$0xff] }
 0x261   : > { %1254 = vmatpush.bf16.xpose.msra.mxu3 %v1245_v35  ;;  %v1264_v36 = vsel %vm875_vm10, %v1109_v34, 0  ;;  %876 = vst.msk [vmem:[#allocation5] sm:$0xff] %vm875_vm10, %v2668_v63  ;;  %v3038_v2 = vld [vmem:[#allocation3] sm:$0xff] }
 0x262   : > { %1273 = vmatpush.bf16.xpose.msrb.mxu0 %v1264_v36  ;;  %877 = vst.msk [vmem:[#allocation5 + $0x8] sm:$0xff] %vm875_vm10, %v2668_v63  ;;  %v3066_v15 = vld [vmem:[#allocation3 + $0x8] sm:$0xff] }
 0x263   : > { %878 = vst.msk [vmem:[#allocation5 + $0x10] sm:$0xff] %vm875_vm10, %v2668_v63  ;;  %v3056_v9 = vld [vmem:[#allocation3 + $0x10] sm:$0xff] }
 0x264   : > { %879 = vst.msk [vmem:[#allocation5 + $0x18] sm:$0xff] %vm875_vm10, %v2668_v63  ;;  %v1120_v20 = vpop.permute.xlu0 %1119 }
 0x265   : > { %v1134_v22 = vrot.slane %v1120_v20, 4  ;;  %v1137_v23 = vsel %vm748_vm8, %v1120_v20, %v1136_v21 }
 0x266   : > { %v1145_v25 = vperm.slane %v1137_v23, %v2899_v14 }
 0x267   : > { %2226 = vmatmul.msk.bf16.vlgmr.msra.gmra.mxu1 %vm875_vm10, %v1238_v37  ;;  %2227 = vmatmul.msk.bf16.vlgmr.msra.gmra.mxu2 %vm875_vm10, %v1239_v38  ;;  %v1135_v24 = vsel %vm748_vm8, %v1134_v22, %v1114_v19 }
 0x268   : > { %2224 = vmatmul.msk.bf16.vlgmr.msra.gmra.mxu3 %vm875_vm10, %v1236_v39  ;;  %v1141_v27 = vperm.slane %v1135_v24, %v2899_v14  ;;  %v1158_v31 = vrot.slane %v1145_v25, 4 }
 0x269   : > { %2225 = vmatmul.msk.bf16.vlgmr.msrb.gmra.mxu0 %vm875_vm10, %v1237_v40 }
 0x26a   : > { %v1146_v35 = vrot.slane %v1141_v27, 4 }
 0x2e4   : > { %v1294_v42 = vpop.f32.mrf.mxu1 }
 0x2e5   : > { %v3012_v54 = vsel %vm1325_vm11, %v1294_v42, -1e+30 }
 0x2e6   : > { %v1275_v45 = vpop.f32.mrf.mxu0  ;;  %v1342_v58 = vsel %vm875_vm10, %v3012_v54, -inf }
 0x2e7   : > { %v3020_v60 = vsel %vm1325_vm11, %v1275_v45, -1e+30 }
 0x2e8   : > { %v1339_v61 = vsel %vm875_vm10, %v3020_v60, -inf }
 0x2ea   : > { %v1313_v46 = vpop.f32.mrf.mxu2 }
 0x2eb   : > { %v1256_v47 = vpop.f32.mrf.mxu3  ;;  %v3000_v48 = vsel %vm1325_vm11, %v1313_v46, -1e+30 }
 0x2ec   : > { %v3004_v49 = vsel %vm1325_vm11, %v1256_v47, -1e+30  ;;  %v1296_v50 = vpop.f32.mrf.mxu1  ;;  %v1345_v51 = vsel %vm875_vm10, %v3000_v48, -inf }
 0x2ed   : > { %1346 = vmax.xlane.f32.xlu2 %v1345_v51  ;;  %v1336_v52 = vsel %vm875_vm10, %v3004_v49, -inf }
 0x2ee   : > { %1337 = vmax.xlane.f32.xlu1 %v1336_v52  ;;  %v1277_v53 = vpop.f32.mrf.mxu0 }
 0x2f2   : > { %v1315_v55 = vpop.f32.mrf.mxu2 }
 0x2f3   : > { %v1258_v56 = vpop.f32.mrf.mxu3 }
 0x2f6   : > { %1343 = vmax.xlane.f32.xlu1 %v1342_v58 }
 0x2fe   : > { %1340 = vmax.xlane.f32.xlu1 %v1339_v61 }
 0x317   : > { %1116 = vrot.lane.b32.xlu1 %v2895_v1, %s2663_s16  ;;  %s2552_s16 = scalar_lea.hbm %s2551_s30, 8 }
 0x318   : > { %p2553_p1 = scmp.ne.s32.totalorder %s2551_s30, %s2552_s16  ;;  %p2558_p6 = scmp.lt.s32.totalorder %s2556_s0, %s2552_s16 }
 0x31a   : > { %p2554_p2 = pnand %p2553_p1, %p2793_p4  ;;  %p2559_p7 = por %p2558_p6, %p2557_p5 }
 0x31c   : > { %p2555_p3 = pneg %p2554_p2 }
 0x31e   : > { %p2560_p9 = pnand %p2559_p7, %p2555_p3 }
 0x360   : > { %v1347_v3 = vpop.xlane.xlu2 %1346 }
 0x361   : > { %v3041_v4 = vmax.f32 %v3036_v0, %v1347_v3  ;;  %v1338_v5 = vpop.xlane.xlu1 %1337 }
 0x362   : > { %v3044_v6 = vmax.f32 %v3038_v2, %v1338_v5 }
 0x363   : > { %v1355_v7 = vsub.f32 %v3036_v0, %v3041_v4  ;;  %1545 = vst.msk [vmem:[#allocation3 + $0x18] sm:$0xff] %vm689_vm12, %v3041_v4  ;;  %1381 = vperm.xlu2 %2424, %v3041_v4   ;;  %v1398_v4 = vld [vmem:[#allocation4 + $0x10] sm:$0xff] }
 0x364   : > { %v1352_v8 = vsub.f32 %v3038_v2, %v3044_v6  ;;  %1542 = vst.msk [vmem:[#allocation3] sm:$0xff] %vm689_vm12, %v3044_v6  ;;  %1366 = vperm.xlu0 %2423, %v3044_v6  }
 0x369   : > { %v1344_v11 = vpop.xlane.xlu1 %1343 }
 0x36a   : > { %v3059_v12 = vmax.f32 %v3056_v9, %v1344_v11 }
 0x36c   : > { %v1354_v13 = vsub.f32 %v3056_v9, %v3059_v12  ;;  %1544 = vst.msk [vmem:[#allocation3 + $0x10] sm:$0xff] %vm689_vm12, %v3059_v12  ;;  %1376 = vperm.xlu1 %2425, %v3059_v12   ;;  %v1362_v9 = vmul.f32 1.442695, %v1355_v7 }
 0x371   : > { %v1341_v16 = vpop.xlane.xlu1 %1340 }
 0x372   : > { %v3069_v17 = vmax.f32 %v3066_v15, %v1341_v16 }
 0x374   : > { %v1353_v18 = vsub.f32 %v3066_v15, %v3069_v17  ;;  %1543 = vst.msk [vmem:[#allocation3 + $0x8] sm:$0xff] %vm689_vm12, %v3069_v17  ;;  %1371 = vperm.xlu0 %2423, %v3069_v17  }
 0x389   : > { %v1117_v28 = vpop.permute.xlu1 %1116 }
 0x38a   : > { %v1122_v29 = vrot.slane %v1117_v28, 4  ;;  %v1125_v30 = vsel %vm748_vm8, %v1117_v28, %v1124_v26 }
 0x38b   : > { %v1133_v33 = vperm.slane %v1125_v30, %v2899_v14 }
 0x38c   : > { %v1123_v34 = vsel %vm748_vm8, %v1122_v29, %v2895_v1 }
 0x38d   : > { %v1129_v36 = vperm.slane %v1123_v34, %v2899_v14  ;;  %v1159_v37 = vsel %vm748_vm8, %v1158_v31, %v1133_v33  ;;  %v1160_v38 = vrot.slane %v1133_v33, 4 }
 0x38e   : > { %v1165_v39 = vperm.slane %v1159_v37, %v2909_v32 }
 0x38f   : > { %v1147_v40 = vsel %vm748_vm8, %v1146_v35, %v1129_v36  ;;  %v1148_v41 = vrot.slane %v1129_v36, 4  ;;  %v1161_v42 = vsel %vm748_vm8, %v1145_v25, %v1160_v38 }
 0x390   : > { %v1153_v44 = vperm.slane %v1147_v40, %v2909_v32  ;;  %v1169_v45 = vperm.slane %v1161_v42, %v2909_v32  ;;  %v1174_v47 = vrot.slane %v1165_v39, 4 }
 0x391   : > { %v1149_v46 = vsel %vm748_vm8, %v1141_v27, %v1148_v41 }
 0x392   : > { %v1157_v1 = vperm.slane %v1149_v46, %v2909_v32  ;;  %v1176_v50 = vrot.slane %v1169_v45, 4  ;;  %v1170_v51 = vrot.slane %v1153_v44, 4  ;;  %v1175_v61 = vsel %vm748_vm8, 0.0, %v1174_v47 }
 0x394   : > { %v1172_v52 = vrot.slane %v1157_v1, 4  ;;  %v1177_v53 = vsel %vm748_vm8, 0.0, %v1176_v50  ;;  %v1189_v55 = vsel %vm748_vm8, %v1176_v50, %v1165_v39  ;;  %v1171_v16 = vsel %vm748_vm8, 0.0, %v1170_v51 }
 0x395   : > { %v1193_v56 = vperm.slane %v1189_v55, %v2899_v14  ;;  %v1194_v58 = vrot.slane %v1177_v53, 4 }
 0x396   : > { %v1173_v59 = vsel %vm748_vm8, 0.0, %v1172_v52  ;;  %v1178_v62 = vsel %vm748_vm8, %v1172_v52, %v1153_v44 }
 0x397   : > { %v1183_v63 = vrot.slane %v1173_v59, 4  ;;  %v1195_v3 = vsel %vm748_vm8, %v1194_v58, %v1175_v61  ;;  %v1182_v5 = vperm.slane %v1178_v62, %v2899_v14  ;;  %v1214_v11 = vrot.slane %v1193_v56, 4 }
 0x398   : > { %v1199_v19 = vperm.slane %v1195_v3, %v2899_v14  ;;  %v1356_v61 = vmul.f32 1.442695, %v1352_v8 }
 0x399   : > { %v1184_v20 = vsel %vm748_vm8, %v1183_v63, %v1171_v16  ;;  %v1202_v21 = vrot.slane %v1182_v5, 4 }
 0x39a   : > { %v1188_v22 = vperm.slane %v1184_v20, %v2899_v14  ;;  %v1215_v23 = vsel %vm748_vm8, %v1199_v19, %v1214_v11  ;;  %v1212_v24 = vrot.slane %v1199_v19, 4 }
 0x39b   : > { %v1223_v25 = vperm.slane %v1215_v23, %v2909_v32 }
 0x39c   : > { %v1203_v26 = vsel %vm748_vm8, %v1188_v22, %v1202_v21  ;;  %v1200_v27 = vrot.slane %v1188_v22, 4  ;;  %v1213_v28 = vsel %vm748_vm8, %v1212_v24, %v1193_v56 }
 0x39d   : > { %v1211_v29 = vperm.slane %v1203_v26, %v2909_v32  ;;  %v1228_v30 = vrot.slane %v1223_v25, 4  ;;  %v1219_v31 = vperm.slane %v1213_v28, %v2909_v32 }
 0x39e   : > { %v1201_v33 = vsel %vm748_vm8, %v1200_v27, %v1182_v5 }
 0x39f   : > { %v1229_v34 = vsel %vm748_vm8, %v1228_v30, %v1211_v29  ;;  %v1230_v35 = vrot.slane %v1211_v29, 4  ;;  %v1207_v36 = vperm.slane %v1201_v33, %v2909_v32  ;;  %v1224_v37 = vrot.slane %v1219_v31, 4  ;;  %v1396_v33 = vld [vmem:[#allocation4] sm:$0xff] }
 0x3a0   : > { %v1234_v38 = vpack.c.bf16 %v1229_v34, %v1229_v34 }
 0x3a1   : > { %v1225_v39 = vsel %vm748_vm8, %v1224_v37, %v1207_v36  ;;  %v1226_v40 = vrot.slane %v1207_v36, 4  ;;  %v1231_v41 = vsel %vm748_vm8, %v1223_v25, %v1230_v35 }
 0x3a2   : > { %v1500_v42 = vsel %vm1460_vm13, %v1234_v38, 0  ;;  %v1232_v44 = vpack.c.bf16 %v1225_v39, %v1225_v39  ;;  %v1235_v45 = vpack.c.bf16 %v1231_v41, %v1231_v41  ;;  %v1425_v41 = vld [vmem:[#allocation5] sm:$0xff] }
 0x3a3   : > { %1509 = vmatpush.bf16.msrb.mxu1 %v1500_v42  ;;  %v1227_v46 = vsel %vm748_vm8, %v1219_v31, %v1226_v40  ;;  %v1397_v40 = vld [vmem:[#allocation4 + $0x8] sm:$0xff] }
 0x3a4   : > { %v1462_v1 = vsel %vm1460_vm13, %v1232_v44, 0  ;;  %v1519_v47 = vsel %vm1460_vm13, %v1235_v45, 0  ;;  %v1233_v50 = vpack.c.bf16 %v1227_v46, %v1227_v46 }
 0x3a5   : > { %1471 = vmatpush.bf16.msrb.mxu3 %v1462_v1  ;;  %1528 = vmatpush.bf16.msrb.mxu2 %v1519_v47 }
 0x3a6   : > { %v1481_v51 = vsel %vm1460_vm13, %v1233_v50, 0 }
 0x3a7   : > { %1490 = vmatpush.bf16.msra.mxu0 %v1481_v51  ;;  %v1427_v51 = vld [vmem:[#allocation5 + $0x10] sm:$0xff] }
 0x3bd   : > { %v1382_v52 = vpop.permute.xlu2 %1381 }
 0x3be   : > { %v1387_v53 = vsub.f32 %v3000_v48, %v1382_v52 }
 0x3c0   : > { %v1394_v55 = vmul.f32 1.442695, %v1387_v53 }
 0x3c2   : > { %2440 = vpow2.f32 %v1394_v55 }
 0x3c3   : > { %2442 = vpow2.f32 %v1356_v61 }
 0x3c8   : > { %v2441_v56 = vpop.eup %2440 }
 0x3c9   : > { %v1456_v58 = vpack.c.bf16 %v2441_v56, %v2441_v56  ;;  %v1413_v59 = vsel %vm875_vm10, %v2441_v56, 0.0  ;;  %v2443_v11 = vpop.eup %2442 }
 0x3ca   : > { %1414 = vadd.xlane.f32.xlu2 %v1413_v59  ;;  %v1400_v34 = vmul.f32 %v2443_v11, %v1396_v33 }
 0x3cb   : > { %2231 = vmatmul.msk.bf16.vlgmr.msrb.gmra.mxu2 %vm875_vm10, %v1456_v58 }
 0x3d6   : > { %v1367_v62 = vpop.permute.xlu0 %1366 }
 0x3d7   : > { %v1384_v63 = vsub.f32 %v3004_v49, %v1367_v62 }
 0x3d9   : > { %v1388_v3 = vmul.f32 1.442695, %v1384_v63  ;;  %v1426_v63 = vld [vmem:[#allocation5 + $0x8] sm:$0xff] }
 0x3db   : > { %2444 = vpow2.f32 %v1388_v3 }
 0x3de   : > { %v1377_v48 = vpop.permute.xlu1 %1376 }
 0x3df   : > { %v1386_v5 = vsub.f32 %v3012_v54, %v1377_v48  ;;  %v1360_v54 = vmul.f32 1.442695, %v1354_v13  ;;  %v1399_v13 = vld [vmem:[#allocation4 + $0x18] sm:$0xff] }
 0x3e1   : > { %v2445_v16 = vpop.eup %2444  ;;  %v1392_v19 = vmul.f32 1.442695, %v1386_v5 }
 0x3e2   : > { %1431 = vperm.xlu2 %2424, %v2443_v11   ;;  %v1404_v20 = vsel %vm875_vm10, %v2445_v16, 0.0  ;;  %v1453_v21 = vpack.c.bf16 %v2445_v16, %v2445_v16 }
 0x3e3   : > { %2446 = vpow2.f32 %v1392_v19  ;;  %1405 = vadd.xlane.f32.xlu0 %v1404_v20 }
 0x3e4   : > { %2228 = vmatmul.msk.bf16.vlgmr.msrb.gmra.mxu3 %vm875_vm10, %v1453_v21 }
 0x3e6   : > { %v1372_v2 = vpop.permute.xlu0 %1371 }
 0x3e7   : > { %v1385_v49 = vsub.f32 %v3020_v60, %v1372_v2  ;;  %v1358_v60 = vmul.f32 1.442695, %v1353_v18  ;;  %v1428_v2 = vld [vmem:[#allocation5 + $0x18] sm:$0xff] }
 0x3e9   : > { %v2447_v6 = vpop.eup %2446  ;;  %v1390_v8 = vmul.f32 1.442695, %v1385_v49 }
 0x3ea   : > { %v1410_v22 = vsel %vm875_vm10, %v2447_v6, 0.0  ;;  %v1455_v23 = vpack.c.bf16 %v2447_v6, %v2447_v6 }
 0x3eb   : > { %2448 = vpow2.f32 %v1390_v8  ;;  %1411 = vadd.xlane.f32.xlu1 %v1410_v22 }
 0x3ec   : > { %2230 = vmatmul.msk.bf16.vlgmr.msrb.gmra.mxu1 %vm875_vm10, %v1455_v23  ;;  %2450 = vpow2.f32 %v1360_v54 }
 0x3ed   : > { %2452 = vpow2.f32 %v1358_v60 }
 0x3ee   : > { %2454 = vpow2.f32 %v1362_v9 }
 0x3f1   : > { %v2449_v24 = vpop.eup %2448 }
 0x3f2   : > { %v1454_v25 = vpack.c.bf16 %v2449_v24, %v2449_v24  ;;  %v1407_v26 = vsel %vm875_vm10, %v2449_v24, 0.0  ;;  %v2451_v27 = vpop.eup %2450 }
 0x3f3   : > { %1408 = vadd.xlane.f32.xlu1 %v1407_v26  ;;  %v2453_v28 = vpop.eup %2452  ;;  %v1402_v7 = vmul.f32 %v2451_v27, %v1398_v4 }
 0x3f4   : > { %2229 = vmatmul.msk.bf16.vlgmr.msra.gmra.mxu0 %vm875_vm10, %v1454_v25  ;;  %v2455_v12 = vpop.eup %2454  ;;  %v1401_v44 = vmul.f32 %v2453_v28, %v1397_v40 }
 0x3f5   : > { %v1403_v29 = vmul.f32 %v2455_v12, %v1399_v13 }
 0x3f7   : > { %1441 = vperm.xlu0 %2423, %v2451_v27  }
 0x3ff   : > { %1436 = vperm.xlu0 %2423, %v2453_v28  }
 0x40c   : > { %1446 = vperm.xlu1 %2425, %v2455_v12  }
 0x43d   : > { %v1415_v30 = vpop.xlane.xlu2 %1414 }
 0x43e   : > { %v1419_v31 = vadd.f32 %v1415_v30, %v1403_v29 }
 0x440   : > { %1424 = vst.msk [vmem:[#allocation4 + $0x18] sm:$0xff] %vm689_vm12, %v1419_v31 }
 0x445   : > { %v1432_v42 = vpop.permute.xlu2 %1431 }
 0x446   : > { %v1449_v45 = vmul.f32 %v1432_v42, %v1425_v41 }
 0x447   : > { %v1558_v15 = vld [vmem:[#allocation4 + $0x18] sm:$0xff] }
 0x448   : > { %2456 = vrcp.f32 %v1558_v15 }
 0x44e   : > { %v2457_v17 = vpop.eup %2456  ;;  %v1530_v18 = vpop.f32.mrf.mxu2 }
 0x44f   : > { %1580 = vperm.xlu1 %2425, %v2457_v17  }
 0x456   : > { %v1406_v35 = vpop.xlane.xlu0 %1405  ;;  %v1532_v36 = vpop.f32.mrf.mxu2 }
 0x457   : > { %v1416_v0 = vadd.f32 %v1406_v35, %v1400_v34 }
 0x459   : > { %1421 = vst.msk [vmem:[#allocation4] sm:$0xff] %vm689_vm12, %v1416_v0 }
 0x45e   : > { %v1412_v37 = vpop.xlane.xlu1 %1411 }
 0x45f   : > { %v1418_v38 = vadd.f32 %v1412_v37, %v1402_v7 }
 0x460   : > { %v1555_v39 = vld [vmem:[#allocation4] sm:$0xff] }
 0x461   : > { %1423 = vst.msk [vmem:[#allocation4 + $0x10] sm:$0xff] %vm689_vm12, %v1418_v38  ;;  %2458 = vrcp.f32 %v1555_v39 }
 0x466   : > { %v1409_v46 = vpop.xlane.xlu1 %1408 }
 0x467   : > { %v2459_v1 = vpop.eup %2458  ;;  %v1417_v47 = vadd.f32 %v1409_v46, %v1401_v44  ;;  %v1473_v50 = vpop.f32.mrf.mxu3 }
 0x468   : > { %v1534_v52 = vadd.f32 %v1473_v50, %v1449_v45  ;;  %1565 = vperm.xlu2 %2424, %v2459_v1   ;;  %v1557_v53 = vld [vmem:[#allocation4 + $0x10] sm:$0xff] }
 0x469   : > { %1422 = vst.msk [vmem:[#allocation4 + $0x8] sm:$0xff] %vm689_vm12, %v1417_v47  ;;  %v1442_v55 = vpop.permute.xlu0 %1441  ;;  %v1511_v56 = vpop.f32.mrf.mxu1  ;;  %2460 = vrcp.f32 %v1557_v53 }
 0x46a   : > { %1538 = vst.msk [vmem:[#allocation5] sm:$0xff] %vm875_vm10, %v1534_v52  ;;  %v1451_v58 = vmul.f32 %v1442_v55, %v1427_v51 }
 0x46c   : > { %v1536_v59 = vadd.f32 %v1511_v56, %v1451_v58 }
 0x46e   : > { %1540 = vst.msk [vmem:[#allocation5 + $0x10] sm:$0xff] %vm875_vm10, %v1536_v59 }
 0x46f   : > { %v2461_v61 = vpop.eup %2460  ;;  %v1475_v62 = vpop.f32.mrf.mxu3 }
 0x470   : > { %1575 = vperm.xlu0 %2423, %v2461_v61   ;;  %v1556_v3 = vld [vmem:[#allocation4 + $0x8] sm:$0xff] }
 0x471   : > { %v1437_v48 = vpop.permute.xlu0 %1436  ;;  %v1492_v5 = vpop.f32.mrf.mxu0  ;;  %2462 = vrcp.f32 %v1556_v3  ;;  %v1551_v23 = vld [vmem:[#allocation5] sm:$0xff] }
 0x472   : > { %v1450_v11 = vmul.f32 %v1437_v48, %v1426_v63  ;;  %v1513_v16 = vpop.f32.mrf.mxu1 }
 0x474   : > { %v1535_v19 = vadd.f32 %v1492_v5, %v1450_v11 }
 0x475   : > { %v1553_v54 = vld [vmem:[#allocation5 + $0x10] sm:$0xff] }
 0x476   : > { %1539 = vst.msk [vmem:[#allocation5 + $0x8] sm:$0xff] %vm875_vm10, %v1535_v19 }
 0x477   : > { %v2463_v20 = vpop.eup %2462 }
 0x478   : > { %1570 = vperm.xlu0 %2423, %v2463_v20  }
 0x479   : > { %v1494_v21 = vpop.f32.mrf.mxu0 }
 0x47d   : > { %v1552_v15 = vld [vmem:[#allocation5 + $0x8] sm:$0xff] }
 0x47e   : > { %v1447_v49 = vpop.permute.xlu1 %1446 }
 0x47f   : > { %v1452_v6 = vmul.f32 %v1447_v49, %v1428_v2 }
 0x481   : > { %v1537_v8 = vadd.f32 %v1530_v18, %v1452_v6 }
 0x483   : > { %1541 = vst.msk [vmem:[#allocation5 + $0x18] sm:$0xff] %vm875_vm10, %v1537_v8 }
 0x48a   : > { %v1554_v28 = vld [vmem:[#allocation5 + $0x18] sm:$0xff] }
 0x4c1   : > { %v1581_v60 = vpop.permute.xlu1 %1580 }
 0x4c2   : > { %v1566_v22 = vpop.permute.xlu2 %1565  ;;  %v1586_v12 = vmul.f32 %v1581_v60, %v1554_v28 }
 0x4c3   : > { %v1583_v25 = vmul.f32 %v1566_v22, %v1551_v23 }
 0x4c4   : > { %v1600_v17 = vrot.slane %v1586_v12, 4 }
 0x4c5   : > { %v1590_v9 = vrot.slane %v1583_v25, 4 }
 0x4e2   : > { %v1576_v24 = vpop.permute.xlu0 %1575 }
 0x4e3   : > { %v1585_v26 = vmul.f32 %v1576_v24, %v1553_v54 }
 0x4e5   : > { %v1587_v27 = vrot.slane %v1585_v26, 4  ;;  %v1591_v29 = vsel %vm748_vm8, %v1585_v26, %v1590_v9 }
 0x4e6   : > { %v1599_v33 = vperm.slane %v1591_v29, %v2899_v14 }
 0x4e7   : > { %v1589_v13 = vsel %vm748_vm8, %v1587_v27, %v1583_v25 }
 0x4e8   : > { %v1595_v30 = vperm.slane %v1589_v13, %v2899_v14  ;;  %v1626_v7 = vrot.slane %v1599_v33, 4 }
 0x4ea   : > { %v1571_v31 = vpop.permute.xlu0 %1570  ;;  %v1614_v36 = vrot.slane %v1595_v30, 4 }
 0x4eb   : > { %v1584_v18 = vmul.f32 %v1571_v31, %v1552_v15  ;;  %v660_v31 = vsel %vm621_vm0, %v2888_v57, 0.0  ;;  %v2295_v15 = vld [vmem:[#allocation6 + $0x8] sm:$0xff] }
 0x4ec   : > { %1747 = vmatpush.bf16.msra.mxu3 %v2295_v15 }
 0x4ed   : > { %v1601_v34 = vsel %vm748_vm8, %v1600_v17, %v1584_v18  ;;  %v1602_v35 = vrot.slane %v1584_v18, 4 }
 0x4ee   : > { %v1607_v0 = vperm.slane %v1601_v34, %v2899_v14 }
 0x4ef   : > { %v1603_v4 = vsel %vm748_vm8, %v1586_v12, %v1602_v35 }
 0x4f0   : > { %v1611_v37 = vperm.slane %v1603_v4, %v2899_v14  ;;  %v1612_v38 = vrot.slane %v1607_v0, 4  ;;  %v1615_v39 = vsel %vm748_vm8, %v1607_v0, %v1614_v36  ;;  %v2430_v4 = vld [vmem:[%s3346_s8] ss:$0 sm:$0xff] }
 0x4f1   : > { %v1623_v40 = vperm.slane %v1615_v39, %v2909_v32 }
 0x4f2   : > { %v1613_v41 = vsel %vm748_vm8, %v1612_v38, %v1595_v30  ;;  %v1624_v42 = vrot.slane %v1611_v37, 4  ;;  %v1627_v44 = vsel %vm748_vm8, %v1611_v37, %v1626_v7  ;;  %v3202_v37 = vld [vmem:[%s2845_s25] sm:$0xff] }
 0x4f3   : > { %v1619_v45 = vperm.slane %v1613_v41, %v2909_v32  ;;  %v1635_v46 = vperm.slane %v1627_v44, %v2909_v32  ;;  %v1638_v1 = vrot.slane %v1623_v40, 4 }
 0x4f4   : > { %v1625_v47 = vsel %vm748_vm8, %v1624_v42, %v1599_v33 }
 0x4f5   : > { %v1631_v50 = vperm.slane %v1625_v47, %v2909_v32  ;;  %v1636_v51 = vrot.slane %v1619_v45, 4  ;;  %v1639_v52 = vsel %vm748_vm8, 0.0, %v1638_v1  ;;  %v1642_v53 = vrot.slane %v1635_v46, 4 }
 0x4f6   : > { %v1644_v55 = vsel %vm748_vm8, %v1638_v1, %v1619_v45  ;;  %v1649_v56 = vrot.slane %v1639_v52, 4 }
 0x4f7   : > { %v1643_v58 = vsel %vm748_vm8, 0.0, %v1642_v53  ;;  %v1637_v59 = vsel %vm748_vm8, 0.0, %v1636_v51  ;;  %v1640_v61 = vrot.slane %v1631_v50, 4  ;;  %v1648_v62 = vperm.slane %v1644_v55, %v2899_v14 }
 0x4f8   : > { %v1660_v63 = vrot.slane %v1643_v58, 4  ;;  %v1650_v3 = vsel %vm748_vm8, %v1649_v56, %v1637_v59  ;;  %v1655_v48 = vsel %vm748_vm8, %v1642_v53, %v1631_v50  ;;  %v2672_v50 = vmov 31.0  }
 0x4f9   : > { %v1641_v5 = vsel %vm748_vm8, 0.0, %v1640_v61  ;;  %v1654_v11 = vperm.slane %v1650_v3, %v2899_v14  ;;  %v1659_v16 = vperm.slane %v1655_v48, %v2899_v14  ;;  %v1668_v19 = vrot.slane %v1648_v62, 4 }
 0x4fa   : > { %v1661_v20 = vsel %vm748_vm8, %v1660_v63, %v1641_v5  ;;  %2464 = vrcp.f32 %v2672_v50 }
 0x4fb   : > { %v1665_v21 = vperm.slane %v1661_v20, %v2899_v14  ;;  %v1669_v2 = vsel %vm748_vm8, %v1654_v11, %v1668_v19  ;;  %v1680_v49 = vrot.slane %v1659_v16, 4  ;;  %v1666_v6 = vrot.slane %v1654_v11, 4 }
 0x4fc   : > { %v1677_v8 = vperm.slane %v1669_v2, %v2909_v32 }
 0x4fd   : > { %v1681_v22 = vsel %vm748_vm8, %v1665_v21, %v1680_v49  ;;  %v1667_v23 = vsel %vm748_vm8, %v1666_v6, %v1648_v62  ;;  %v1678_v54 = vrot.slane %v1665_v21, 4 }
 0x4fe   : > { %v1689_v24 = vperm.slane %v1681_v22, %v2909_v32  ;;  %v1696_v25 = vrot.slane %v1677_v8, 4  ;;  %v1673_v26 = vperm.slane %v1667_v23, %v2909_v32 }
 0x4ff   : > { %v1679_v60 = vsel %vm748_vm8, %v1678_v54, %v1659_v16 }
 0x500   : > { %v1697_v14 = vsel %vm748_vm8, %v1689_v24, %v1696_v25  ;;  %v1694_v27 = vrot.slane %v1689_v24, 4  ;;  %v1685_v28 = vperm.slane %v1679_v60, %v2909_v32  ;;  %v1692_v9 = vrot.slane %v1673_v26, 4  ;;  %v2294_v32 = vld [vmem:[#allocation6] sm:$0xff]  ;;  %v2465_v51 = vpop.eup %2464  ;;  %v2297_v60 = vld [vmem:[#allocation9 + $0x8] sm:$0xff] }
 0x501   : > { %1707 = vrot.lane.b32.xlu0 %v1697_v14, %s2669_s17  ;;  %1748 = vmatpush.bf16.msra.mxu3 %v2294_v32  ;;  %v670_v52 = vmul.f32 31.0, %v2465_v51  ;;  %vm674_vm1 = vweird.f32 %v2465_v51  ;;  %v2296_v14 = vld [vmem:[#allocation9] sm:$0xff] }
 0x502   : > { %v1695_v12 = vsel %vm748_vm8, %v1694_v27, %v1677_v8  ;;  %v1690_v13 = vrot.slane %v1685_v28, 4  ;;  %v1693_v29 = vsel %vm748_vm8, %v1685_v28, %v1692_v9  ;;  %1824 = vmatpush.bf16.msrb.mxu0 %v2297_v60 }
 0x503   : > { %1703 = vrot.lane.b32.xlu1 %v1695_v12, %s2670_s18  ;;  %1699 = vrot.lane.b32.xlu2 %v1693_v29, %s2671_s29  ;;  %v671_v56 = vsub.f32 1.0, %v670_v52  ;;  %s3261_s18 = sand.u32 1, %s2638_s19  }
 0x504   : > { %v1691_v30 = vsel %vm748_vm8, %v1690_v13, %v1673_v26  ;;  %s3362_s29 = sshll.u32 %s3261_s18, 3  ;;  %s2003_s23 = scalar_lea.sflag [#allocation8], %s3261_s18 }
 0x505   : > { %v672_v61 = vmul.f32 %v2465_v51, %v671_v56  ;;  %s3269_s27 = scalar_lea.vmem [#allocation11], %s3362_s29 }
 0x506   : > { %1825 = vmatpush.bf16.msrb.mxu0 %v2296_v14  ;;  %s2021_s20 = sshll.u32 %s3269_s27, 4  ;;  %s2022_s20 = int_to_ptr.vmem [resolvable:$true] %s2021_s20 }
 0x507   : > { %v673_v3 = vadd.f32 %v2465_v51, %v672_v61  ;;  %v2305_v61 = vld [vmem:[%s3351_s13 + $0x38] sm:$0xff] }
 0x508   : > { %1905 = vmatpush.bf16.msra.mxu1 %v2305_v61 }
 0x509   : > { %v3218_v11 = vsel %vm674_vm1, %v2465_v51, %v673_v3  ;;  %v2301_v3 = vld [vmem:[%s3351_s13 + $0x18] sm:$0xff] }
 0x52b   : > { %661 = vadd.xlane.f32.xlu0 %v660_v31 }
 0x55d   : > { %v1700_v17 = vpop.permute.xlu2 %1699 }
 0x55e   : > { %v1711_v18 = vsel %vm875_vm10, %v1691_v30, %v1700_v17 }
 0x573   : > { %v1708_v34 = vpop.permute.xlu0 %1707 }
 0x575   : > { %v1704_v33 = vpop.permute.xlu1 %1703 }
 0x576   : > { %v1713_v35 = vsel %vm1712_vm14, %v1711_v18, %v1704_v33 }
 0x577   : > { %v1715_v36 = vsel %vm1714_vm15, %v1713_v35, %v1708_v34  ;;  %v2431_v35 = vld [vmem:[%s3347_s9] ss:$0 sm:$0xff] }
 0x578   : > { %v1716_v0 = vpack.c.bf16 %v1715_v36, %v1715_v36 }
 0x57a   : > { %2240 = vmatmul.msk.bf16.vlgmr.msra.gmra.mxu3 %vm621_vm0, %v1716_v0 }
 0x59e   : > { %v662_v41 = vpop.xlane.xlu0 %661 }
 0x59f   : > { %v663_v44 = vmul.f32 %v662_v41, %v2849_v10 }
 0x5a1   : > { %v664_v45 = vsub.f32 %v2888_v57, %v663_v44 }
 0x5a3   : > { %v665_v1 = vmul.f32 %v664_v45, %v664_v45 }
 0x5a5   : > { %v666_v47 = vsel %vm621_vm0, %v665_v1, 0.0 }
 0x5fd   : > { %v1750_v7 = vpop.f32.mrf.mxu3 }
 0x5fe   : > { %v3204_v38 = vadd.f32 %v2430_v4, %v1750_v7  ;;  %v2432_v7 = vld [vmem:[%s3348_s10] ss:$0 sm:$0xff] }
 0x600   : > { %v1754_v39 = vadd.f32 %v3204_v38, %v3202_v37  ;;  %v1920_v46 = vsel %vm621_vm0, %v3204_v38, 0.0 }
 0x602   : > { %v1757_v40 = vsel %vm621_vm0, %v1754_v39, 0.0 }
 0x603   : > { %1758 = vadd.xlane.f32.xlu2 %v1757_v40 }
 0x605   : > { %v1752_v42 = vpop.f32.mrf.mxu3 }
 0x60b   : > { %1921 = vadd.xlane.f32.xlu2 %v1920_v46 }
 0x613   : > { %667 = vadd.xlane.f32.xlu2 %v666_v47 }
 0x676   : > { %v1759_v53 = vpop.xlane.xlu2 %1758 }
 0x677   : > { %v1767_v55 = vmul.f32 %v1759_v53, %v2849_v10 }
 0x679   : > { %v1768_v58 = vsub.f32 %v1754_v39, %v1767_v55 }
 0x67b   : > { %v1769_v59 = vmul.f32 %v1768_v58, %v1768_v58 }
 0x67d   : > { %v1770_v57 = vsel %vm621_vm0, %v1769_v59, 0.0 }
 0x67e   : > { %1771 = vadd.xlane.f32.xlu1 %v1770_v57  ;;  %v1922_v62 = vpop.xlane.xlu2 %1921  ;;  %v2304_v57 = vld [vmem:[%s3351_s13 + $0x30] sm:$0xff] }
 0x67f   : > { %v1923_v63 = vmul.f32 %v1922_v62, %v2849_v10  ;;  %1906 = vmatpush.bf16.msra.mxu1 %v2304_v57  ;;  %v2303_v62 = vld [vmem:[%s3351_s13 + $0x28] sm:$0xff] }
 0x681   : > { %v1924_v48 = vsub.f32 %v3204_v38, %v1923_v63  ;;  %v2302_v63 = vld [vmem:[%s3351_s13 + $0x20] sm:$0xff] }
 0x683   : > { %v1925_v5 = vmul.f32 %v1924_v48, %v1924_v48  ;;  %1907 = vmatpush.bf16.msra.mxu1 %v2303_v62  ;;  %v2300_v48 = vld [vmem:[%s3351_s13 + $0x10] sm:$0xff] }
 0x685   : > { %v1926_v16 = vsel %vm621_vm0, %v1925_v5, 0.0  ;;  %v2299_v5 = vld [vmem:[%s3351_s13 + $0x8] sm:$0xff] }
 0x686   : > { %1927 = vadd.xlane.f32.xlu0 %v1926_v16  ;;  %v668_v19 = vpop.xlane.xlu2 %667  ;;  %v2298_v16 = vld [vmem:[%s3351_s13] sm:$0xff] }
 0x687   : > { %v676_v20 = vmul.f32 %v3218_v11, %v668_v19  ;;  %1908 = vmatpush.bf16.msra.mxu1 %v2302_v63 }
 0x689   : > { %2466 = vrsqrt.f32 %v676_v20  ;;  %vm684_vm2 = vcmp.eq.f32.partialorder %v676_v20, inf  ;;  %v687_v54 = vand.u32 2147483648, %v676_v20  ;;  %vm686_vm3 = vcmp.eq.f32.partialorder %v676_v20, 0.0 }
 0x68b   : > { %1909 = vmatpush.bf16.msra.mxu1 %v2301_v3 }
 0x68f   : > { %v2467_v21 = vpop.eup %2466  ;;  %1910 = vmatpush.bf16.msra.mxu1 %v2300_v48 }
 0x690   : > { %v678_v2 = vmul.f32 %v2467_v21, %v676_v20 }
 0x692   : > { %v679_v49 = vmul.f32 %v2467_v21, %v678_v2 }
 0x693   : > { %1911 = vmatpush.bf16.msra.mxu1 %v2299_v5 }
 0x694   : > { %v680_v6 = vmul.f32 0.5, %v679_v49  ;;  %v2433_v49 = vld [vmem:[%s3350_s12] ss:$0 sm:$0xff] }
 0x696   : > { %v681_v8 = vsub.f32 1.5, %v680_v6 }
 0x697   : > { %1912 = vmatpush.bf16.msra.mxu1 %v2298_v16 }
 0x698   : > { %v682_v22 = vmul.f32 %v2467_v21, %v681_v8 }
 0x69a   : > { %v683_v23 = vmul.f32 %v682_v22, %v676_v20 }
 0x69c   : > { %v685_v24 = vsel %vm684_vm2, %v676_v20, %v683_v23 }
 0x69d   : > { %v688_v25 = vsel %vm686_vm3, %v687_v54, %v685_v24 }
 0x69e   : > { %v690_v26 = vsel %vm689_vm12, %v688_v25, 0.0 }
 0x69f   : > { %691 = vadd.xlane.f32.xlu2 %v690_v26 }
 0x6f1   : > { %v1772_v27 = vpop.xlane.xlu1 %1771 }
 0x6f2   : > { %v1773_v28 = vmul.f32 %v1772_v27, %v2849_v10 }
 0x6f4   : > { %v1774_v9 = vadd.f32 1e-05, %v1773_v28 }
 0x6f6   : > { %2468 = vrsqrt.f32 %v1774_v9  ;;  %vm1781_vm5 = vweird.f32 %v1774_v9 }
 0x6f9   : > { %v1928_v12 = vpop.xlane.xlu0 %1927 }
 0x6fa   : > { %v1936_v13 = vmul.f32 %v1928_v12, %v3218_v11 }
 0x6fc   : > { %v2469_v29 = vpop.eup %2468  ;;  %2470 = vrsqrt.f32 %v1936_v13  ;;  %vm1944_vm7 = vcmp.eq.f32.partialorder %v1936_v13, inf  ;;  %v1947_v46 = vand.u32 2147483648, %v1936_v13  ;;  %vm1946_vm8 = vcmp.eq.f32.partialorder %v1936_v13, 0.0 }
 0x6fd   : > { %v1776_v30 = vmul.f32 %v2469_v29, %v1774_v9  ;;  %vm1782_vm4 = vweird.f32 %v2469_v29 }
 0x6fe   : > { %vm1783_vm6 = vmor %vm1781_vm5, %vm1782_vm4 }
 0x6ff   : > { %v1777_v31 = vmul.f32 %v2469_v29, %v1776_v30 }
 0x701   : > { %v1778_v15 = vmul.f32 0.5, %v1777_v31 }
 0x702   : > { %v2471_v32 = vpop.eup %2470 }
 0x703   : > { %v1779_v17 = vsub.f32 1.5, %v1778_v15  ;;  %v1938_v18 = vmul.f32 %v2471_v32, %v1936_v13 }
 0x705   : > { %v1780_v33 = vmul.f32 %v2469_v29, %v1779_v17  ;;  %v1939_v34 = vmul.f32 %v2471_v32, %v1938_v18 }
 0x707   : > { %v1784_v36 = vsel %vm1783_vm6, %v2469_v29, %v1780_v33  ;;  %v1940_v0 = vmul.f32 0.5, %v1939_v34 }
 0x708   : > { %v1785_v4 = vmul.f32 %v1784_v36, %v1768_v58 }
 0x709   : > { %v1941_v39 = vsub.f32 1.5, %v1940_v0 }
 0x70a   : > { %v1789_v40 = vmul.f32 %v2431_v35, %v1785_v4 }
 0x70b   : > { %v1942_v41 = vmul.f32 %v2471_v32, %v1941_v39 }
 0x70c   : > { %v1793_v42 = vadd.f32 %v2432_v7, %v1789_v40 }
 0x70d   : > { %v1943_v44 = vmul.f32 %v1942_v41, %v1936_v13 }
 0x70e   : > { %v1794_v45 = vpack.c.bf16 %v1793_v42, %v1793_v42 }
 0x70f   : > { %v1945_v1 = vsel %vm1944_vm7, %v1936_v13, %v1943_v44 }
 0x710   : > { %2249 = vmatmul.msk.bf16.vlgmr.msrb.gmra.mxu0 %vm621_vm0, %v1794_v45  ;;  %v1948_v47 = vsel %vm1946_vm8, %v1947_v46, %v1945_v1 }
 0x711   : > { %v1950_v50 = vsel %vm689_vm12, %v1948_v47, 0.0 }
 0x712   : > { %v692_v51 = vpop.xlane.xlu2 %691  ;;  %1951 = vadd.xlane.f32.xlu0 %v1950_v50 }
 0x713   : > { %v693_v52 = vrot.slane %v692_v51, 4 }
 0x715   : > { %v694_v53 = vadd.f32 %v693_v52, %v692_v51 }
 0x717   : > { %v695_v55 = vrot.slane %v694_v53, 2 }
 0x719   : > { %v696_v56 = vadd.f32 %v695_v55, %v694_v53 }
 0x71b   : > { %v697_v58 = vrot.slane %v696_v56, 1 }
 0x71d   : > { %v698_v59 = vadd.f32 %v697_v58, %v696_v56 }
 0x71f   : > { %2306 = vpush %v698_v59 }
 0x785   : > { %v1952_v19 = vpop.xlane.xlu0 %1951 }
 0x786   : > { %v1953_v20 = vrot.slane %v1952_v19, 4 }
 0x788   : > { %v1954_v21 = vadd.f32 %v1953_v20, %v1952_v19 }
 0x78a   : > { %v1955_v2 = vrot.slane %v1954_v21, 2 }
 0x78c   : > { %v1956_v6 = vadd.f32 %v1955_v2, %v1954_v21 }
 0x78d   : > { %v1827_v8 = vpop.f32.mrf.mxu0 }
 0x78e   : > { %v1828_v22 = vadd.f32 %v2433_v49, %v1827_v8  ;;  %v1957_v23 = vrot.slane %v1956_v6, 1 }
 0x790   : > { %v1832_v54 = vmul.f32 0.044715, %v1828_v22  ;;  %v1958_v24 = vadd.f32 %v1957_v23, %v1956_v6  ;;  %v1831_v9 = vmul.f32 0.5, %v1828_v22 }
 0x792   : > { %v1833_v25 = vmul.f32 %v1832_v54, %v1828_v22  ;;  %2308 = vpush %v1958_v24 }
 0x794   : > { %v1834_v26 = vmul.f32 %v1833_v25, %v1828_v22 }
 0x795   : > { %v1829_v60 = vpop.f32.mrf.mxu0 }
 0x796   : > { %v1835_v14 = vadd.f32 %v1834_v26, %v1828_v22 }
 0x798   : > { %v1836_v27 = vmul.f32 0.7978845, %v1835_v14 }
 0x79a   : > { %2472 = vtanh.f32 %v1836_v27 }
 0x7a0   : > { %v2473_v28 = vpop.eup %2472 }
 0x7a1   : > { %v1838_v12 = vadd.f32 1.0, %v2473_v28 }
 0x7a3   : > { %v1839_v13 = vmul.f32 %v1838_v12, %v1831_v9 }
 0x7a5   : > { %v1840_v29 = vpack.c.bf16 %v1839_v13, %v1839_v13 }
 0x7a7   : > { %1913 = vmatmul.bf16.vlgmr.msra.gmra.mxu1 %v1840_v29 }
 0x824   : > { %v1914_v30 = vpop.f32.mrf.mxu1 }
 0x825   : > { %v1915_v31 = vadd.f32 %v1914_v30, %v3204_v38 }
 0x827   : > { %v2000_v15 = vadd.f32 %v1915_v31, %v3202_v37  ;;  %v1964_v32 = vsel %vm621_vm0, %v1915_v31, 0.0 }
 0x828   : > { %1965 = vadd.xlane.f32.xlu1 %v1964_v32 }
 0x829   : > { %2001 = vst.msk [vmem:[%s3269_s27] sm:$0xff] %vm621_vm0, %v2000_v15 }
 0x82c   : > { %v1916_v17 = vpop.f32.mrf.mxu1 }
 0x89b   : > { %v1966_v18 = vpop.xlane.xlu1 %1965 }
 0x89c   : > { %v1967_v33 = vmul.f32 %v1966_v18, %v2849_v10 }
 0x89e   : > { %v1968_v34 = vsub.f32 %v1915_v31, %v1967_v33 }
 0x8a0   : > { %v1969_v35 = vmul.f32 %v1968_v34, %v1968_v34 }
 0x8a2   : > { %v1970_v36 = vsel %vm621_vm0, %v1969_v35, 0.0 }
 0x8a3   : > { %1971 = vadd.xlane.f32.xlu1 %v1970_v36 }
 0x916   : > { %v1972_v38 = vpop.xlane.xlu1 %1971 }
 0x917   : > { %v1973_v37 = vmul.f32 %v1972_v38, %v3218_v11 }
 0x919   : > { %2474 = vrsqrt.f32 %v1973_v37  ;;  %vm1981_vm9 = vcmp.eq.f32.partialorder %v1973_v37, inf  ;;  %v1984_v42 = vand.u32 2147483648, %v1973_v37  ;;  %vm1983_vm0 = vcmp.eq.f32.partialorder %v1973_v37, 0.0 }
 0x91f   : > { %v2475_v0 = vpop.eup %2474 }
 0x920   : > { %v1975_v4 = vmul.f32 %v2475_v0, %v1973_v37 }
 0x922   : > { %v1976_v7 = vmul.f32 %v2475_v0, %v1975_v4 }
 0x924   : > { %v1977_v39 = vmul.f32 0.5, %v1976_v7 }
 0x926   : > { %v1978_v40 = vsub.f32 1.5, %v1977_v39 }
 0x928   : > { %v1979_v41 = vmul.f32 %v2475_v0, %v1978_v40 }
 0x92a   : > { %v1980_v10 = vmul.f32 %v1979_v41, %v1973_v37 }
 0x92c   : > { %v1982_v44 = vsel %vm1981_vm9, %v1973_v37, %v1980_v10 }
 0x92d   : > { %v1985_v45 = vsel %vm1983_vm0, %v1984_v42, %v1982_v44 }
 0x92e   : > { %v1986_v11 = vsel %vm689_vm12, %v1985_v45, 0.0 }
 0x92f   : > { %1987 = vadd.xlane.f32.xlu1 %v1986_v11 }
 0x930   : > { %2563 = shalt.err (!%p2560_p9)
}
 0x931   : > { %2320 = dma.vmem_to_hbm [thread:$0]  (%p2793_p4), %s2022_s20, 128, %s2024_s22, %s2003_s23   ;;  %vm1919_vm10 = vcmp.eq.s32.totalorder %v2995_v43, 1  ;;  %vm659_vm11 = vcmp.eq.s32.totalorder %v2995_v43, 0  ;;  %vm1963_vm12 = vcmp.eq.s32.totalorder %v2995_v43, 2 }
 0x932   : > { %s2307_s29 = spop %2306  ;;  %s3381_s27 = sld [smem:[#allocation28_spill]] }
 0x933   : > { %s2309_s1 = spop %2308  ;;  %v700_v56 = vstv %s2307_s29  ;;  %s3382_s26 = sshll.u32 %s3261_s18, 3 }
 0x934   : > { %v1960_v55 = vstv %s2309_s1  ;;  %s592_s15 = scalar_lea.vmem [#allocation12], %s3382_s26  ;;  %v701_v59 = vsel %vm659_vm11, %v700_v56, 0.0  ;;  %s2008_s21 = scalar_lea.sflag [#allocation13], %s3261_s18 }
 0x935   : > { %v1961_v58 = vsel %vm1919_vm10, %v1960_v55, 0.0  ;;  %s2036_s20 = sshll.u32 %s592_s15, 4  ;;  %s2037_s20 = int_to_ptr.vmem [resolvable:$true] %s2036_s20 }
 0x936   : > { %v1962_v61 = vadd.f32 %v1961_v58, %v701_v59 }
 0x938   : > { %s2034_s25 = scalar_lea.hbm %s3381_s27, %s2284_s24  ;;  %s2584_s29 = scalar_lea.hbm %s3381_s27, 16 }
 0x939   : > { %s2038_s23 = sshll.u32 %s2034_s25, 4  ;;  %s2039_s23 = int_to_ptr.hbm [resolvable:$true] %s2038_s23 }
 0x93a   : > { %s2578_s30 = sshra.s32 %s2039_s23, 4  ;;  %s2579_s30 = int_to_ptr.hbm [resolvable:$true] %s2578_s30 }
 0x93b   : > { %s2580_s24 = scalar_lea.hbm %s2579_s30, 8  ;;  %p2585_p13 = scmp.lt.s32.totalorder %s2579_s30, %s3381_s27 }
 0x93c   : > { %p2581_p10 = scmp.ne.s32.totalorder %s2579_s30, %s2580_s24  ;;  %p2586_p0 = scmp.lt.s32.totalorder %s2584_s29, %s2580_s24 }
 0x93e   : > { %p2582_p11 = pnand %p2581_p10, %p2793_p4  ;;  %p2587_p1 = por %p2586_p0, %p2585_p13 }
 0x940   : > { %p2583_p12 = pneg %p2582_p11 }
 0x942   : > { %p2588_p2 = pnand %p2587_p1, %p2583_p12 }
 0x9a2   : > { %v1988_v46 = vpop.xlane.xlu1 %1987 }
 0x9a3   : > { %v1989_v1 = vrot.slane %v1988_v46, 4 }
 0x9a5   : > { %v1990_v47 = vadd.f32 %v1989_v1, %v1988_v46 }
 0x9a7   : > { %v1991_v50 = vrot.slane %v1990_v47, 2 }
 0x9a9   : > { %v1992_v51 = vadd.f32 %v1991_v50, %v1990_v47 }
 0x9ab   : > { %v1993_v52 = vrot.slane %v1992_v51, 1 }
 0x9ad   : > { %v1994_v53 = vadd.f32 %v1993_v52, %v1992_v51 }
 0x9af   : > { %2310 = vpush %v1994_v53 }
 0x9e0   : > { %s2311_s22 = spop %2310 }
 0x9e1   : > { %v1996_v57 = vstv %s2311_s22 }
 0x9e2   : > { %v1997_v62 = vsel %vm1963_vm12, %v1996_v57, 0.0 }
 0x9e3   : > { %v1998_v63 = vadd.f32 %v1997_v62, %v1962_v61 }
 0x9e5   : > { %1999 = vst [vmem:[%s592_s15] sm:$0xff] %v1998_v63 }
 0x9e6   : > { %2591 = shalt.err (!%p2588_p2)
}
 0x9e7   : > { %2321 = dma.vmem_to_hbm [thread:$0]  (%p2793_p4), %s2037_s20, 128, %s2039_s23, %s2008_s21  }
 0x9e8 PF: > { %s3383_s18 = sld [smem:[#allocation21_spill]] }
 0x9e9   : > { %s3384_s2 = sld [smem:[#allocation18_spill]] }
 0x9ee   : > { %p2342_p3 = scmp.ge.s32.totalorder %s3383_s18, 2 }
 0x9ef   : > { %s2050_s26 = sand.u32 1, %s3384_s2  }
 0x9f0   : > { %p2332_p5 = pnand %p2342_p3, %p2800_p8  ;;  %s2051_s15 = scalar_lea.sflag [#allocation8], %s2050_s26 }
 0x9f2   : > { %p2333_p6 = pneg %p2332_p5 }
 0x9f4   : > { %2625 = dma.done.wait (%p2333_p6), %s2051_s15, 128  }
 0x9f5   : > { %2627 = vsyncadd (%p2333_p6), %s2051_s15, 4294967168  ;;  %s2061_s22 = scalar_lea.sflag [#allocation13], %s2050_s26 }
 0x9f6   : > { %2629 = dma.done.wait (%p2333_p6), %s2061_s22, 128  }
 0x9f7   : > { %2631 = vsyncadd (%p2333_p6), %s2061_s22, 4294967168  ;;  %s34_s23 = sadd.s32 1, %s3383_s18   ;;  %s3386_s28 = sld [smem:[#allocation19_spill]] }
 0x9f8   : > { %p31_p7 = scmp.ge.s32.totalorder %s34_s23, 4   ;;  %s3387_s20 = sld [smem:[#allocation24_spill]] }
 0x9f9   : > { %s3388_s21 = sld [smem:[#allocation20_spill]]  ;;  %s3390_s18 = smov %s2638_s19 }
 0x9fa   : > { %s3389_s22 = sld [smem:[#allocation22_spill]]  ;;  %33 = sbr.rel (!%p31_p7) target bundleno = 13 (0xd), region = 152 }
 0x9fd   : > { %s3391_s19 = smov %s3386_s28 }
 0x9ff   :  { %2067 = vsyncpa [#allocation7], 1 }
 0xa00   :  { %2069 = vsyncpa [#allocation7 + $0x1], 1 }
 0xa01   :  { %2070 = vsyncpa [#allocation10], 1 }
 0xa02   :  { %2071 = vsyncpa [#allocation8], 1 }
 0xa03   :  { %2073 = vsyncpa [#allocation8 + $0x1], 1 }
 0xa04   :  { %2074 = vsyncpa [#allocation13], 1 }
 0xa05   :  { %2076 = vsyncpa [#allocation13 + $0x1], 1 }

</bundles_post_ra>
